<compile_context>
chip_gen: v5e
topology: v5e:2x2
jax: 0.10.0
libtpu: 0.0.40
codegen_flags: <defaults>
</compile_context>

<pallas_src>
import functools

import jax
import jax.numpy as jnp
import numpy as np
from jax.experimental import pallas as pl
from jax.experimental.pallas import tpu as pltpu

EPS = 1e-5        # PyTorch nn.LayerNorm default eps
NEG_BIG = -1e30   # finite mask value: exp(NEG_BIG - m) underflows to exactly 0.0


# ----------------------------- in-kernel helpers -----------------------------
def _layernorm(x, g, b):
    mu = jnp.mean(x, axis=-1, keepdims=True)
    var = jnp.mean((x - mu) ** 2, axis=-1, keepdims=True)
    return (x - mu) * jax.lax.rsqrt(var + EPS) * g + b


def _gelu_exact(x):
    # PyTorch F.gelu default (erf-based, not tanh approximation)
    return 0.5 * x * (1.0 + jax.lax.erf(x * 0.7071067811865475))


# ------------------------------ fused kernel ----------------------------------
def fused_forward_kernel(
    # inputs
    x_ref,
    ln1_g_ref, ln1_b_ref, wqkv_ref, wout_ref, bout_ref,
    ln2_g_ref, ln2_b_ref, w1_ref, b1_ref, w2_ref, b2_ref,
    mw1_ref, mb1_ref, mw2_ref, mb2_ref, mw3_ref, mb3_ref,
    # output
    o_ref,
    *, depth, heads, dim_head, n_real, n_pad, dim):
    """Entire TabAttention forward for one batch tile; x stays 2-D (rows, D) in VMEM."""
    inner = heads * dim_head
    scale = dim_head ** (-0.5)
    rows = x_ref.shape[0]            # TB * n_pad (token-padded, batch-major rows)
    tb = rows // n_pad

    x = x_ref[...]                   # (rows, D) f32

    # Padding-key bias (tokens >= n_real were zero-padded in the wrapper). Built once.
    col = jax.lax.broadcasted_iota(jnp.int32, (1, n_pad, n_pad), 2)
    pad_bias = jnp.where(col < n_real, 0.0, NEG_BIG)          # (1, Np, Np) f32

    # TODO(synk): switch to lax.fori_loop over l (dynamic first-axis weight indexing)
    # once depth is large enough for the static unroll to hurt spills / compile time.
    for l in range(depth):
        # ---- PreNorm(Residual(Attention)): x = Attn(LN(x)) + LN(x) ----
        xn = _layernorm(x, ln1_g_ref[l], ln1_b_ref[l])                        # (rows, D)
        qkv = jnp.dot(xn, wqkv_ref[l], preferred_element_type=jnp.float32)    # (rows, 3*inner)
        qkv3 = qkv.reshape(tb, n_pad, 3 * inner)   # layout-trivial split (Np == 8)
        acc = None
        # TODO(synk): fold the 8 heads into one batched dot_general once the
        # lane-split relayout is verified to lower on all target generations.
        for h in range(heads):                      # statically unrolled, heads are tiny
            s = h * dim_head
            qh = qkv3[..., s:s + dim_head] * scale                    # scale folded into q
            kh = qkv3[..., inner + s:inner + s + dim_head]
            vh = qkv3[..., 2 * inner + s:2 * inner + s + dim_head]
            sim = jnp.einsum('bid,bjd->bij', qh, kh,
                             preferred_element_type=jnp.float32) + pad_bias   # (TB, Np, Np)
            m = jnp.max(sim, axis=-1, keepdims=True)
            e = jnp.exp(sim - m)
            p = e * pl.reciprocal(jnp.sum(e, axis=-1, keepdims=True), approx=True)
            hout = jnp.einsum('bij,bjd->bid', p, vh,
                              preferred_element_type=jnp.float32)             # (TB, Np, dh)
            # per-head output projection as a full-sublane 2-D matmul
            contrib = jnp.dot(hout.reshape(rows, dim_head), wout_ref[l, h],
                              preferred_element_type=jnp.float32)             # (rows, D)
            acc = contrib if acc is None else acc + contrib
        x = acc + bout_ref[l] + xn                  # residual adds LN(x)

        # ---- PreNorm(Residual(FeedForward)): x = FF(LN(x)) + LN(x) ----
        xn = _layernorm(x, ln2_g_ref[l], ln2_b_ref[l])
        hdn = jnp.dot(xn, w1_ref[l], preferred_element_type=jnp.float32) + b1_ref[l]
        half = 4 * dim
        gg = hdn[:, :half] * _gelu_exact(hdn[:, half:])                       # GEGLU
        y = jnp.dot(gg, w2_ref[l], preferred_element_type=jnp.float32) + b2_ref[l]
        x = y + xn

    # ---- final MLP on flatten(real tokens): flat @ W1 == sum_n x[:, n, :] @ W1[n] ----
    x3 = x.reshape(tb, n_pad, dim)                  # layout-trivial split
    acc = None
    for n in range(n_real):                         # padded tokens excluded
        c = jnp.dot(x3[:, n, :], mw1_ref[n], preferred_element_type=jnp.float32)
        acc = c if acc is None else acc + c
    h1 = acc + mb1_ref[...]
    h2 = jnp.dot(h1, mw2_ref[...], preferred_element_type=jnp.float32) + mb2_ref[...]
    out = jnp.dot(h2, mw3_ref[...], preferred_element_type=jnp.float32) + mb3_ref[...]
    o_ref[...] = out.astype(o_ref.dtype)


# --------------------------- parameter packing --------------------------------
def pack_params(params, *, heads, dim_head, n_tokens, dim):
    """One-time repack of natural per-layer params into the kernel's VMEM layout."""
    L = params['layers']

    def stack(getter):
        return jnp.stack([getter(l) for l in L], axis=0)

    packed = {
        'ln1_g': stack(lambda l: l['attn']['ln_g'].reshape(1, dim)),            # (depth, 1, D)
        'ln1_b': stack(lambda l: l['attn']['ln_b'].reshape(1, dim)),
        'wqkv':  stack(lambda l: l['attn']['w_qkv']),                           # (depth, D, 3*inner)
        'wout':  stack(lambda l: l['attn']['w_out'].reshape(heads, dim_head, dim)),  # (depth, H, dh, D)
        'bout':  stack(lambda l: l['attn']['b_out'].reshape(1, dim)),
        'ln2_g': stack(lambda l: l['ff']['ln_g'].reshape(1, dim)),
        'ln2_b': stack(lambda l: l['ff']['ln_b'].reshape(1, dim)),
        'w1':    stack(lambda l: l['ff']['w1']),                                # (depth, D, 8D)
        'b1':    stack(lambda l: l['ff']['b1'].reshape(1, -1)),
        'w2':    stack(lambda l: l['ff']['w2']),                                # (depth, 4D, D)
        'b2':    stack(lambda l: l['ff']['b2'].reshape(1, dim)),
    }
    m = params['mlp']
    h1 = m['w1'].shape[1]
    packed.update({
        'mw1': m['w1'].reshape(n_tokens, dim, h1),   # per-token slices of the flatten matmul
        'mb1': m['b1'].reshape(1, -1),
        'mw2': m['w2'],
        'mb2': m['b2'].reshape(1, -1),
        'mw3': m['w3'],
        'mb3': m['b3'].reshape(1, -1),
    })
    return packed


_WEIGHT_ORDER = ['ln1_g', 'ln1_b', 'wqkv', 'wout', 'bout',
                 'ln2_g', 'ln2_b', 'w1', 'b1', 'w2', 'b2',
                 'mw1', 'mb1', 'mw2', 'mb2', 'mw3', 'mb3']


def _pick_batch_tile(B, row_cap=512):
    """Largest multiple-of-8 tile <= row_cap giving >=2 (preferably even) grid steps.

    >=2 steps lets v7x shard the 'parallel' batch axis across its two TensorCores
    and gives the pipeline something to double-buffer; the row cap keeps the
    per-step VMEM working set well under v7x's 64 MiB share."""
    if B < 16:
        return B                      # tiny batch: one fat step (grid=(1,))
    cands = [tb for tb in range(8, min(row_cap, B // 2) + 1, 8) if B % tb == 0]
    if not cands:
        return B
    even = [tb for tb in cands if (B // tb) % 2 == 0]
    return max(even) if even else max(cands)


# ------------------------------- pallas wrapper --------------------------------
def tab_attention_forward(packed, x_categ, x_cont, x_categ_enc, x_cont_enc,
                          *, depth, heads, dim_head, dim, dim_out, batch_tile=None):
    """Single fused pallas_call for the whole forward (x_categ/x_cont unused on this path)."""
    B, n_categ, _ = x_categ_enc.shape
    n_cont = x_cont_enc.shape[1]
    n_real = n_categ + n_cont
    n_pad = max(8, ((n_real + 7) // 8) * 8)     # sublane-aligned token count

    # One-time HBM-side prep: concat + zero-pad tokens + collapse to 2-D rows.
    x = jnp.concatenate([x_categ_enc, x_cont_enc], axis=1).astype(jnp.float32)
    x = jnp.pad(x, ((0, 0), (0, n_pad - n_real), (0, 0)))
    x2 = x.reshape(B * n_pad, dim)              # batch-major rows

    TB = _pick_batch_tile(B) if batch_tile is None else batch_tile
    assert B % TB == 0 and (TB == B or TB % 8 == 0)
    grid = (B // TB,)

    weights = [packed[k] for k in _WEIGHT_ORDER]

    def full_spec(arr):
        nd = arr.ndim
        return pl.BlockSpec(arr.shape, lambda i, _nd=nd: (0,) * _nd)

    in_specs = [pl.BlockSpec((TB * n_pad, dim), lambda i: (i, 0))] \
        + [full_spec(w) for w in weights]

    kernel = functools.partial(
        fused_forward_kernel, depth=depth, heads=heads, dim_head=dim_head,
        n_real=n_real, n_pad=n_pad, dim=dim)

    return pl.pallas_call(
        kernel,
        grid=grid,
        out_shape=jax.ShapeDtypeStruct((B, dim_out), jnp.float32),
        in_specs=in_specs,
        out_specs=pl.BlockSpec((TB, dim_out), lambda i: (i, 0)),
        compiler_params=pltpu.CompilerParams(
            dimension_semantics=("parallel",),          # megacore sharding on v7x
            vmem_limit_bytes=32 * 1024 * 1024),          # explicit; safe on v5e/v6e/v7x
    )(x2, *weights)


# ------------------------------- param init -----------------------------------
def init_params(key, *, dim, heads, dim_head, depth, nfeats, dim_out,
                mlp_hidden_mults=(4, 2)):
    inner = heads * dim_head
    ks = iter(jax.random.split(key, depth * 4 + 4))

    def dense(k, fan_in, fan_out):
        return 0.02 * jax.random.normal(k, (fan_in, fan_out), jnp.float32)

    layers = []
    for _ in range(depth):
        attn = {
            'ln_g': jnp.ones((1, 1, dim), jnp.float32),
            'ln_b': jnp.zeros((1, 1, dim), jnp.float32),
            'w_qkv': dense(next(ks), dim, inner * 3),
            'w_out': dense(next(ks), inner, dim),
            'b_out': jnp.zeros((1, 1, dim), jnp.float32),
        }
        ff = {
            'ln_g': jnp.ones((1, 1, dim), jnp.float32),
            'ln_b': jnp.zeros((1, 1, dim), jnp.float32),
            'w1': dense(next(ks), dim, dim * 4 * 2),
            'b1': jnp.zeros((1, 1, dim * 4 * 2), jnp.float32),
            'w2': dense(next(ks), dim * 4, dim),
            'b2': jnp.zeros((1, 1, dim), jnp.float32),
        }
        layers.append({'attn': attn, 'ff': ff})

    input_size = dim * nfeats
    l = input_size // 8
    h1, h2 = l * mlp_hidden_mults[0], l * mlp_hidden_mults[1]
    mlp = {
        'w1': dense(next(ks), input_size, h1), 'b1': jnp.zeros((1, h1), jnp.float32),
        'w2': dense(next(ks), h1, h2),         'b2': jnp.zeros((1, h2), jnp.float32),
        'w3': dense(next(ks), h2, dim_out),    'b3': jnp.zeros((1, dim_out), jnp.float32),
    }
    return {'layers': layers, 'mlp': mlp}


# ------------------------------ pure-JAX reference -----------------------------
def reference_forward(params, x_categ_enc, x_cont_enc, *, heads, dim_head):
    x = jnp.concatenate([x_categ_enc, x_cont_enc], axis=1)
    inner = heads * dim_head
    for layer in params['layers']:
        a = layer['attn']
        xn = _layernorm(x, a['ln_g'], a['ln_b'])
        qkv = jnp.einsum('bnd,de->bne', xn, a['w_qkv'])
        q, k, v = qkv[..., :inner], qkv[..., inner:2 * inner], qkv[..., 2 * inner:]
        B, N, _ = q.shape
        q = q.reshape(B, N, heads, dim_head).transpose(0, 2, 1, 3)
        k = k.reshape(B, N, heads, dim_head).transpose(0, 2, 1, 3)
        v = v.reshape(B, N, heads, dim_head).transpose(0, 2, 1, 3)
        sim = jnp.einsum('bhid,bhjd->bhij', q, k) * (dim_head ** -0.5)
        attn = jax.nn.softmax(sim, axis=-1)
        out = jnp.einsum('bhij,bhjd->bhid', attn, v)
        out = out.transpose(0, 2, 1, 3).reshape(B, N, inner)
        x = jnp.einsum('bne,ed->bnd', out, a['w_out']) + a['b_out'] + xn

        f = layer['ff']
        xn = _layernorm(x, f['ln_g'], f['ln_b'])
        h = jnp.einsum('bnd,de->bne', xn, f['w1']) + f['b1']
        half = h.shape[-1] // 2
        gg = h[..., :half] * _gelu_exact(h[..., half:])
        x = jnp.einsum('bne,ed->bnd', gg, f['w2']) + f['b2'] + xn

    flat = x.reshape(x.shape[0], -1)
    m = params['mlp']
    h1 = flat @ m['w1'] + m['b1']
    h2 = h1 @ m['w2'] + m['b2']
    return h2 @ m['w3'] + m['b3']


# ----------------------------------- main --------------------------------------
if __name__ == "__main__":
    # small config consistent with the module
    categories = (3, 5, 4)        # -> num_categories = 3
    num_continuous = 2
    B = 2
    dim = 32
    depth = 2
    heads = 8
    dim_head = 16
    dim_out = 1
    nfeats = len(categories) + num_continuous   # 5

    key = jax.random.PRNGKey(0)
    k_par, k1, k2, k3, k4 = jax.random.split(key, 5)

    params = init_params(k_par, dim=dim, heads=heads, dim_head=dim_head,
                         depth=depth, nfeats=nfeats, dim_out=dim_out)
    packed = pack_params(params, heads=heads, dim_head=dim_head,
                         n_tokens=nfeats, dim=dim)

    # forward inputs (x_categ / x_cont are unused on this path but built for fidelity)
    x_categ = jax.random.randint(k1, (B, len(categories)), 0, 3)
    x_cont = jax.random.normal(k2, (B, num_continuous), jnp.float32)
    x_categ_enc = jax.random.normal(k3, (B, len(categories), dim), jnp.float32)
    x_cont_enc = jax.random.normal(k4, (B, num_continuous, dim), jnp.float32)

    out = tab_attention_forward(packed, x_categ, x_cont, x_categ_enc, x_cont_enc,
                                depth=depth, heads=heads, dim_head=dim_head,
                                dim=dim, dim_out=dim_out)
    out = jax.block_until_ready(out)

    ref = reference_forward(params, x_categ_enc, x_cont_enc,
                            heads=heads, dim_head=dim_head)
    np.testing.assert_allclose(np.asarray(out), np.asarray(ref), rtol=2e-3, atol=2e-3)

    print("KERNEL_OK")
</pallas_src>

<mosaic_0001>
module attributes {stable_mosaic.version = 11 : i64} {
  func.func @fused_forward_kernel(%arg0: i32, %arg1: memref<16x32xf32, #tpu.memory_space<vmem>>, %arg2: memref<2x1x32xf32, #tpu.memory_space<vmem>>, %arg3: memref<2x1x32xf32, #tpu.memory_space<vmem>>, %arg4: memref<2x32x384xf32, #tpu.memory_space<vmem>>, %arg5: memref<2x8x16x32xf32, #tpu.memory_space<vmem>>, %arg6: memref<2x1x32xf32, #tpu.memory_space<vmem>>, %arg7: memref<2x1x32xf32, #tpu.memory_space<vmem>>, %arg8: memref<2x1x32xf32, #tpu.memory_space<vmem>>, %arg9: memref<2x32x256xf32, #tpu.memory_space<vmem>>, %arg10: memref<2x1x256xf32, #tpu.memory_space<vmem>>, %arg11: memref<2x128x32xf32, #tpu.memory_space<vmem>>, %arg12: memref<2x1x32xf32, #tpu.memory_space<vmem>>, %arg13: memref<5x32x80xf32, #tpu.memory_space<vmem>>, %arg14: memref<1x80xf32, #tpu.memory_space<vmem>>, %arg15: memref<80x40xf32, #tpu.memory_space<vmem>>, %arg16: memref<1x40xf32, #tpu.memory_space<vmem>>, %arg17: memref<40x1xf32, #tpu.memory_space<vmem>>, %arg18: memref<1x1xf32, #tpu.memory_space<vmem>>, %arg19: memref<2x1xf32, #tpu.memory_space<vmem>>) attributes {dimension_semantics = [#tpu.dimension_semantics<parallel>], iteration_bounds = array<i64: 1>, scalar_prefetch = 0 : i64, scratch_operands = 0 : i64, tpu.core_type = #tpu.core_type<tc>, window_params = [{transform_indices = @transform_0, window_bounds = array<i64: 16, 32>}, {pipeline_mode = #tpu.pipeline_mode<synchronous>, transform_indices = @transform_1, window_bounds = array<i64: 2, 1, 32>}, {pipeline_mode = #tpu.pipeline_mode<synchronous>, transform_indices = @transform_2, window_bounds = array<i64: 2, 1, 32>}, {pipeline_mode = #tpu.pipeline_mode<synchronous>, transform_indices = @transform_3, window_bounds = array<i64: 2, 32, 384>}, {pipeline_mode = #tpu.pipeline_mode<synchronous>, transform_indices = @transform_4, window_bounds = array<i64: 2, 8, 16, 32>}, {pipeline_mode = #tpu.pipeline_mode<synchronous>, transform_indices = @transform_5, window_bounds = array<i64: 2, 1, 32>}, {pipeline_mode = #tpu.pipeline_mode<synchronous>, transform_indices = @transform_6, window_bounds = array<i64: 2, 1, 32>}, {pipeline_mode = #tpu.pipeline_mode<synchronous>, transform_indices = @transform_7, window_bounds = array<i64: 2, 1, 32>}, {pipeline_mode = #tpu.pipeline_mode<synchronous>, transform_indices = @transform_8, window_bounds = array<i64: 2, 32, 256>}, {pipeline_mode = #tpu.pipeline_mode<synchronous>, transform_indices = @transform_9, window_bounds = array<i64: 2, 1, 256>}, {pipeline_mode = #tpu.pipeline_mode<synchronous>, transform_indices = @transform_10, window_bounds = array<i64: 2, 128, 32>}, {pipeline_mode = #tpu.pipeline_mode<synchronous>, transform_indices = @transform_11, window_bounds = array<i64: 2, 1, 32>}, {pipeline_mode = #tpu.pipeline_mode<synchronous>, transform_indices = @transform_12, window_bounds = array<i64: 5, 32, 80>}, {pipeline_mode = #tpu.pipeline_mode<synchronous>, transform_indices = @transform_13, window_bounds = array<i64: 1, 80>}, {pipeline_mode = #tpu.pipeline_mode<synchronous>, transform_indices = @transform_14, window_bounds = array<i64: 80, 40>}, {pipeline_mode = #tpu.pipeline_mode<synchronous>, transform_indices = @transform_15, window_bounds = array<i64: 1, 40>}, {pipeline_mode = #tpu.pipeline_mode<synchronous>, transform_indices = @transform_16, window_bounds = array<i64: 40, 1>}, {pipeline_mode = #tpu.pipeline_mode<synchronous>, transform_indices = @transform_17, window_bounds = array<i64: 1, 1>}, {transform_indices = @transform_18, window_bounds = array<i64: 2, 1>}]} {
    %c0 = arith.constant 0 : index
    %c0_0 = arith.constant 0 : index
    %0 = vector.load %arg1[%c0, %c0_0] : memref<16x32xf32, #tpu.memory_space<vmem>>, vector<16x32xf32>
    %1 = tpu.iota {dimensions = array<i32: 2>} : vector<1x8x8xi32>
    %c5_i32 = arith.constant 5 : i32
    %2 = vector.broadcast %c5_i32 : i32 to vector<1x8x8xi32>
    %3 = arith.cmpi slt, %1, %2 : vector<1x8x8xi32>
    %cst = arith.constant 0.000000e+00 : f32
    %cst_1 = arith.constant -1.000000e+30 : f32
    %4 = vector.broadcast %cst : f32 to vector<1x8x8xf32>
    %5 = vector.broadcast %cst_1 : f32 to vector<1x8x8xf32>
    %6 = arith.select %3, %4, %5 : vector<1x8x8xi1>, vector<1x8x8xf32>
    %c0_2 = arith.constant 0 : index
    %c0_3 = arith.constant 0 : index
    %c0_4 = arith.constant 0 : index
    %7 = vector.load %arg2[%c0_2, %c0_3, %c0_4] : memref<2x1x32xf32, #tpu.memory_space<vmem>>, vector<1x1x32xf32>
    %8 = vector.shape_cast %7 : vector<1x1x32xf32> to vector<1x32xf32>
    %c0_5 = arith.constant 0 : index
    %c0_6 = arith.constant 0 : index
    %c0_7 = arith.constant 0 : index
    %9 = vector.load %arg3[%c0_5, %c0_6, %c0_7] : memref<2x1x32xf32, #tpu.memory_space<vmem>>, vector<1x1x32xf32>
    %10 = vector.shape_cast %9 : vector<1x1x32xf32> to vector<1x32xf32>
    %cst_8 = arith.constant dense<0.000000e+00> : vector<16xf32>
    %11 = vector.multi_reduction <add>, %0, %cst_8 [1] : vector<16x32xf32> to vector<16xf32>
    %12 = vector.shape_cast %11 : vector<16xf32> to vector<16x1xf32>
    %cst_9 = arith.constant 3.200000e+01 : f32
    %13 = vector.broadcast %cst_9 : f32 to vector<16x1xf32>
    %14 = arith.divf %12, %13 : vector<16x1xf32>
    %15 = vector.broadcast %14 : vector<16x1xf32> to vector<16x32xf32>
    %16 = arith.subf %0, %15 : vector<16x32xf32>
    %17 = arith.mulf %16, %16 : vector<16x32xf32>
    %cst_10 = arith.constant dense<0.000000e+00> : vector<16xf32>
    %18 = vector.multi_reduction <add>, %17, %cst_10 [1] : vector<16x32xf32> to vector<16xf32>
    %19 = vector.shape_cast %18 : vector<16xf32> to vector<16x1xf32>
    %cst_11 = arith.constant 3.200000e+01 : f32
    %20 = vector.broadcast %cst_11 : f32 to vector<16x1xf32>
    %21 = arith.divf %19, %20 : vector<16x1xf32>
    %22 = vector.broadcast %14 : vector<16x1xf32> to vector<16x32xf32>
    %23 = arith.subf %0, %22 : vector<16x32xf32>
    %cst_12 = arith.constant 9.99999974E-6 : f32
    %24 = vector.broadcast %cst_12 : f32 to vector<16x1xf32>
    %25 = arith.addf %21, %24 : vector<16x1xf32>
    %26 = math.rsqrt %25 : vector<16x1xf32>
    %27 = vector.broadcast %26 : vector<16x1xf32> to vector<16x32xf32>
    %28 = arith.mulf %23, %27 : vector<16x32xf32>
    %29 = vector.broadcast %8 : vector<1x32xf32> to vector<16x32xf32>
    %30 = arith.mulf %28, %29 : vector<16x32xf32>
    %31 = vector.broadcast %10 : vector<1x32xf32> to vector<16x32xf32>
    %32 = arith.addf %30, %31 : vector<16x32xf32>
    %c0_13 = arith.constant 0 : index
    %c0_14 = arith.constant 0 : index
    %c0_15 = arith.constant 0 : index
    %33 = vector.load %arg4[%c0_13, %c0_14, %c0_15] : memref<2x32x384xf32, #tpu.memory_space<vmem>>, vector<1x32x384xf32>
    %34 = vector.shape_cast %33 : vector<1x32x384xf32> to vector<32x384xf32>
    %cst_16 = arith.constant dense<0.000000e+00> : vector<16x384xf32>
    %35 = tpu.matmul %32, %34, %cst_16 {dimension_numbers = #tpu.dot_dimension_numbers<[1], [0], [0], [1], [0, 0, 1, 1], [], []>} : vector<16x32xf32>, vector<32x384xf32>, vector<16x384xf32> -> vector<16x384xf32>
    %36 = vector.shape_cast %35 : vector<16x384xf32> to vector<2x8x384xf32>
    %37 = vector.extract_strided_slice %36 {offsets = [0, 0, 0], sizes = [2, 8, 16], strides = [1, 1, 1]} : vector<2x8x384xf32> to vector<2x8x16xf32>
    %cst_17 = arith.constant 2.500000e-01 : f32
    %38 = vector.broadcast %cst_17 : f32 to vector<2x8x16xf32>
    %39 = arith.mulf %37, %38 : vector<2x8x16xf32>
    %40 = vector.extract_strided_slice %36 {offsets = [0, 0, 128], sizes = [2, 8, 16], strides = [1, 1, 1]} : vector<2x8x384xf32> to vector<2x8x16xf32>
    %41 = vector.extract_strided_slice %36 {offsets = [0, 0, 256], sizes = [2, 8, 16], strides = [1, 1, 1]} : vector<2x8x384xf32> to vector<2x8x16xf32>
    "tpu.trace_start"() <{level = 10 : i32, message = "bid,bjd->bij"}> : () -> ()
    %cst_18 = arith.constant dense<0.000000e+00> : vector<2x8x8xf32>
    %42 = tpu.matmul %39, %40, %cst_18 {dimension_numbers = #tpu.dot_dimension_numbers<[2], [2], [1], [1], [0, 0, 0, 1, 1, 1], [0], [0]>} : vector<2x8x16xf32>, vector<2x8x16xf32>, vector<2x8x8xf32> -> vector<2x8x8xf32>
    "tpu.trace_stop"() : () -> ()
    %43 = vector.broadcast %6 : vector<1x8x8xf32> to vector<2x8x8xf32>
    %44 = arith.addf %42, %43 : vector<2x8x8xf32>
    %cst_19 = arith.constant dense<0xFF800000> : vector<2x8xf32>
    %45 = vector.multi_reduction <maximumf>, %44, %cst_19 [2] : vector<2x8x8xf32> to vector<2x8xf32>
    %46 = vector.shape_cast %45 : vector<2x8xf32> to vector<2x8x1xf32>
    %47 = vector.broadcast %46 : vector<2x8x1xf32> to vector<2x8x8xf32>
    %48 = arith.subf %44, %47 : vector<2x8x8xf32>
    %49 = math.exp %48 : vector<2x8x8xf32>
    %cst_20 = arith.constant dense<0.000000e+00> : vector<2x8xf32>
    %50 = vector.multi_reduction <add>, %49, %cst_20 [2] : vector<2x8x8xf32> to vector<2x8xf32>
    %51 = vector.shape_cast %50 : vector<2x8xf32> to vector<2x8x1xf32>
    %52 = tpu.reciprocal %51 {approx = true} : vector<2x8x1xf32> -> vector<2x8x1xf32>
    %53 = vector.broadcast %52 : vector<2x8x1xf32> to vector<2x8x8xf32>
    %54 = arith.mulf %49, %53 : vector<2x8x8xf32>
    "tpu.trace_start"() <{level = 10 : i32, message = "bij,bjd->bid"}> : () -> ()
    %cst_21 = arith.constant dense<0.000000e+00> : vector<2x8x16xf32>
    %55 = tpu.matmul %54, %41, %cst_21 {dimension_numbers = #tpu.dot_dimension_numbers<[2], [1], [1], [2], [0, 0, 0, 1, 1, 2], [0], [0]>} : vector<2x8x8xf32>, vector<2x8x16xf32>, vector<2x8x16xf32> -> vector<2x8x16xf32>
    "tpu.trace_stop"() : () -> ()
    %56 = vector.shape_cast %55 : vector<2x8x16xf32> to vector<16x16xf32>
    %c0_22 = arith.constant 0 : index
    %c0_23 = arith.constant 0 : index
    %c0_24 = arith.constant 0 : index
    %c0_25 = arith.constant 0 : index
    %57 = vector.load %arg5[%c0_22, %c0_23, %c0_24, %c0_25] : memref<2x8x16x32xf32, #tpu.memory_space<vmem>>, vector<1x1x16x32xf32>
    %58 = vector.shape_cast %57 : vector<1x1x16x32xf32> to vector<16x32xf32>
    %cst_26 = arith.constant dense<0.000000e+00> : vector<16x32xf32>
    %59 = tpu.matmul %56, %58, %cst_26 {dimension_numbers = #tpu.dot_dimension_numbers<[1], [0], [0], [1], [0, 0, 1, 1], [], []>} : vector<16x16xf32>, vector<16x32xf32>, vector<16x32xf32> -> vector<16x32xf32>
    %60 = vector.extract_strided_slice %36 {offsets = [0, 0, 16], sizes = [2, 8, 16], strides = [1, 1, 1]} : vector<2x8x384xf32> to vector<2x8x16xf32>
    %cst_27 = arith.constant 2.500000e-01 : f32
    %61 = vector.broadcast %cst_27 : f32 to vector<2x8x16xf32>
    %62 = arith.mulf %60, %61 : vector<2x8x16xf32>
    %63 = vector.extract_strided_slice %36 {offsets = [0, 0, 144], sizes = [2, 8, 16], strides = [1, 1, 1]} : vector<2x8x384xf32> to vector<2x8x16xf32>
    %64 = vector.extract_strided_slice %36 {offsets = [0, 0, 272], sizes = [2, 8, 16], strides = [1, 1, 1]} : vector<2x8x384xf32> to vector<2x8x16xf32>
    "tpu.trace_start"() <{level = 10 : i32, message = "bid,bjd->bij"}> : () -> ()
    %cst_28 = arith.constant dense<0.000000e+00> : vector<2x8x8xf32>
    %65 = tpu.matmul %62, %63, %cst_28 {dimension_numbers = #tpu.dot_dimension_numbers<[2], [2], [1], [1], [0, 0, 0, 1, 1, 1], [0], [0]>} : vector<2x8x16xf32>, vector<2x8x16xf32>, vector<2x8x8xf32> -> vector<2x8x8xf32>
    "tpu.trace_stop"() : () -> ()
    %66 = vector.broadcast %6 : vector<1x8x8xf32> to vector<2x8x8xf32>
    %67 = arith.addf %65, %66 : vector<2x8x8xf32>
    %cst_29 = arith.constant dense<0xFF800000> : vector<2x8xf32>
    %68 = vector.multi_reduction <maximumf>, %67, %cst_29 [2] : vector<2x8x8xf32> to vector<2x8xf32>
    %69 = vector.shape_cast %68 : vector<2x8xf32> to vector<2x8x1xf32>
    %70 = vector.broadcast %69 : vector<2x8x1xf32> to vector<2x8x8xf32>
    %71 = arith.subf %67, %70 : vector<2x8x8xf32>
    %72 = math.exp %71 : vector<2x8x8xf32>
    %cst_30 = arith.constant dense<0.000000e+00> : vector<2x8xf32>
    %73 = vector.multi_reduction <add>, %72, %cst_30 [2] : vector<2x8x8xf32> to vector<2x8xf32>
    %74 = vector.shape_cast %73 : vector<2x8xf32> to vector<2x8x1xf32>
    %75 = tpu.reciprocal %74 {approx = true} : vector<2x8x1xf32> -> vector<2x8x1xf32>
    %76 = vector.broadcast %75 : vector<2x8x1xf32> to vector<2x8x8xf32>
    %77 = arith.mulf %72, %76 : vector<2x8x8xf32>
    "tpu.trace_start"() <{level = 10 : i32, message = "bij,bjd->bid"}> : () -> ()
    %cst_31 = arith.constant dense<0.000000e+00> : vector<2x8x16xf32>
    %78 = tpu.matmul %77, %64, %cst_31 {dimension_numbers = #tpu.dot_dimension_numbers<[2], [1], [1], [2], [0, 0, 0, 1, 1, 2], [0], [0]>} : vector<2x8x8xf32>, vector<2x8x16xf32>, vector<2x8x16xf32> -> vector<2x8x16xf32>
    "tpu.trace_stop"() : () -> ()
    %79 = vector.shape_cast %78 : vector<2x8x16xf32> to vector<16x16xf32>
    %c0_32 = arith.constant 0 : index
    %c1 = arith.constant 1 : index
    %c0_33 = arith.constant 0 : index
    %c0_34 = arith.constant 0 : index
    %80 = vector.load %arg5[%c0_32, %c1, %c0_33, %c0_34] : memref<2x8x16x32xf32, #tpu.memory_space<vmem>>, vector<1x1x16x32xf32>
    %81 = vector.shape_cast %80 : vector<1x1x16x32xf32> to vector<16x32xf32>
    %cst_35 = arith.constant dense<0.000000e+00> : vector<16x32xf32>
    %82 = tpu.matmul %79, %81, %cst_35 {dimension_numbers = #tpu.dot_dimension_numbers<[1], [0], [0], [1], [0, 0, 1, 1], [], []>} : vector<16x16xf32>, vector<16x32xf32>, vector<16x32xf32> -> vector<16x32xf32>
    %83 = arith.addf %59, %82 : vector<16x32xf32>
    %84 = vector.extract_strided_slice %36 {offsets = [0, 0, 32], sizes = [2, 8, 16], strides = [1, 1, 1]} : vector<2x8x384xf32> to vector<2x8x16xf32>
    %cst_36 = arith.constant 2.500000e-01 : f32
    %85 = vector.broadcast %cst_36 : f32 to vector<2x8x16xf32>
    %86 = arith.mulf %84, %85 : vector<2x8x16xf32>
    %87 = vector.extract_strided_slice %36 {offsets = [0, 0, 160], sizes = [2, 8, 16], strides = [1, 1, 1]} : vector<2x8x384xf32> to vector<2x8x16xf32>
    %88 = vector.extract_strided_slice %36 {offsets = [0, 0, 288], sizes = [2, 8, 16], strides = [1, 1, 1]} : vector<2x8x384xf32> to vector<2x8x16xf32>
    "tpu.trace_start"() <{level = 10 : i32, message = "bid,bjd->bij"}> : () -> ()
    %cst_37 = arith.constant dense<0.000000e+00> : vector<2x8x8xf32>
    %89 = tpu.matmul %86, %87, %cst_37 {dimension_numbers = #tpu.dot_dimension_numbers<[2], [2], [1], [1], [0, 0, 0, 1, 1, 1], [0], [0]>} : vector<2x8x16xf32>, vector<2x8x16xf32>, vector<2x8x8xf32> -> vector<2x8x8xf32>
    "tpu.trace_stop"() : () -> ()
    %90 = vector.broadcast %6 : vector<1x8x8xf32> to vector<2x8x8xf32>
    %91 = arith.addf %89, %90 : vector<2x8x8xf32>
    %cst_38 = arith.constant dense<0xFF800000> : vector<2x8xf32>
    %92 = vector.multi_reduction <maximumf>, %91, %cst_38 [2] : vector<2x8x8xf32> to vector<2x8xf32>
    %93 = vector.shape_cast %92 : vector<2x8xf32> to vector<2x8x1xf32>
    %94 = vector.broadcast %93 : vector<2x8x1xf32> to vector<2x8x8xf32>
    %95 = arith.subf %91, %94 : vector<2x8x8xf32>
    %96 = math.exp %95 : vector<2x8x8xf32>
    %cst_39 = arith.constant dense<0.000000e+00> : vector<2x8xf32>
    %97 = vector.multi_reduction <add>, %96, %cst_39 [2] : vector<2x8x8xf32> to vector<2x8xf32>
    %98 = vector.shape_cast %97 : vector<2x8xf32> to vector<2x8x1xf32>
    %99 = tpu.reciprocal %98 {approx = true} : vector<2x8x1xf32> -> vector<2x8x1xf32>
    %100 = vector.broadcast %99 : vector<2x8x1xf32> to vector<2x8x8xf32>
    %101 = arith.mulf %96, %100 : vector<2x8x8xf32>
    "tpu.trace_start"() <{level = 10 : i32, message = "bij,bjd->bid"}> : () -> ()
    %cst_40 = arith.constant dense<0.000000e+00> : vector<2x8x16xf32>
    %102 = tpu.matmul %101, %88, %cst_40 {dimension_numbers = #tpu.dot_dimension_numbers<[2], [1], [1], [2], [0, 0, 0, 1, 1, 2], [0], [0]>} : vector<2x8x8xf32>, vector<2x8x16xf32>, vector<2x8x16xf32> -> vector<2x8x16xf32>
    "tpu.trace_stop"() : () -> ()
    %103 = vector.shape_cast %102 : vector<2x8x16xf32> to vector<16x16xf32>
    %c0_41 = arith.constant 0 : index
    %c2 = arith.constant 2 : index
    %c0_42 = arith.constant 0 : index
    %c0_43 = arith.constant 0 : index
    %104 = vector.load %arg5[%c0_41, %c2, %c0_42, %c0_43] : memref<2x8x16x32xf32, #tpu.memory_space<vmem>>, vector<1x1x16x32xf32>
    %105 = vector.shape_cast %104 : vector<1x1x16x32xf32> to vector<16x32xf32>
    %cst_44 = arith.constant dense<0.000000e+00> : vector<16x32xf32>
    %106 = tpu.matmul %103, %105, %cst_44 {dimension_numbers = #tpu.dot_dimension_numbers<[1], [0], [0], [1], [0, 0, 1, 1], [], []>} : vector<16x16xf32>, vector<16x32xf32>, vector<16x32xf32> -> vector<16x32xf32>
    %107 = arith.addf %83, %106 : vector<16x32xf32>
    %108 = vector.extract_strided_slice %36 {offsets = [0, 0, 48], sizes = [2, 8, 16], strides = [1, 1, 1]} : vector<2x8x384xf32> to vector<2x8x16xf32>
    %cst_45 = arith.constant 2.500000e-01 : f32
    %109 = vector.broadcast %cst_45 : f32 to vector<2x8x16xf32>
    %110 = arith.mulf %108, %109 : vector<2x8x16xf32>
    %111 = vector.extract_strided_slice %36 {offsets = [0, 0, 176], sizes = [2, 8, 16], strides = [1, 1, 1]} : vector<2x8x384xf32> to vector<2x8x16xf32>
    %112 = vector.extract_strided_slice %36 {offsets = [0, 0, 304], sizes = [2, 8, 16], strides = [1, 1, 1]} : vector<2x8x384xf32> to vector<2x8x16xf32>
    "tpu.trace_start"() <{level = 10 : i32, message = "bid,bjd->bij"}> : () -> ()
    %cst_46 = arith.constant dense<0.000000e+00> : vector<2x8x8xf32>
    %113 = tpu.matmul %110, %111, %cst_46 {dimension_numbers = #tpu.dot_dimension_numbers<[2], [2], [1], [1], [0, 0, 0, 1, 1, 1], [0], [0]>} : vector<2x8x16xf32>, vector<2x8x16xf32>, vector<2x8x8xf32> -> vector<2x8x8xf32>
    "tpu.trace_stop"() : () -> ()
    %114 = vector.broadcast %6 : vector<1x8x8xf32> to vector<2x8x8xf32>
    %115 = arith.addf %113, %114 : vector<2x8x8xf32>
    %cst_47 = arith.constant dense<0xFF800000> : vector<2x8xf32>
    %116 = vector.multi_reduction <maximumf>, %115, %cst_47 [2] : vector<2x8x8xf32> to vector<2x8xf32>
    %117 = vector.shape_cast %116 : vector<2x8xf32> to vector<2x8x1xf32>
    %118 = vector.broadcast %117 : vector<2x8x1xf32> to vector<2x8x8xf32>
    %119 = arith.subf %115, %118 : vector<2x8x8xf32>
    %120 = math.exp %119 : vector<2x8x8xf32>
    %cst_48 = arith.constant dense<0.000000e+00> : vector<2x8xf32>
    %121 = vector.multi_reduction <add>, %120, %cst_48 [2] : vector<2x8x8xf32> to vector<2x8xf32>
    %122 = vector.shape_cast %121 : vector<2x8xf32> to vector<2x8x1xf32>
    %123 = tpu.reciprocal %122 {approx = true} : vector<2x8x1xf32> -> vector<2x8x1xf32>
    %124 = vector.broadcast %123 : vector<2x8x1xf32> to vector<2x8x8xf32>
    %125 = arith.mulf %120, %124 : vector<2x8x8xf32>
    "tpu.trace_start"() <{level = 10 : i32, message = "bij,bjd->bid"}> : () -> ()
    %cst_49 = arith.constant dense<0.000000e+00> : vector<2x8x16xf32>
    %126 = tpu.matmul %125, %112, %cst_49 {dimension_numbers = #tpu.dot_dimension_numbers<[2], [1], [1], [2], [0, 0, 0, 1, 1, 2], [0], [0]>} : vector<2x8x8xf32>, vector<2x8x16xf32>, vector<2x8x16xf32> -> vector<2x8x16xf32>
    "tpu.trace_stop"() : () -> ()
    %127 = vector.shape_cast %126 : vector<2x8x16xf32> to vector<16x16xf32>
    %c0_50 = arith.constant 0 : index
    %c3 = arith.constant 3 : index
    %c0_51 = arith.constant 0 : index
    %c0_52 = arith.constant 0 : index
    %128 = vector.load %arg5[%c0_50, %c3, %c0_51, %c0_52] : memref<2x8x16x32xf32, #tpu.memory_space<vmem>>, vector<1x1x16x32xf32>
    %129 = vector.shape_cast %128 : vector<1x1x16x32xf32> to vector<16x32xf32>
    %cst_53 = arith.constant dense<0.000000e+00> : vector<16x32xf32>
    %130 = tpu.matmul %127, %129, %cst_53 {dimension_numbers = #tpu.dot_dimension_numbers<[1], [0], [0], [1], [0, 0, 1, 1], [], []>} : vector<16x16xf32>, vector<16x32xf32>, vector<16x32xf32> -> vector<16x32xf32>
    %131 = arith.addf %107, %130 : vector<16x32xf32>
    %132 = vector.extract_strided_slice %36 {offsets = [0, 0, 64], sizes = [2, 8, 16], strides = [1, 1, 1]} : vector<2x8x384xf32> to vector<2x8x16xf32>
    %cst_54 = arith.constant 2.500000e-01 : f32
    %133 = vector.broadcast %cst_54 : f32 to vector<2x8x16xf32>
    %134 = arith.mulf %132, %133 : vector<2x8x16xf32>
    %135 = vector.extract_strided_slice %36 {offsets = [0, 0, 192], sizes = [2, 8, 16], strides = [1, 1, 1]} : vector<2x8x384xf32> to vector<2x8x16xf32>
    %136 = vector.extract_strided_slice %36 {offsets = [0, 0, 320], sizes = [2, 8, 16], strides = [1, 1, 1]} : vector<2x8x384xf32> to vector<2x8x16xf32>
    "tpu.trace_start"() <{level = 10 : i32, message = "bid,bjd->bij"}> : () -> ()
    %cst_55 = arith.constant dense<0.000000e+00> : vector<2x8x8xf32>
    %137 = tpu.matmul %134, %135, %cst_55 {dimension_numbers = #tpu.dot_dimension_numbers<[2], [2], [1], [1], [0, 0, 0, 1, 1, 1], [0], [0]>} : vector<2x8x16xf32>, vector<2x8x16xf32>, vector<2x8x8xf32> -> vector<2x8x8xf32>
    "tpu.trace_stop"() : () -> ()
    %138 = vector.broadcast %6 : vector<1x8x8xf32> to vector<2x8x8xf32>
    %139 = arith.addf %137, %138 : vector<2x8x8xf32>
    %cst_56 = arith.constant dense<0xFF800000> : vector<2x8xf32>
    %140 = vector.multi_reduction <maximumf>, %139, %cst_56 [2] : vector<2x8x8xf32> to vector<2x8xf32>
    %141 = vector.shape_cast %140 : vector<2x8xf32> to vector<2x8x1xf32>
    %142 = vector.broadcast %141 : vector<2x8x1xf32> to vector<2x8x8xf32>
    %143 = arith.subf %139, %142 : vector<2x8x8xf32>
    %144 = math.exp %143 : vector<2x8x8xf32>
    %cst_57 = arith.constant dense<0.000000e+00> : vector<2x8xf32>
    %145 = vector.multi_reduction <add>, %144, %cst_57 [2] : vector<2x8x8xf32> to vector<2x8xf32>
    %146 = vector.shape_cast %145 : vector<2x8xf32> to vector<2x8x1xf32>
    %147 = tpu.reciprocal %146 {approx = true} : vector<2x8x1xf32> -> vector<2x8x1xf32>
    %148 = vector.broadcast %147 : vector<2x8x1xf32> to vector<2x8x8xf32>
    %149 = arith.mulf %144, %148 : vector<2x8x8xf32>
    "tpu.trace_start"() <{level = 10 : i32, message = "bij,bjd->bid"}> : () -> ()
    %cst_58 = arith.constant dense<0.000000e+00> : vector<2x8x16xf32>
    %150 = tpu.matmul %149, %136, %cst_58 {dimension_numbers = #tpu.dot_dimension_numbers<[2], [1], [1], [2], [0, 0, 0, 1, 1, 2], [0], [0]>} : vector<2x8x8xf32>, vector<2x8x16xf32>, vector<2x8x16xf32> -> vector<2x8x16xf32>
    "tpu.trace_stop"() : () -> ()
    %151 = vector.shape_cast %150 : vector<2x8x16xf32> to vector<16x16xf32>
    %c0_59 = arith.constant 0 : index
    %c4 = arith.constant 4 : index
    %c0_60 = arith.constant 0 : index
    %c0_61 = arith.constant 0 : index
    %152 = vector.load %arg5[%c0_59, %c4, %c0_60, %c0_61] : memref<2x8x16x32xf32, #tpu.memory_space<vmem>>, vector<1x1x16x32xf32>
    %153 = vector.shape_cast %152 : vector<1x1x16x32xf32> to vector<16x32xf32>
    %cst_62 = arith.constant dense<0.000000e+00> : vector<16x32xf32>
    %154 = tpu.matmul %151, %153, %cst_62 {dimension_numbers = #tpu.dot_dimension_numbers<[1], [0], [0], [1], [0, 0, 1, 1], [], []>} : vector<16x16xf32>, vector<16x32xf32>, vector<16x32xf32> -> vector<16x32xf32>
    %155 = arith.addf %131, %154 : vector<16x32xf32>
    %156 = vector.extract_strided_slice %36 {offsets = [0, 0, 80], sizes = [2, 8, 16], strides = [1, 1, 1]} : vector<2x8x384xf32> to vector<2x8x16xf32>
    %cst_63 = arith.constant 2.500000e-01 : f32
    %157 = vector.broadcast %cst_63 : f32 to vector<2x8x16xf32>
    %158 = arith.mulf %156, %157 : vector<2x8x16xf32>
    %159 = vector.extract_strided_slice %36 {offsets = [0, 0, 208], sizes = [2, 8, 16], strides = [1, 1, 1]} : vector<2x8x384xf32> to vector<2x8x16xf32>
    %160 = vector.extract_strided_slice %36 {offsets = [0, 0, 336], sizes = [2, 8, 16], strides = [1, 1, 1]} : vector<2x8x384xf32> to vector<2x8x16xf32>
    "tpu.trace_start"() <{level = 10 : i32, message = "bid,bjd->bij"}> : () -> ()
    %cst_64 = arith.constant dense<0.000000e+00> : vector<2x8x8xf32>
    %161 = tpu.matmul %158, %159, %cst_64 {dimension_numbers = #tpu.dot_dimension_numbers<[2], [2], [1], [1], [0, 0, 0, 1, 1, 1], [0], [0]>} : vector<2x8x16xf32>, vector<2x8x16xf32>, vector<2x8x8xf32> -> vector<2x8x8xf32>
    "tpu.trace_stop"() : () -> ()
    %162 = vector.broadcast %6 : vector<1x8x8xf32> to vector<2x8x8xf32>
    %163 = arith.addf %161, %162 : vector<2x8x8xf32>
    %cst_65 = arith.constant dense<0xFF800000> : vector<2x8xf32>
    %164 = vector.multi_reduction <maximumf>, %163, %cst_65 [2] : vector<2x8x8xf32> to vector<2x8xf32>
    %165 = vector.shape_cast %164 : vector<2x8xf32> to vector<2x8x1xf32>
    %166 = vector.broadcast %165 : vector<2x8x1xf32> to vector<2x8x8xf32>
    %167 = arith.subf %163, %166 : vector<2x8x8xf32>
    %168 = math.exp %167 : vector<2x8x8xf32>
    %cst_66 = arith.constant dense<0.000000e+00> : vector<2x8xf32>
    %169 = vector.multi_reduction <add>, %168, %cst_66 [2] : vector<2x8x8xf32> to vector<2x8xf32>
    %170 = vector.shape_cast %169 : vector<2x8xf32> to vector<2x8x1xf32>
    %171 = tpu.reciprocal %170 {approx = true} : vector<2x8x1xf32> -> vector<2x8x1xf32>
    %172 = vector.broadcast %171 : vector<2x8x1xf32> to vector<2x8x8xf32>
    %173 = arith.mulf %168, %172 : vector<2x8x8xf32>
    "tpu.trace_start"() <{level = 10 : i32, message = "bij,bjd->bid"}> : () -> ()
    %cst_67 = arith.constant dense<0.000000e+00> : vector<2x8x16xf32>
    %174 = tpu.matmul %173, %160, %cst_67 {dimension_numbers = #tpu.dot_dimension_numbers<[2], [1], [1], [2], [0, 0, 0, 1, 1, 2], [0], [0]>} : vector<2x8x8xf32>, vector<2x8x16xf32>, vector<2x8x16xf32> -> vector<2x8x16xf32>
    "tpu.trace_stop"() : () -> ()
    %175 = vector.shape_cast %174 : vector<2x8x16xf32> to vector<16x16xf32>
    %c0_68 = arith.constant 0 : index
    %c5 = arith.constant 5 : index
    %c0_69 = arith.constant 0 : index
    %c0_70 = arith.constant 0 : index
    %176 = vector.load %arg5[%c0_68, %c5, %c0_69, %c0_70] : memref<2x8x16x32xf32, #tpu.memory_space<vmem>>, vector<1x1x16x32xf32>
    %177 = vector.shape_cast %176 : vector<1x1x16x32xf32> to vector<16x32xf32>
    %cst_71 = arith.constant dense<0.000000e+00> : vector<16x32xf32>
    %178 = tpu.matmul %175, %177, %cst_71 {dimension_numbers = #tpu.dot_dimension_numbers<[1], [0], [0], [1], [0, 0, 1, 1], [], []>} : vector<16x16xf32>, vector<16x32xf32>, vector<16x32xf32> -> vector<16x32xf32>
    %179 = arith.addf %155, %178 : vector<16x32xf32>
    %180 = vector.extract_strided_slice %36 {offsets = [0, 0, 96], sizes = [2, 8, 16], strides = [1, 1, 1]} : vector<2x8x384xf32> to vector<2x8x16xf32>
    %cst_72 = arith.constant 2.500000e-01 : f32
    %181 = vector.broadcast %cst_72 : f32 to vector<2x8x16xf32>
    %182 = arith.mulf %180, %181 : vector<2x8x16xf32>
    %183 = vector.extract_strided_slice %36 {offsets = [0, 0, 224], sizes = [2, 8, 16], strides = [1, 1, 1]} : vector<2x8x384xf32> to vector<2x8x16xf32>
    %184 = vector.extract_strided_slice %36 {offsets = [0, 0, 352], sizes = [2, 8, 16], strides = [1, 1, 1]} : vector<2x8x384xf32> to vector<2x8x16xf32>
    "tpu.trace_start"() <{level = 10 : i32, message = "bid,bjd->bij"}> : () -> ()
    %cst_73 = arith.constant dense<0.000000e+00> : vector<2x8x8xf32>
    %185 = tpu.matmul %182, %183, %cst_73 {dimension_numbers = #tpu.dot_dimension_numbers<[2], [2], [1], [1], [0, 0, 0, 1, 1, 1], [0], [0]>} : vector<2x8x16xf32>, vector<2x8x16xf32>, vector<2x8x8xf32> -> vector<2x8x8xf32>
    "tpu.trace_stop"() : () -> ()
    %186 = vector.broadcast %6 : vector<1x8x8xf32> to vector<2x8x8xf32>
    %187 = arith.addf %185, %186 : vector<2x8x8xf32>
    %cst_74 = arith.constant dense<0xFF800000> : vector<2x8xf32>
    %188 = vector.multi_reduction <maximumf>, %187, %cst_74 [2] : vector<2x8x8xf32> to vector<2x8xf32>
    %189 = vector.shape_cast %188 : vector<2x8xf32> to vector<2x8x1xf32>
    %190 = vector.broadcast %189 : vector<2x8x1xf32> to vector<2x8x8xf32>
    %191 = arith.subf %187, %190 : vector<2x8x8xf32>
    %192 = math.exp %191 : vector<2x8x8xf32>
    %cst_75 = arith.constant dense<0.000000e+00> : vector<2x8xf32>
    %193 = vector.multi_reduction <add>, %192, %cst_75 [2] : vector<2x8x8xf32> to vector<2x8xf32>
    %194 = vector.shape_cast %193 : vector<2x8xf32> to vector<2x8x1xf32>
    %195 = tpu.reciprocal %194 {approx = true} : vector<2x8x1xf32> -> vector<2x8x1xf32>
    %196 = vector.broadcast %195 : vector<2x8x1xf32> to vector<2x8x8xf32>
    %197 = arith.mulf %192, %196 : vector<2x8x8xf32>
    "tpu.trace_start"() <{level = 10 : i32, message = "bij,bjd->bid"}> : () -> ()
    %cst_76 = arith.constant dense<0.000000e+00> : vector<2x8x16xf32>
    %198 = tpu.matmul %197, %184, %cst_76 {dimension_numbers = #tpu.dot_dimension_numbers<[2], [1], [1], [2], [0, 0, 0, 1, 1, 2], [0], [0]>} : vector<2x8x8xf32>, vector<2x8x16xf32>, vector<2x8x16xf32> -> vector<2x8x16xf32>
    "tpu.trace_stop"() : () -> ()
    %199 = vector.shape_cast %198 : vector<2x8x16xf32> to vector<16x16xf32>
    %c0_77 = arith.constant 0 : index
    %c6 = arith.constant 6 : index
    %c0_78 = arith.constant 0 : index
    %c0_79 = arith.constant 0 : index
    %200 = vector.load %arg5[%c0_77, %c6, %c0_78, %c0_79] : memref<2x8x16x32xf32, #tpu.memory_space<vmem>>, vector<1x1x16x32xf32>
    %201 = vector.shape_cast %200 : vector<1x1x16x32xf32> to vector<16x32xf32>
    %cst_80 = arith.constant dense<0.000000e+00> : vector<16x32xf32>
    %202 = tpu.matmul %199, %201, %cst_80 {dimension_numbers = #tpu.dot_dimension_numbers<[1], [0], [0], [1], [0, 0, 1, 1], [], []>} : vector<16x16xf32>, vector<16x32xf32>, vector<16x32xf32> -> vector<16x32xf32>
    %203 = arith.addf %179, %202 : vector<16x32xf32>
    %204 = vector.extract_strided_slice %36 {offsets = [0, 0, 112], sizes = [2, 8, 16], strides = [1, 1, 1]} : vector<2x8x384xf32> to vector<2x8x16xf32>
    %cst_81 = arith.constant 2.500000e-01 : f32
    %205 = vector.broadcast %cst_81 : f32 to vector<2x8x16xf32>
    %206 = arith.mulf %204, %205 : vector<2x8x16xf32>
    %207 = vector.extract_strided_slice %36 {offsets = [0, 0, 240], sizes = [2, 8, 16], strides = [1, 1, 1]} : vector<2x8x384xf32> to vector<2x8x16xf32>
    %208 = vector.extract_strided_slice %36 {offsets = [0, 0, 368], sizes = [2, 8, 16], strides = [1, 1, 1]} : vector<2x8x384xf32> to vector<2x8x16xf32>
    "tpu.trace_start"() <{level = 10 : i32, message = "bid,bjd->bij"}> : () -> ()
    %cst_82 = arith.constant dense<0.000000e+00> : vector<2x8x8xf32>
    %209 = tpu.matmul %206, %207, %cst_82 {dimension_numbers = #tpu.dot_dimension_numbers<[2], [2], [1], [1], [0, 0, 0, 1, 1, 1], [0], [0]>} : vector<2x8x16xf32>, vector<2x8x16xf32>, vector<2x8x8xf32> -> vector<2x8x8xf32>
    "tpu.trace_stop"() : () -> ()
    %210 = vector.broadcast %6 : vector<1x8x8xf32> to vector<2x8x8xf32>
    %211 = arith.addf %209, %210 : vector<2x8x8xf32>
    %cst_83 = arith.constant dense<0xFF800000> : vector<2x8xf32>
    %212 = vector.multi_reduction <maximumf>, %211, %cst_83 [2] : vector<2x8x8xf32> to vector<2x8xf32>
    %213 = vector.shape_cast %212 : vector<2x8xf32> to vector<2x8x1xf32>
    %214 = vector.broadcast %213 : vector<2x8x1xf32> to vector<2x8x8xf32>
    %215 = arith.subf %211, %214 : vector<2x8x8xf32>
    %216 = math.exp %215 : vector<2x8x8xf32>
    %cst_84 = arith.constant dense<0.000000e+00> : vector<2x8xf32>
    %217 = vector.multi_reduction <add>, %216, %cst_84 [2] : vector<2x8x8xf32> to vector<2x8xf32>
    %218 = vector.shape_cast %217 : vector<2x8xf32> to vector<2x8x1xf32>
    %219 = tpu.reciprocal %218 {approx = true} : vector<2x8x1xf32> -> vector<2x8x1xf32>
    %220 = vector.broadcast %219 : vector<2x8x1xf32> to vector<2x8x8xf32>
    %221 = arith.mulf %216, %220 : vector<2x8x8xf32>
    "tpu.trace_start"() <{level = 10 : i32, message = "bij,bjd->bid"}> : () -> ()
    %cst_85 = arith.constant dense<0.000000e+00> : vector<2x8x16xf32>
    %222 = tpu.matmul %221, %208, %cst_85 {dimension_numbers = #tpu.dot_dimension_numbers<[2], [1], [1], [2], [0, 0, 0, 1, 1, 2], [0], [0]>} : vector<2x8x8xf32>, vector<2x8x16xf32>, vector<2x8x16xf32> -> vector<2x8x16xf32>
    "tpu.trace_stop"() : () -> ()
    %223 = vector.shape_cast %222 : vector<2x8x16xf32> to vector<16x16xf32>
    %c0_86 = arith.constant 0 : index
    %c7 = arith.constant 7 : index
    %c0_87 = arith.constant 0 : index
    %c0_88 = arith.constant 0 : index
    %224 = vector.load %arg5[%c0_86, %c7, %c0_87, %c0_88] : memref<2x8x16x32xf32, #tpu.memory_space<vmem>>, vector<1x1x16x32xf32>
    %225 = vector.shape_cast %224 : vector<1x1x16x32xf32> to vector<16x32xf32>
    %cst_89 = arith.constant dense<0.000000e+00> : vector<16x32xf32>
    %226 = tpu.matmul %223, %225, %cst_89 {dimension_numbers = #tpu.dot_dimension_numbers<[1], [0], [0], [1], [0, 0, 1, 1], [], []>} : vector<16x16xf32>, vector<16x32xf32>, vector<16x32xf32> -> vector<16x32xf32>
    %227 = arith.addf %203, %226 : vector<16x32xf32>
    %c0_90 = arith.constant 0 : index
    %c0_91 = arith.constant 0 : index
    %c0_92 = arith.constant 0 : index
    %228 = vector.load %arg6[%c0_90, %c0_91, %c0_92] : memref<2x1x32xf32, #tpu.memory_space<vmem>>, vector<1x1x32xf32>
    %229 = vector.shape_cast %228 : vector<1x1x32xf32> to vector<1x32xf32>
    %230 = vector.broadcast %229 : vector<1x32xf32> to vector<16x32xf32>
    %231 = arith.addf %227, %230 : vector<16x32xf32>
    %232 = arith.addf %231, %32 : vector<16x32xf32>
    %c0_93 = arith.constant 0 : index
    %c0_94 = arith.constant 0 : index
    %c0_95 = arith.constant 0 : index
    %233 = vector.load %arg7[%c0_93, %c0_94, %c0_95] : memref<2x1x32xf32, #tpu.memory_space<vmem>>, vector<1x1x32xf32>
    %234 = vector.shape_cast %233 : vector<1x1x32xf32> to vector<1x32xf32>
    %c0_96 = arith.constant 0 : index
    %c0_97 = arith.constant 0 : index
    %c0_98 = arith.constant 0 : index
    %235 = vector.load %arg8[%c0_96, %c0_97, %c0_98] : memref<2x1x32xf32, #tpu.memory_space<vmem>>, vector<1x1x32xf32>
    %236 = vector.shape_cast %235 : vector<1x1x32xf32> to vector<1x32xf32>
    %cst_99 = arith.constant dense<0.000000e+00> : vector<16xf32>
    %237 = vector.multi_reduction <add>, %232, %cst_99 [1] : vector<16x32xf32> to vector<16xf32>
    %238 = vector.shape_cast %237 : vector<16xf32> to vector<16x1xf32>
    %cst_100 = arith.constant 3.200000e+01 : f32
    %239 = vector.broadcast %cst_100 : f32 to vector<16x1xf32>
    %240 = arith.divf %238, %239 : vector<16x1xf32>
    %241 = vector.broadcast %240 : vector<16x1xf32> to vector<16x32xf32>
    %242 = arith.subf %232, %241 : vector<16x32xf32>
    %243 = arith.mulf %242, %242 : vector<16x32xf32>
    %cst_101 = arith.constant dense<0.000000e+00> : vector<16xf32>
    %244 = vector.multi_reduction <add>, %243, %cst_101 [1] : vector<16x32xf32> to vector<16xf32>
    %245 = vector.shape_cast %244 : vector<16xf32> to vector<16x1xf32>
    %cst_102 = arith.constant 3.200000e+01 : f32
    %246 = vector.broadcast %cst_102 : f32 to vector<16x1xf32>
    %247 = arith.divf %245, %246 : vector<16x1xf32>
    %248 = vector.broadcast %240 : vector<16x1xf32> to vector<16x32xf32>
    %249 = arith.subf %232, %248 : vector<16x32xf32>
    %cst_103 = arith.constant 9.99999974E-6 : f32
    %250 = vector.broadcast %cst_103 : f32 to vector<16x1xf32>
    %251 = arith.addf %247, %250 : vector<16x1xf32>
    %252 = math.rsqrt %251 : vector<16x1xf32>
    %253 = vector.broadcast %252 : vector<16x1xf32> to vector<16x32xf32>
    %254 = arith.mulf %249, %253 : vector<16x32xf32>
    %255 = vector.broadcast %234 : vector<1x32xf32> to vector<16x32xf32>
    %256 = arith.mulf %254, %255 : vector<16x32xf32>
    %257 = vector.broadcast %236 : vector<1x32xf32> to vector<16x32xf32>
    %258 = arith.addf %256, %257 : vector<16x32xf32>
    %c0_104 = arith.constant 0 : index
    %c0_105 = arith.constant 0 : index
    %c0_106 = arith.constant 0 : index
    %259 = vector.load %arg9[%c0_104, %c0_105, %c0_106] : memref<2x32x256xf32, #tpu.memory_space<vmem>>, vector<1x32x256xf32>
    %260 = vector.shape_cast %259 : vector<1x32x256xf32> to vector<32x256xf32>
    %cst_107 = arith.constant dense<0.000000e+00> : vector<16x256xf32>
    %261 = tpu.matmul %258, %260, %cst_107 {dimension_numbers = #tpu.dot_dimension_numbers<[1], [0], [0], [1], [0, 0, 1, 1], [], []>} : vector<16x32xf32>, vector<32x256xf32>, vector<16x256xf32> -> vector<16x256xf32>
    %c0_108 = arith.constant 0 : index
    %c0_109 = arith.constant 0 : index
    %c0_110 = arith.constant 0 : index
    %262 = vector.load %arg10[%c0_108, %c0_109, %c0_110] : memref<2x1x256xf32, #tpu.memory_space<vmem>>, vector<1x1x256xf32>
    %263 = vector.shape_cast %262 : vector<1x1x256xf32> to vector<1x256xf32>
    %264 = vector.broadcast %263 : vector<1x256xf32> to vector<16x256xf32>
    %265 = arith.addf %261, %264 : vector<16x256xf32>
    %266 = vector.extract_strided_slice %265 {offsets = [0, 0], sizes = [16, 128], strides = [1, 1]} : vector<16x256xf32> to vector<16x128xf32>
    %267 = vector.extract_strided_slice %265 {offsets = [0, 128], sizes = [16, 128], strides = [1, 1]} : vector<16x256xf32> to vector<16x128xf32>
    %cst_111 = arith.constant 5.000000e-01 : f32
    %268 = vector.broadcast %cst_111 : f32 to vector<16x128xf32>
    %269 = arith.mulf %268, %267 : vector<16x128xf32>
    %cst_112 = arith.constant 0.707106769 : f32
    %270 = vector.broadcast %cst_112 : f32 to vector<16x128xf32>
    %271 = arith.mulf %267, %270 : vector<16x128xf32>
    %272 = math.erf %271 : vector<16x128xf32>
    %cst_113 = arith.constant 1.000000e+00 : f32
    %273 = vector.broadcast %cst_113 : f32 to vector<16x128xf32>
    %274 = arith.addf %273, %272 : vector<16x128xf32>
    %275 = arith.mulf %269, %274 : vector<16x128xf32>
    %276 = arith.mulf %266, %275 : vector<16x128xf32>
    %c0_114 = arith.constant 0 : index
    %c0_115 = arith.constant 0 : index
    %c0_116 = arith.constant 0 : index
    %277 = vector.load %arg11[%c0_114, %c0_115, %c0_116] : memref<2x128x32xf32, #tpu.memory_space<vmem>>, vector<1x128x32xf32>
    %278 = vector.shape_cast %277 : vector<1x128x32xf32> to vector<128x32xf32>
    %cst_117 = arith.constant dense<0.000000e+00> : vector<16x32xf32>
    %279 = tpu.matmul %276, %278, %cst_117 {dimension_numbers = #tpu.dot_dimension_numbers<[1], [0], [0], [1], [0, 0, 1, 1], [], []>} : vector<16x128xf32>, vector<128x32xf32>, vector<16x32xf32> -> vector<16x32xf32>
    %c0_118 = arith.constant 0 : index
    %c0_119 = arith.constant 0 : index
    %c0_120 = arith.constant 0 : index
    %280 = vector.load %arg12[%c0_118, %c0_119, %c0_120] : memref<2x1x32xf32, #tpu.memory_space<vmem>>, vector<1x1x32xf32>
    %281 = vector.shape_cast %280 : vector<1x1x32xf32> to vector<1x32xf32>
    %282 = vector.broadcast %281 : vector<1x32xf32> to vector<16x32xf32>
    %283 = arith.addf %279, %282 : vector<16x32xf32>
    %284 = arith.addf %283, %258 : vector<16x32xf32>
    %c1_121 = arith.constant 1 : index
    %c0_122 = arith.constant 0 : index
    %c0_123 = arith.constant 0 : index
    %285 = vector.load %arg2[%c1_121, %c0_122, %c0_123] : memref<2x1x32xf32, #tpu.memory_space<vmem>>, vector<1x1x32xf32>
    %286 = vector.shape_cast %285 : vector<1x1x32xf32> to vector<1x32xf32>
    %c1_124 = arith.constant 1 : index
    %c0_125 = arith.constant 0 : index
    %c0_126 = arith.constant 0 : index
    %287 = vector.load %arg3[%c1_124, %c0_125, %c0_126] : memref<2x1x32xf32, #tpu.memory_space<vmem>>, vector<1x1x32xf32>
    %288 = vector.shape_cast %287 : vector<1x1x32xf32> to vector<1x32xf32>
    %cst_127 = arith.constant dense<0.000000e+00> : vector<16xf32>
    %289 = vector.multi_reduction <add>, %284, %cst_127 [1] : vector<16x32xf32> to vector<16xf32>
    %290 = vector.shape_cast %289 : vector<16xf32> to vector<16x1xf32>
    %cst_128 = arith.constant 3.200000e+01 : f32
    %291 = vector.broadcast %cst_128 : f32 to vector<16x1xf32>
    %292 = arith.divf %290, %291 : vector<16x1xf32>
    %293 = vector.broadcast %292 : vector<16x1xf32> to vector<16x32xf32>
    %294 = arith.subf %284, %293 : vector<16x32xf32>
    %295 = arith.mulf %294, %294 : vector<16x32xf32>
    %cst_129 = arith.constant dense<0.000000e+00> : vector<16xf32>
    %296 = vector.multi_reduction <add>, %295, %cst_129 [1] : vector<16x32xf32> to vector<16xf32>
    %297 = vector.shape_cast %296 : vector<16xf32> to vector<16x1xf32>
    %cst_130 = arith.constant 3.200000e+01 : f32
    %298 = vector.broadcast %cst_130 : f32 to vector<16x1xf32>
    %299 = arith.divf %297, %298 : vector<16x1xf32>
    %300 = vector.broadcast %292 : vector<16x1xf32> to vector<16x32xf32>
    %301 = arith.subf %284, %300 : vector<16x32xf32>
    %cst_131 = arith.constant 9.99999974E-6 : f32
    %302 = vector.broadcast %cst_131 : f32 to vector<16x1xf32>
    %303 = arith.addf %299, %302 : vector<16x1xf32>
    %304 = math.rsqrt %303 : vector<16x1xf32>
    %305 = vector.broadcast %304 : vector<16x1xf32> to vector<16x32xf32>
    %306 = arith.mulf %301, %305 : vector<16x32xf32>
    %307 = vector.broadcast %286 : vector<1x32xf32> to vector<16x32xf32>
    %308 = arith.mulf %306, %307 : vector<16x32xf32>
    %309 = vector.broadcast %288 : vector<1x32xf32> to vector<16x32xf32>
    %310 = arith.addf %308, %309 : vector<16x32xf32>
    %c1_132 = arith.constant 1 : index
    %c0_133 = arith.constant 0 : index
    %c0_134 = arith.constant 0 : index
    %311 = vector.load %arg4[%c1_132, %c0_133, %c0_134] : memref<2x32x384xf32, #tpu.memory_space<vmem>>, vector<1x32x384xf32>
    %312 = vector.shape_cast %311 : vector<1x32x384xf32> to vector<32x384xf32>
    %cst_135 = arith.constant dense<0.000000e+00> : vector<16x384xf32>
    %313 = tpu.matmul %310, %312, %cst_135 {dimension_numbers = #tpu.dot_dimension_numbers<[1], [0], [0], [1], [0, 0, 1, 1], [], []>} : vector<16x32xf32>, vector<32x384xf32>, vector<16x384xf32> -> vector<16x384xf32>
    %314 = vector.shape_cast %313 : vector<16x384xf32> to vector<2x8x384xf32>
    %315 = vector.extract_strided_slice %314 {offsets = [0, 0, 0], sizes = [2, 8, 16], strides = [1, 1, 1]} : vector<2x8x384xf32> to vector<2x8x16xf32>
    %cst_136 = arith.constant 2.500000e-01 : f32
    %316 = vector.broadcast %cst_136 : f32 to vector<2x8x16xf32>
    %317 = arith.mulf %315, %316 : vector<2x8x16xf32>
    %318 = vector.extract_strided_slice %314 {offsets = [0, 0, 128], sizes = [2, 8, 16], strides = [1, 1, 1]} : vector<2x8x384xf32> to vector<2x8x16xf32>
    %319 = vector.extract_strided_slice %314 {offsets = [0, 0, 256], sizes = [2, 8, 16], strides = [1, 1, 1]} : vector<2x8x384xf32> to vector<2x8x16xf32>
    "tpu.trace_start"() <{level = 10 : i32, message = "bid,bjd->bij"}> : () -> ()
    %cst_137 = arith.constant dense<0.000000e+00> : vector<2x8x8xf32>
    %320 = tpu.matmul %317, %318, %cst_137 {dimension_numbers = #tpu.dot_dimension_numbers<[2], [2], [1], [1], [0, 0, 0, 1, 1, 1], [0], [0]>} : vector<2x8x16xf32>, vector<2x8x16xf32>, vector<2x8x8xf32> -> vector<2x8x8xf32>
    "tpu.trace_stop"() : () -> ()
    %321 = vector.broadcast %6 : vector<1x8x8xf32> to vector<2x8x8xf32>
    %322 = arith.addf %320, %321 : vector<2x8x8xf32>
    %cst_138 = arith.constant dense<0xFF800000> : vector<2x8xf32>
    %323 = vector.multi_reduction <maximumf>, %322, %cst_138 [2] : vector<2x8x8xf32> to vector<2x8xf32>
    %324 = vector.shape_cast %323 : vector<2x8xf32> to vector<2x8x1xf32>
    %325 = vector.broadcast %324 : vector<2x8x1xf32> to vector<2x8x8xf32>
    %326 = arith.subf %322, %325 : vector<2x8x8xf32>
    %327 = math.exp %326 : vector<2x8x8xf32>
    %cst_139 = arith.constant dense<0.000000e+00> : vector<2x8xf32>
    %328 = vector.multi_reduction <add>, %327, %cst_139 [2] : vector<2x8x8xf32> to vector<2x8xf32>
    %329 = vector.shape_cast %328 : vector<2x8xf32> to vector<2x8x1xf32>
    %330 = tpu.reciprocal %329 {approx = true} : vector<2x8x1xf32> -> vector<2x8x1xf32>
    %331 = vector.broadcast %330 : vector<2x8x1xf32> to vector<2x8x8xf32>
    %332 = arith.mulf %327, %331 : vector<2x8x8xf32>
    "tpu.trace_start"() <{level = 10 : i32, message = "bij,bjd->bid"}> : () -> ()
    %cst_140 = arith.constant dense<0.000000e+00> : vector<2x8x16xf32>
    %333 = tpu.matmul %332, %319, %cst_140 {dimension_numbers = #tpu.dot_dimension_numbers<[2], [1], [1], [2], [0, 0, 0, 1, 1, 2], [0], [0]>} : vector<2x8x8xf32>, vector<2x8x16xf32>, vector<2x8x16xf32> -> vector<2x8x16xf32>
    "tpu.trace_stop"() : () -> ()
    %334 = vector.shape_cast %333 : vector<2x8x16xf32> to vector<16x16xf32>
    %c1_141 = arith.constant 1 : index
    %c0_142 = arith.constant 0 : index
    %c0_143 = arith.constant 0 : index
    %c0_144 = arith.constant 0 : index
    %335 = vector.load %arg5[%c1_141, %c0_142, %c0_143, %c0_144] : memref<2x8x16x32xf32, #tpu.memory_space<vmem>>, vector<1x1x16x32xf32>
    %336 = vector.shape_cast %335 : vector<1x1x16x32xf32> to vector<16x32xf32>
    %cst_145 = arith.constant dense<0.000000e+00> : vector<16x32xf32>
    %337 = tpu.matmul %334, %336, %cst_145 {dimension_numbers = #tpu.dot_dimension_numbers<[1], [0], [0], [1], [0, 0, 1, 1], [], []>} : vector<16x16xf32>, vector<16x32xf32>, vector<16x32xf32> -> vector<16x32xf32>
    %338 = vector.extract_strided_slice %314 {offsets = [0, 0, 16], sizes = [2, 8, 16], strides = [1, 1, 1]} : vector<2x8x384xf32> to vector<2x8x16xf32>
    %cst_146 = arith.constant 2.500000e-01 : f32
    %339 = vector.broadcast %cst_146 : f32 to vector<2x8x16xf32>
    %340 = arith.mulf %338, %339 : vector<2x8x16xf32>
    %341 = vector.extract_strided_slice %314 {offsets = [0, 0, 144], sizes = [2, 8, 16], strides = [1, 1, 1]} : vector<2x8x384xf32> to vector<2x8x16xf32>
    %342 = vector.extract_strided_slice %314 {offsets = [0, 0, 272], sizes = [2, 8, 16], strides = [1, 1, 1]} : vector<2x8x384xf32> to vector<2x8x16xf32>
    "tpu.trace_start"() <{level = 10 : i32, message = "bid,bjd->bij"}> : () -> ()
    %cst_147 = arith.constant dense<0.000000e+00> : vector<2x8x8xf32>
    %343 = tpu.matmul %340, %341, %cst_147 {dimension_numbers = #tpu.dot_dimension_numbers<[2], [2], [1], [1], [0, 0, 0, 1, 1, 1], [0], [0]>} : vector<2x8x16xf32>, vector<2x8x16xf32>, vector<2x8x8xf32> -> vector<2x8x8xf32>
    "tpu.trace_stop"() : () -> ()
    %344 = vector.broadcast %6 : vector<1x8x8xf32> to vector<2x8x8xf32>
    %345 = arith.addf %343, %344 : vector<2x8x8xf32>
    %cst_148 = arith.constant dense<0xFF800000> : vector<2x8xf32>
    %346 = vector.multi_reduction <maximumf>, %345, %cst_148 [2] : vector<2x8x8xf32> to vector<2x8xf32>
    %347 = vector.shape_cast %346 : vector<2x8xf32> to vector<2x8x1xf32>
    %348 = vector.broadcast %347 : vector<2x8x1xf32> to vector<2x8x8xf32>
    %349 = arith.subf %345, %348 : vector<2x8x8xf32>
    %350 = math.exp %349 : vector<2x8x8xf32>
    %cst_149 = arith.constant dense<0.000000e+00> : vector<2x8xf32>
    %351 = vector.multi_reduction <add>, %350, %cst_149 [2] : vector<2x8x8xf32> to vector<2x8xf32>
    %352 = vector.shape_cast %351 : vector<2x8xf32> to vector<2x8x1xf32>
    %353 = tpu.reciprocal %352 {approx = true} : vector<2x8x1xf32> -> vector<2x8x1xf32>
    %354 = vector.broadcast %353 : vector<2x8x1xf32> to vector<2x8x8xf32>
    %355 = arith.mulf %350, %354 : vector<2x8x8xf32>
    "tpu.trace_start"() <{level = 10 : i32, message = "bij,bjd->bid"}> : () -> ()
    %cst_150 = arith.constant dense<0.000000e+00> : vector<2x8x16xf32>
    %356 = tpu.matmul %355, %342, %cst_150 {dimension_numbers = #tpu.dot_dimension_numbers<[2], [1], [1], [2], [0, 0, 0, 1, 1, 2], [0], [0]>} : vector<2x8x8xf32>, vector<2x8x16xf32>, vector<2x8x16xf32> -> vector<2x8x16xf32>
    "tpu.trace_stop"() : () -> ()
    %357 = vector.shape_cast %356 : vector<2x8x16xf32> to vector<16x16xf32>
    %c1_151 = arith.constant 1 : index
    %c1_152 = arith.constant 1 : index
    %c0_153 = arith.constant 0 : index
    %c0_154 = arith.constant 0 : index
    %358 = vector.load %arg5[%c1_151, %c1_152, %c0_153, %c0_154] : memref<2x8x16x32xf32, #tpu.memory_space<vmem>>, vector<1x1x16x32xf32>
    %359 = vector.shape_cast %358 : vector<1x1x16x32xf32> to vector<16x32xf32>
    %cst_155 = arith.constant dense<0.000000e+00> : vector<16x32xf32>
    %360 = tpu.matmul %357, %359, %cst_155 {dimension_numbers = #tpu.dot_dimension_numbers<[1], [0], [0], [1], [0, 0, 1, 1], [], []>} : vector<16x16xf32>, vector<16x32xf32>, vector<16x32xf32> -> vector<16x32xf32>
    %361 = arith.addf %337, %360 : vector<16x32xf32>
    %362 = vector.extract_strided_slice %314 {offsets = [0, 0, 32], sizes = [2, 8, 16], strides = [1, 1, 1]} : vector<2x8x384xf32> to vector<2x8x16xf32>
    %cst_156 = arith.constant 2.500000e-01 : f32
    %363 = vector.broadcast %cst_156 : f32 to vector<2x8x16xf32>
    %364 = arith.mulf %362, %363 : vector<2x8x16xf32>
    %365 = vector.extract_strided_slice %314 {offsets = [0, 0, 160], sizes = [2, 8, 16], strides = [1, 1, 1]} : vector<2x8x384xf32> to vector<2x8x16xf32>
    %366 = vector.extract_strided_slice %314 {offsets = [0, 0, 288], sizes = [2, 8, 16], strides = [1, 1, 1]} : vector<2x8x384xf32> to vector<2x8x16xf32>
    "tpu.trace_start"() <{level = 10 : i32, message = "bid,bjd->bij"}> : () -> ()
    %cst_157 = arith.constant dense<0.000000e+00> : vector<2x8x8xf32>
    %367 = tpu.matmul %364, %365, %cst_157 {dimension_numbers = #tpu.dot_dimension_numbers<[2], [2], [1], [1], [0, 0, 0, 1, 1, 1], [0], [0]>} : vector<2x8x16xf32>, vector<2x8x16xf32>, vector<2x8x8xf32> -> vector<2x8x8xf32>
    "tpu.trace_stop"() : () -> ()
    %368 = vector.broadcast %6 : vector<1x8x8xf32> to vector<2x8x8xf32>
    %369 = arith.addf %367, %368 : vector<2x8x8xf32>
    %cst_158 = arith.constant dense<0xFF800000> : vector<2x8xf32>
    %370 = vector.multi_reduction <maximumf>, %369, %cst_158 [2] : vector<2x8x8xf32> to vector<2x8xf32>
    %371 = vector.shape_cast %370 : vector<2x8xf32> to vector<2x8x1xf32>
    %372 = vector.broadcast %371 : vector<2x8x1xf32> to vector<2x8x8xf32>
    %373 = arith.subf %369, %372 : vector<2x8x8xf32>
    %374 = math.exp %373 : vector<2x8x8xf32>
    %cst_159 = arith.constant dense<0.000000e+00> : vector<2x8xf32>
    %375 = vector.multi_reduction <add>, %374, %cst_159 [2] : vector<2x8x8xf32> to vector<2x8xf32>
    %376 = vector.shape_cast %375 : vector<2x8xf32> to vector<2x8x1xf32>
    %377 = tpu.reciprocal %376 {approx = true} : vector<2x8x1xf32> -> vector<2x8x1xf32>
    %378 = vector.broadcast %377 : vector<2x8x1xf32> to vector<2x8x8xf32>
    %379 = arith.mulf %374, %378 : vector<2x8x8xf32>
    "tpu.trace_start"() <{level = 10 : i32, message = "bij,bjd->bid"}> : () -> ()
    %cst_160 = arith.constant dense<0.000000e+00> : vector<2x8x16xf32>
    %380 = tpu.matmul %379, %366, %cst_160 {dimension_numbers = #tpu.dot_dimension_numbers<[2], [1], [1], [2], [0, 0, 0, 1, 1, 2], [0], [0]>} : vector<2x8x8xf32>, vector<2x8x16xf32>, vector<2x8x16xf32> -> vector<2x8x16xf32>
    "tpu.trace_stop"() : () -> ()
    %381 = vector.shape_cast %380 : vector<2x8x16xf32> to vector<16x16xf32>
    %c1_161 = arith.constant 1 : index
    %c2_162 = arith.constant 2 : index
    %c0_163 = arith.constant 0 : index
    %c0_164 = arith.constant 0 : index
    %382 = vector.load %arg5[%c1_161, %c2_162, %c0_163, %c0_164] : memref<2x8x16x32xf32, #tpu.memory_space<vmem>>, vector<1x1x16x32xf32>
    %383 = vector.shape_cast %382 : vector<1x1x16x32xf32> to vector<16x32xf32>
    %cst_165 = arith.constant dense<0.000000e+00> : vector<16x32xf32>
    %384 = tpu.matmul %381, %383, %cst_165 {dimension_numbers = #tpu.dot_dimension_numbers<[1], [0], [0], [1], [0, 0, 1, 1], [], []>} : vector<16x16xf32>, vector<16x32xf32>, vector<16x32xf32> -> vector<16x32xf32>
    %385 = arith.addf %361, %384 : vector<16x32xf32>
    %386 = vector.extract_strided_slice %314 {offsets = [0, 0, 48], sizes = [2, 8, 16], strides = [1, 1, 1]} : vector<2x8x384xf32> to vector<2x8x16xf32>
    %cst_166 = arith.constant 2.500000e-01 : f32
    %387 = vector.broadcast %cst_166 : f32 to vector<2x8x16xf32>
    %388 = arith.mulf %386, %387 : vector<2x8x16xf32>
    %389 = vector.extract_strided_slice %314 {offsets = [0, 0, 176], sizes = [2, 8, 16], strides = [1, 1, 1]} : vector<2x8x384xf32> to vector<2x8x16xf32>
    %390 = vector.extract_strided_slice %314 {offsets = [0, 0, 304], sizes = [2, 8, 16], strides = [1, 1, 1]} : vector<2x8x384xf32> to vector<2x8x16xf32>
    "tpu.trace_start"() <{level = 10 : i32, message = "bid,bjd->bij"}> : () -> ()
    %cst_167 = arith.constant dense<0.000000e+00> : vector<2x8x8xf32>
    %391 = tpu.matmul %388, %389, %cst_167 {dimension_numbers = #tpu.dot_dimension_numbers<[2], [2], [1], [1], [0, 0, 0, 1, 1, 1], [0], [0]>} : vector<2x8x16xf32>, vector<2x8x16xf32>, vector<2x8x8xf32> -> vector<2x8x8xf32>
    "tpu.trace_stop"() : () -> ()
    %392 = vector.broadcast %6 : vector<1x8x8xf32> to vector<2x8x8xf32>
    %393 = arith.addf %391, %392 : vector<2x8x8xf32>
    %cst_168 = arith.constant dense<0xFF800000> : vector<2x8xf32>
    %394 = vector.multi_reduction <maximumf>, %393, %cst_168 [2] : vector<2x8x8xf32> to vector<2x8xf32>
    %395 = vector.shape_cast %394 : vector<2x8xf32> to vector<2x8x1xf32>
    %396 = vector.broadcast %395 : vector<2x8x1xf32> to vector<2x8x8xf32>
    %397 = arith.subf %393, %396 : vector<2x8x8xf32>
    %398 = math.exp %397 : vector<2x8x8xf32>
    %cst_169 = arith.constant dense<0.000000e+00> : vector<2x8xf32>
    %399 = vector.multi_reduction <add>, %398, %cst_169 [2] : vector<2x8x8xf32> to vector<2x8xf32>
    %400 = vector.shape_cast %399 : vector<2x8xf32> to vector<2x8x1xf32>
    %401 = tpu.reciprocal %400 {approx = true} : vector<2x8x1xf32> -> vector<2x8x1xf32>
    %402 = vector.broadcast %401 : vector<2x8x1xf32> to vector<2x8x8xf32>
    %403 = arith.mulf %398, %402 : vector<2x8x8xf32>
    "tpu.trace_start"() <{level = 10 : i32, message = "bij,bjd->bid"}> : () -> ()
    %cst_170 = arith.constant dense<0.000000e+00> : vector<2x8x16xf32>
    %404 = tpu.matmul %403, %390, %cst_170 {dimension_numbers = #tpu.dot_dimension_numbers<[2], [1], [1], [2], [0, 0, 0, 1, 1, 2], [0], [0]>} : vector<2x8x8xf32>, vector<2x8x16xf32>, vector<2x8x16xf32> -> vector<2x8x16xf32>
    "tpu.trace_stop"() : () -> ()
    %405 = vector.shape_cast %404 : vector<2x8x16xf32> to vector<16x16xf32>
    %c1_171 = arith.constant 1 : index
    %c3_172 = arith.constant 3 : index
    %c0_173 = arith.constant 0 : index
    %c0_174 = arith.constant 0 : index
    %406 = vector.load %arg5[%c1_171, %c3_172, %c0_173, %c0_174] : memref<2x8x16x32xf32, #tpu.memory_space<vmem>>, vector<1x1x16x32xf32>
    %407 = vector.shape_cast %406 : vector<1x1x16x32xf32> to vector<16x32xf32>
    %cst_175 = arith.constant dense<0.000000e+00> : vector<16x32xf32>
    %408 = tpu.matmul %405, %407, %cst_175 {dimension_numbers = #tpu.dot_dimension_numbers<[1], [0], [0], [1], [0, 0, 1, 1], [], []>} : vector<16x16xf32>, vector<16x32xf32>, vector<16x32xf32> -> vector<16x32xf32>
    %409 = arith.addf %385, %408 : vector<16x32xf32>
    %410 = vector.extract_strided_slice %314 {offsets = [0, 0, 64], sizes = [2, 8, 16], strides = [1, 1, 1]} : vector<2x8x384xf32> to vector<2x8x16xf32>
    %cst_176 = arith.constant 2.500000e-01 : f32
    %411 = vector.broadcast %cst_176 : f32 to vector<2x8x16xf32>
    %412 = arith.mulf %410, %411 : vector<2x8x16xf32>
    %413 = vector.extract_strided_slice %314 {offsets = [0, 0, 192], sizes = [2, 8, 16], strides = [1, 1, 1]} : vector<2x8x384xf32> to vector<2x8x16xf32>
    %414 = vector.extract_strided_slice %314 {offsets = [0, 0, 320], sizes = [2, 8, 16], strides = [1, 1, 1]} : vector<2x8x384xf32> to vector<2x8x16xf32>
    "tpu.trace_start"() <{level = 10 : i32, message = "bid,bjd->bij"}> : () -> ()
    %cst_177 = arith.constant dense<0.000000e+00> : vector<2x8x8xf32>
    %415 = tpu.matmul %412, %413, %cst_177 {dimension_numbers = #tpu.dot_dimension_numbers<[2], [2], [1], [1], [0, 0, 0, 1, 1, 1], [0], [0]>} : vector<2x8x16xf32>, vector<2x8x16xf32>, vector<2x8x8xf32> -> vector<2x8x8xf32>
    "tpu.trace_stop"() : () -> ()
    %416 = vector.broadcast %6 : vector<1x8x8xf32> to vector<2x8x8xf32>
    %417 = arith.addf %415, %416 : vector<2x8x8xf32>
    %cst_178 = arith.constant dense<0xFF800000> : vector<2x8xf32>
    %418 = vector.multi_reduction <maximumf>, %417, %cst_178 [2] : vector<2x8x8xf32> to vector<2x8xf32>
    %419 = vector.shape_cast %418 : vector<2x8xf32> to vector<2x8x1xf32>
    %420 = vector.broadcast %419 : vector<2x8x1xf32> to vector<2x8x8xf32>
    %421 = arith.subf %417, %420 : vector<2x8x8xf32>
    %422 = math.exp %421 : vector<2x8x8xf32>
    %cst_179 = arith.constant dense<0.000000e+00> : vector<2x8xf32>
    %423 = vector.multi_reduction <add>, %422, %cst_179 [2] : vector<2x8x8xf32> to vector<2x8xf32>
    %424 = vector.shape_cast %423 : vector<2x8xf32> to vector<2x8x1xf32>
    %425 = tpu.reciprocal %424 {approx = true} : vector<2x8x1xf32> -> vector<2x8x1xf32>
    %426 = vector.broadcast %425 : vector<2x8x1xf32> to vector<2x8x8xf32>
    %427 = arith.mulf %422, %426 : vector<2x8x8xf32>
    "tpu.trace_start"() <{level = 10 : i32, message = "bij,bjd->bid"}> : () -> ()
    %cst_180 = arith.constant dense<0.000000e+00> : vector<2x8x16xf32>
    %428 = tpu.matmul %427, %414, %cst_180 {dimension_numbers = #tpu.dot_dimension_numbers<[2], [1], [1], [2], [0, 0, 0, 1, 1, 2], [0], [0]>} : vector<2x8x8xf32>, vector<2x8x16xf32>, vector<2x8x16xf32> -> vector<2x8x16xf32>
    "tpu.trace_stop"() : () -> ()
    %429 = vector.shape_cast %428 : vector<2x8x16xf32> to vector<16x16xf32>
    %c1_181 = arith.constant 1 : index
    %c4_182 = arith.constant 4 : index
    %c0_183 = arith.constant 0 : index
    %c0_184 = arith.constant 0 : index
    %430 = vector.load %arg5[%c1_181, %c4_182, %c0_183, %c0_184] : memref<2x8x16x32xf32, #tpu.memory_space<vmem>>, vector<1x1x16x32xf32>
    %431 = vector.shape_cast %430 : vector<1x1x16x32xf32> to vector<16x32xf32>
    %cst_185 = arith.constant dense<0.000000e+00> : vector<16x32xf32>
    %432 = tpu.matmul %429, %431, %cst_185 {dimension_numbers = #tpu.dot_dimension_numbers<[1], [0], [0], [1], [0, 0, 1, 1], [], []>} : vector<16x16xf32>, vector<16x32xf32>, vector<16x32xf32> -> vector<16x32xf32>
    %433 = arith.addf %409, %432 : vector<16x32xf32>
    %434 = vector.extract_strided_slice %314 {offsets = [0, 0, 80], sizes = [2, 8, 16], strides = [1, 1, 1]} : vector<2x8x384xf32> to vector<2x8x16xf32>
    %cst_186 = arith.constant 2.500000e-01 : f32
    %435 = vector.broadcast %cst_186 : f32 to vector<2x8x16xf32>
    %436 = arith.mulf %434, %435 : vector<2x8x16xf32>
    %437 = vector.extract_strided_slice %314 {offsets = [0, 0, 208], sizes = [2, 8, 16], strides = [1, 1, 1]} : vector<2x8x384xf32> to vector<2x8x16xf32>
    %438 = vector.extract_strided_slice %314 {offsets = [0, 0, 336], sizes = [2, 8, 16], strides = [1, 1, 1]} : vector<2x8x384xf32> to vector<2x8x16xf32>
    "tpu.trace_start"() <{level = 10 : i32, message = "bid,bjd->bij"}> : () -> ()
    %cst_187 = arith.constant dense<0.000000e+00> : vector<2x8x8xf32>
    %439 = tpu.matmul %436, %437, %cst_187 {dimension_numbers = #tpu.dot_dimension_numbers<[2], [2], [1], [1], [0, 0, 0, 1, 1, 1], [0], [0]>} : vector<2x8x16xf32>, vector<2x8x16xf32>, vector<2x8x8xf32> -> vector<2x8x8xf32>
    "tpu.trace_stop"() : () -> ()
    %440 = vector.broadcast %6 : vector<1x8x8xf32> to vector<2x8x8xf32>
    %441 = arith.addf %439, %440 : vector<2x8x8xf32>
    %cst_188 = arith.constant dense<0xFF800000> : vector<2x8xf32>
    %442 = vector.multi_reduction <maximumf>, %441, %cst_188 [2] : vector<2x8x8xf32> to vector<2x8xf32>
    %443 = vector.shape_cast %442 : vector<2x8xf32> to vector<2x8x1xf32>
    %444 = vector.broadcast %443 : vector<2x8x1xf32> to vector<2x8x8xf32>
    %445 = arith.subf %441, %444 : vector<2x8x8xf32>
    %446 = math.exp %445 : vector<2x8x8xf32>
    %cst_189 = arith.constant dense<0.000000e+00> : vector<2x8xf32>
    %447 = vector.multi_reduction <add>, %446, %cst_189 [2] : vector<2x8x8xf32> to vector<2x8xf32>
    %448 = vector.shape_cast %447 : vector<2x8xf32> to vector<2x8x1xf32>
    %449 = tpu.reciprocal %448 {approx = true} : vector<2x8x1xf32> -> vector<2x8x1xf32>
    %450 = vector.broadcast %449 : vector<2x8x1xf32> to vector<2x8x8xf32>
    %451 = arith.mulf %446, %450 : vector<2x8x8xf32>
    "tpu.trace_start"() <{level = 10 : i32, message = "bij,bjd->bid"}> : () -> ()
    %cst_190 = arith.constant dense<0.000000e+00> : vector<2x8x16xf32>
    %452 = tpu.matmul %451, %438, %cst_190 {dimension_numbers = #tpu.dot_dimension_numbers<[2], [1], [1], [2], [0, 0, 0, 1, 1, 2], [0], [0]>} : vector<2x8x8xf32>, vector<2x8x16xf32>, vector<2x8x16xf32> -> vector<2x8x16xf32>
    "tpu.trace_stop"() : () -> ()
    %453 = vector.shape_cast %452 : vector<2x8x16xf32> to vector<16x16xf32>
    %c1_191 = arith.constant 1 : index
    %c5_192 = arith.constant 5 : index
    %c0_193 = arith.constant 0 : index
    %c0_194 = arith.constant 0 : index
    %454 = vector.load %arg5[%c1_191, %c5_192, %c0_193, %c0_194] : memref<2x8x16x32xf32, #tpu.memory_space<vmem>>, vector<1x1x16x32xf32>
    %455 = vector.shape_cast %454 : vector<1x1x16x32xf32> to vector<16x32xf32>
    %cst_195 = arith.constant dense<0.000000e+00> : vector<16x32xf32>
    %456 = tpu.matmul %453, %455, %cst_195 {dimension_numbers = #tpu.dot_dimension_numbers<[1], [0], [0], [1], [0, 0, 1, 1], [], []>} : vector<16x16xf32>, vector<16x32xf32>, vector<16x32xf32> -> vector<16x32xf32>
    %457 = arith.addf %433, %456 : vector<16x32xf32>
    %458 = vector.extract_strided_slice %314 {offsets = [0, 0, 96], sizes = [2, 8, 16], strides = [1, 1, 1]} : vector<2x8x384xf32> to vector<2x8x16xf32>
    %cst_196 = arith.constant 2.500000e-01 : f32
    %459 = vector.broadcast %cst_196 : f32 to vector<2x8x16xf32>
    %460 = arith.mulf %458, %459 : vector<2x8x16xf32>
    %461 = vector.extract_strided_slice %314 {offsets = [0, 0, 224], sizes = [2, 8, 16], strides = [1, 1, 1]} : vector<2x8x384xf32> to vector<2x8x16xf32>
    %462 = vector.extract_strided_slice %314 {offsets = [0, 0, 352], sizes = [2, 8, 16], strides = [1, 1, 1]} : vector<2x8x384xf32> to vector<2x8x16xf32>
    "tpu.trace_start"() <{level = 10 : i32, message = "bid,bjd->bij"}> : () -> ()
    %cst_197 = arith.constant dense<0.000000e+00> : vector<2x8x8xf32>
    %463 = tpu.matmul %460, %461, %cst_197 {dimension_numbers = #tpu.dot_dimension_numbers<[2], [2], [1], [1], [0, 0, 0, 1, 1, 1], [0], [0]>} : vector<2x8x16xf32>, vector<2x8x16xf32>, vector<2x8x8xf32> -> vector<2x8x8xf32>
    "tpu.trace_stop"() : () -> ()
    %464 = vector.broadcast %6 : vector<1x8x8xf32> to vector<2x8x8xf32>
    %465 = arith.addf %463, %464 : vector<2x8x8xf32>
    %cst_198 = arith.constant dense<0xFF800000> : vector<2x8xf32>
    %466 = vector.multi_reduction <maximumf>, %465, %cst_198 [2] : vector<2x8x8xf32> to vector<2x8xf32>
    %467 = vector.shape_cast %466 : vector<2x8xf32> to vector<2x8x1xf32>
    %468 = vector.broadcast %467 : vector<2x8x1xf32> to vector<2x8x8xf32>
    %469 = arith.subf %465, %468 : vector<2x8x8xf32>
    %470 = math.exp %469 : vector<2x8x8xf32>
    %cst_199 = arith.constant dense<0.000000e+00> : vector<2x8xf32>
    %471 = vector.multi_reduction <add>, %470, %cst_199 [2] : vector<2x8x8xf32> to vector<2x8xf32>
    %472 = vector.shape_cast %471 : vector<2x8xf32> to vector<2x8x1xf32>
    %473 = tpu.reciprocal %472 {approx = true} : vector<2x8x1xf32> -> vector<2x8x1xf32>
    %474 = vector.broadcast %473 : vector<2x8x1xf32> to vector<2x8x8xf32>
    %475 = arith.mulf %470, %474 : vector<2x8x8xf32>
    "tpu.trace_start"() <{level = 10 : i32, message = "bij,bjd->bid"}> : () -> ()
    %cst_200 = arith.constant dense<0.000000e+00> : vector<2x8x16xf32>
    %476 = tpu.matmul %475, %462, %cst_200 {dimension_numbers = #tpu.dot_dimension_numbers<[2], [1], [1], [2], [0, 0, 0, 1, 1, 2], [0], [0]>} : vector<2x8x8xf32>, vector<2x8x16xf32>, vector<2x8x16xf32> -> vector<2x8x16xf32>
    "tpu.trace_stop"() : () -> ()
    %477 = vector.shape_cast %476 : vector<2x8x16xf32> to vector<16x16xf32>
    %c1_201 = arith.constant 1 : index
    %c6_202 = arith.constant 6 : index
    %c0_203 = arith.constant 0 : index
    %c0_204 = arith.constant 0 : index
    %478 = vector.load %arg5[%c1_201, %c6_202, %c0_203, %c0_204] : memref<2x8x16x32xf32, #tpu.memory_space<vmem>>, vector<1x1x16x32xf32>
    %479 = vector.shape_cast %478 : vector<1x1x16x32xf32> to vector<16x32xf32>
    %cst_205 = arith.constant dense<0.000000e+00> : vector<16x32xf32>
    %480 = tpu.matmul %477, %479, %cst_205 {dimension_numbers = #tpu.dot_dimension_numbers<[1], [0], [0], [1], [0, 0, 1, 1], [], []>} : vector<16x16xf32>, vector<16x32xf32>, vector<16x32xf32> -> vector<16x32xf32>
    %481 = arith.addf %457, %480 : vector<16x32xf32>
    %482 = vector.extract_strided_slice %314 {offsets = [0, 0, 112], sizes = [2, 8, 16], strides = [1, 1, 1]} : vector<2x8x384xf32> to vector<2x8x16xf32>
    %cst_206 = arith.constant 2.500000e-01 : f32
    %483 = vector.broadcast %cst_206 : f32 to vector<2x8x16xf32>
    %484 = arith.mulf %482, %483 : vector<2x8x16xf32>
    %485 = vector.extract_strided_slice %314 {offsets = [0, 0, 240], sizes = [2, 8, 16], strides = [1, 1, 1]} : vector<2x8x384xf32> to vector<2x8x16xf32>
    %486 = vector.extract_strided_slice %314 {offsets = [0, 0, 368], sizes = [2, 8, 16], strides = [1, 1, 1]} : vector<2x8x384xf32> to vector<2x8x16xf32>
    "tpu.trace_start"() <{level = 10 : i32, message = "bid,bjd->bij"}> : () -> ()
    %cst_207 = arith.constant dense<0.000000e+00> : vector<2x8x8xf32>
    %487 = tpu.matmul %484, %485, %cst_207 {dimension_numbers = #tpu.dot_dimension_numbers<[2], [2], [1], [1], [0, 0, 0, 1, 1, 1], [0], [0]>} : vector<2x8x16xf32>, vector<2x8x16xf32>, vector<2x8x8xf32> -> vector<2x8x8xf32>
    "tpu.trace_stop"() : () -> ()
    %488 = vector.broadcast %6 : vector<1x8x8xf32> to vector<2x8x8xf32>
    %489 = arith.addf %487, %488 : vector<2x8x8xf32>
    %cst_208 = arith.constant dense<0xFF800000> : vector<2x8xf32>
    %490 = vector.multi_reduction <maximumf>, %489, %cst_208 [2] : vector<2x8x8xf32> to vector<2x8xf32>
    %491 = vector.shape_cast %490 : vector<2x8xf32> to vector<2x8x1xf32>
    %492 = vector.broadcast %491 : vector<2x8x1xf32> to vector<2x8x8xf32>
    %493 = arith.subf %489, %492 : vector<2x8x8xf32>
    %494 = math.exp %493 : vector<2x8x8xf32>
    %cst_209 = arith.constant dense<0.000000e+00> : vector<2x8xf32>
    %495 = vector.multi_reduction <add>, %494, %cst_209 [2] : vector<2x8x8xf32> to vector<2x8xf32>
    %496 = vector.shape_cast %495 : vector<2x8xf32> to vector<2x8x1xf32>
    %497 = tpu.reciprocal %496 {approx = true} : vector<2x8x1xf32> -> vector<2x8x1xf32>
    %498 = vector.broadcast %497 : vector<2x8x1xf32> to vector<2x8x8xf32>
    %499 = arith.mulf %494, %498 : vector<2x8x8xf32>
    "tpu.trace_start"() <{level = 10 : i32, message = "bij,bjd->bid"}> : () -> ()
    %cst_210 = arith.constant dense<0.000000e+00> : vector<2x8x16xf32>
    %500 = tpu.matmul %499, %486, %cst_210 {dimension_numbers = #tpu.dot_dimension_numbers<[2], [1], [1], [2], [0, 0, 0, 1, 1, 2], [0], [0]>} : vector<2x8x8xf32>, vector<2x8x16xf32>, vector<2x8x16xf32> -> vector<2x8x16xf32>
    "tpu.trace_stop"() : () -> ()
    %501 = vector.shape_cast %500 : vector<2x8x16xf32> to vector<16x16xf32>
    %c1_211 = arith.constant 1 : index
    %c7_212 = arith.constant 7 : index
    %c0_213 = arith.constant 0 : index
    %c0_214 = arith.constant 0 : index
    %502 = vector.load %arg5[%c1_211, %c7_212, %c0_213, %c0_214] : memref<2x8x16x32xf32, #tpu.memory_space<vmem>>, vector<1x1x16x32xf32>
    %503 = vector.shape_cast %502 : vector<1x1x16x32xf32> to vector<16x32xf32>
    %cst_215 = arith.constant dense<0.000000e+00> : vector<16x32xf32>
    %504 = tpu.matmul %501, %503, %cst_215 {dimension_numbers = #tpu.dot_dimension_numbers<[1], [0], [0], [1], [0, 0, 1, 1], [], []>} : vector<16x16xf32>, vector<16x32xf32>, vector<16x32xf32> -> vector<16x32xf32>
    %505 = arith.addf %481, %504 : vector<16x32xf32>
    %c1_216 = arith.constant 1 : index
    %c0_217 = arith.constant 0 : index
    %c0_218 = arith.constant 0 : index
    %506 = vector.load %arg6[%c1_216, %c0_217, %c0_218] : memref<2x1x32xf32, #tpu.memory_space<vmem>>, vector<1x1x32xf32>
    %507 = vector.shape_cast %506 : vector<1x1x32xf32> to vector<1x32xf32>
    %508 = vector.broadcast %507 : vector<1x32xf32> to vector<16x32xf32>
    %509 = arith.addf %505, %508 : vector<16x32xf32>
    %510 = arith.addf %509, %310 : vector<16x32xf32>
    %c1_219 = arith.constant 1 : index
    %c0_220 = arith.constant 0 : index
    %c0_221 = arith.constant 0 : index
    %511 = vector.load %arg7[%c1_219, %c0_220, %c0_221] : memref<2x1x32xf32, #tpu.memory_space<vmem>>, vector<1x1x32xf32>
    %512 = vector.shape_cast %511 : vector<1x1x32xf32> to vector<1x32xf32>
    %c1_222 = arith.constant 1 : index
    %c0_223 = arith.constant 0 : index
    %c0_224 = arith.constant 0 : index
    %513 = vector.load %arg8[%c1_222, %c0_223, %c0_224] : memref<2x1x32xf32, #tpu.memory_space<vmem>>, vector<1x1x32xf32>
    %514 = vector.shape_cast %513 : vector<1x1x32xf32> to vector<1x32xf32>
    %cst_225 = arith.constant dense<0.000000e+00> : vector<16xf32>
    %515 = vector.multi_reduction <add>, %510, %cst_225 [1] : vector<16x32xf32> to vector<16xf32>
    %516 = vector.shape_cast %515 : vector<16xf32> to vector<16x1xf32>
    %cst_226 = arith.constant 3.200000e+01 : f32
    %517 = vector.broadcast %cst_226 : f32 to vector<16x1xf32>
    %518 = arith.divf %516, %517 : vector<16x1xf32>
    %519 = vector.broadcast %518 : vector<16x1xf32> to vector<16x32xf32>
    %520 = arith.subf %510, %519 : vector<16x32xf32>
    %521 = arith.mulf %520, %520 : vector<16x32xf32>
    %cst_227 = arith.constant dense<0.000000e+00> : vector<16xf32>
    %522 = vector.multi_reduction <add>, %521, %cst_227 [1] : vector<16x32xf32> to vector<16xf32>
    %523 = vector.shape_cast %522 : vector<16xf32> to vector<16x1xf32>
    %cst_228 = arith.constant 3.200000e+01 : f32
    %524 = vector.broadcast %cst_228 : f32 to vector<16x1xf32>
    %525 = arith.divf %523, %524 : vector<16x1xf32>
    %526 = vector.broadcast %518 : vector<16x1xf32> to vector<16x32xf32>
    %527 = arith.subf %510, %526 : vector<16x32xf32>
    %cst_229 = arith.constant 9.99999974E-6 : f32
    %528 = vector.broadcast %cst_229 : f32 to vector<16x1xf32>
    %529 = arith.addf %525, %528 : vector<16x1xf32>
    %530 = math.rsqrt %529 : vector<16x1xf32>
    %531 = vector.broadcast %530 : vector<16x1xf32> to vector<16x32xf32>
    %532 = arith.mulf %527, %531 : vector<16x32xf32>
    %533 = vector.broadcast %512 : vector<1x32xf32> to vector<16x32xf32>
    %534 = arith.mulf %532, %533 : vector<16x32xf32>
    %535 = vector.broadcast %514 : vector<1x32xf32> to vector<16x32xf32>
    %536 = arith.addf %534, %535 : vector<16x32xf32>
    %c1_230 = arith.constant 1 : index
    %c0_231 = arith.constant 0 : index
    %c0_232 = arith.constant 0 : index
    %537 = vector.load %arg9[%c1_230, %c0_231, %c0_232] : memref<2x32x256xf32, #tpu.memory_space<vmem>>, vector<1x32x256xf32>
    %538 = vector.shape_cast %537 : vector<1x32x256xf32> to vector<32x256xf32>
    %cst_233 = arith.constant dense<0.000000e+00> : vector<16x256xf32>
    %539 = tpu.matmul %536, %538, %cst_233 {dimension_numbers = #tpu.dot_dimension_numbers<[1], [0], [0], [1], [0, 0, 1, 1], [], []>} : vector<16x32xf32>, vector<32x256xf32>, vector<16x256xf32> -> vector<16x256xf32>
    %c1_234 = arith.constant 1 : index
    %c0_235 = arith.constant 0 : index
    %c0_236 = arith.constant 0 : index
    %540 = vector.load %arg10[%c1_234, %c0_235, %c0_236] : memref<2x1x256xf32, #tpu.memory_space<vmem>>, vector<1x1x256xf32>
    %541 = vector.shape_cast %540 : vector<1x1x256xf32> to vector<1x256xf32>
    %542 = vector.broadcast %541 : vector<1x256xf32> to vector<16x256xf32>
    %543 = arith.addf %539, %542 : vector<16x256xf32>
    %544 = vector.extract_strided_slice %543 {offsets = [0, 0], sizes = [16, 128], strides = [1, 1]} : vector<16x256xf32> to vector<16x128xf32>
    %545 = vector.extract_strided_slice %543 {offsets = [0, 128], sizes = [16, 128], strides = [1, 1]} : vector<16x256xf32> to vector<16x128xf32>
    %cst_237 = arith.constant 5.000000e-01 : f32
    %546 = vector.broadcast %cst_237 : f32 to vector<16x128xf32>
    %547 = arith.mulf %546, %545 : vector<16x128xf32>
    %cst_238 = arith.constant 0.707106769 : f32
    %548 = vector.broadcast %cst_238 : f32 to vector<16x128xf32>
    %549 = arith.mulf %545, %548 : vector<16x128xf32>
    %550 = math.erf %549 : vector<16x128xf32>
    %cst_239 = arith.constant 1.000000e+00 : f32
    %551 = vector.broadcast %cst_239 : f32 to vector<16x128xf32>
    %552 = arith.addf %551, %550 : vector<16x128xf32>
    %553 = arith.mulf %547, %552 : vector<16x128xf32>
    %554 = arith.mulf %544, %553 : vector<16x128xf32>
    %c1_240 = arith.constant 1 : index
    %c0_241 = arith.constant 0 : index
    %c0_242 = arith.constant 0 : index
    %555 = vector.load %arg11[%c1_240, %c0_241, %c0_242] : memref<2x128x32xf32, #tpu.memory_space<vmem>>, vector<1x128x32xf32>
    %556 = vector.shape_cast %555 : vector<1x128x32xf32> to vector<128x32xf32>
    %cst_243 = arith.constant dense<0.000000e+00> : vector<16x32xf32>
    %557 = tpu.matmul %554, %556, %cst_243 {dimension_numbers = #tpu.dot_dimension_numbers<[1], [0], [0], [1], [0, 0, 1, 1], [], []>} : vector<16x128xf32>, vector<128x32xf32>, vector<16x32xf32> -> vector<16x32xf32>
    %c1_244 = arith.constant 1 : index
    %c0_245 = arith.constant 0 : index
    %c0_246 = arith.constant 0 : index
    %558 = vector.load %arg12[%c1_244, %c0_245, %c0_246] : memref<2x1x32xf32, #tpu.memory_space<vmem>>, vector<1x1x32xf32>
    %559 = vector.shape_cast %558 : vector<1x1x32xf32> to vector<1x32xf32>
    %560 = vector.broadcast %559 : vector<1x32xf32> to vector<16x32xf32>
    %561 = arith.addf %557, %560 : vector<16x32xf32>
    %562 = arith.addf %561, %536 : vector<16x32xf32>
    %563 = vector.shape_cast %562 : vector<16x32xf32> to vector<2x8x32xf32>
    %564 = vector.extract_strided_slice %563 {offsets = [0, 0, 0], sizes = [2, 1, 32], strides = [1, 1, 1]} : vector<2x8x32xf32> to vector<2x1x32xf32>
    %565 = vector.shape_cast %564 : vector<2x1x32xf32> to vector<2x32xf32>
    %c0_247 = arith.constant 0 : index
    %c0_248 = arith.constant 0 : index
    %c0_249 = arith.constant 0 : index
    %566 = vector.load %arg13[%c0_247, %c0_248, %c0_249] : memref<5x32x80xf32, #tpu.memory_space<vmem>>, vector<1x32x80xf32>
    %567 = vector.shape_cast %566 : vector<1x32x80xf32> to vector<32x80xf32>
    %cst_250 = arith.constant dense<0.000000e+00> : vector<2x80xf32>
    %568 = tpu.matmul %565, %567, %cst_250 {dimension_numbers = #tpu.dot_dimension_numbers<[1], [0], [0], [1], [0, 0, 1, 1], [], []>} : vector<2x32xf32>, vector<32x80xf32>, vector<2x80xf32> -> vector<2x80xf32>
    %569 = vector.extract_strided_slice %563 {offsets = [0, 1, 0], sizes = [2, 1, 32], strides = [1, 1, 1]} : vector<2x8x32xf32> to vector<2x1x32xf32>
    %570 = vector.shape_cast %569 : vector<2x1x32xf32> to vector<2x32xf32>
    %c1_251 = arith.constant 1 : index
    %c0_252 = arith.constant 0 : index
    %c0_253 = arith.constant 0 : index
    %571 = vector.load %arg13[%c1_251, %c0_252, %c0_253] : memref<5x32x80xf32, #tpu.memory_space<vmem>>, vector<1x32x80xf32>
    %572 = vector.shape_cast %571 : vector<1x32x80xf32> to vector<32x80xf32>
    %cst_254 = arith.constant dense<0.000000e+00> : vector<2x80xf32>
    %573 = tpu.matmul %570, %572, %cst_254 {dimension_numbers = #tpu.dot_dimension_numbers<[1], [0], [0], [1], [0, 0, 1, 1], [], []>} : vector<2x32xf32>, vector<32x80xf32>, vector<2x80xf32> -> vector<2x80xf32>
    %574 = arith.addf %568, %573 : vector<2x80xf32>
    %575 = vector.extract_strided_slice %563 {offsets = [0, 2, 0], sizes = [2, 1, 32], strides = [1, 1, 1]} : vector<2x8x32xf32> to vector<2x1x32xf32>
    %576 = vector.shape_cast %575 : vector<2x1x32xf32> to vector<2x32xf32>
    %c2_255 = arith.constant 2 : index
    %c0_256 = arith.constant 0 : index
    %c0_257 = arith.constant 0 : index
    %577 = vector.load %arg13[%c2_255, %c0_256, %c0_257] : memref<5x32x80xf32, #tpu.memory_space<vmem>>, vector<1x32x80xf32>
    %578 = vector.shape_cast %577 : vector<1x32x80xf32> to vector<32x80xf32>
    %cst_258 = arith.constant dense<0.000000e+00> : vector<2x80xf32>
    %579 = tpu.matmul %576, %578, %cst_258 {dimension_numbers = #tpu.dot_dimension_numbers<[1], [0], [0], [1], [0, 0, 1, 1], [], []>} : vector<2x32xf32>, vector<32x80xf32>, vector<2x80xf32> -> vector<2x80xf32>
    %580 = arith.addf %574, %579 : vector<2x80xf32>
    %581 = vector.extract_strided_slice %563 {offsets = [0, 3, 0], sizes = [2, 1, 32], strides = [1, 1, 1]} : vector<2x8x32xf32> to vector<2x1x32xf32>
    %582 = vector.shape_cast %581 : vector<2x1x32xf32> to vector<2x32xf32>
    %c3_259 = arith.constant 3 : index
    %c0_260 = arith.constant 0 : index
    %c0_261 = arith.constant 0 : index
    %583 = vector.load %arg13[%c3_259, %c0_260, %c0_261] : memref<5x32x80xf32, #tpu.memory_space<vmem>>, vector<1x32x80xf32>
    %584 = vector.shape_cast %583 : vector<1x32x80xf32> to vector<32x80xf32>
    %cst_262 = arith.constant dense<0.000000e+00> : vector<2x80xf32>
    %585 = tpu.matmul %582, %584, %cst_262 {dimension_numbers = #tpu.dot_dimension_numbers<[1], [0], [0], [1], [0, 0, 1, 1], [], []>} : vector<2x32xf32>, vector<32x80xf32>, vector<2x80xf32> -> vector<2x80xf32>
    %586 = arith.addf %580, %585 : vector<2x80xf32>
    %587 = vector.extract_strided_slice %563 {offsets = [0, 4, 0], sizes = [2, 1, 32], strides = [1, 1, 1]} : vector<2x8x32xf32> to vector<2x1x32xf32>
    %588 = vector.shape_cast %587 : vector<2x1x32xf32> to vector<2x32xf32>
    %c4_263 = arith.constant 4 : index
    %c0_264 = arith.constant 0 : index
    %c0_265 = arith.constant 0 : index
    %589 = vector.load %arg13[%c4_263, %c0_264, %c0_265] : memref<5x32x80xf32, #tpu.memory_space<vmem>>, vector<1x32x80xf32>
    %590 = vector.shape_cast %589 : vector<1x32x80xf32> to vector<32x80xf32>
    %cst_266 = arith.constant dense<0.000000e+00> : vector<2x80xf32>
    %591 = tpu.matmul %588, %590, %cst_266 {dimension_numbers = #tpu.dot_dimension_numbers<[1], [0], [0], [1], [0, 0, 1, 1], [], []>} : vector<2x32xf32>, vector<32x80xf32>, vector<2x80xf32> -> vector<2x80xf32>
    %592 = arith.addf %586, %591 : vector<2x80xf32>
    %c0_267 = arith.constant 0 : index
    %c0_268 = arith.constant 0 : index
    %593 = vector.load %arg14[%c0_267, %c0_268] : memref<1x80xf32, #tpu.memory_space<vmem>>, vector<1x80xf32>
    %594 = vector.broadcast %593 : vector<1x80xf32> to vector<2x80xf32>
    %595 = arith.addf %592, %594 : vector<2x80xf32>
    %c0_269 = arith.constant 0 : index
    %c0_270 = arith.constant 0 : index
    %596 = vector.load %arg15[%c0_269, %c0_270] : memref<80x40xf32, #tpu.memory_space<vmem>>, vector<80x40xf32>
    %cst_271 = arith.constant dense<0.000000e+00> : vector<2x40xf32>
    %597 = tpu.matmul %595, %596, %cst_271 {dimension_numbers = #tpu.dot_dimension_numbers<[1], [0], [0], [1], [0, 0, 1, 1], [], []>} : vector<2x80xf32>, vector<80x40xf32>, vector<2x40xf32> -> vector<2x40xf32>
    %c0_272 = arith.constant 0 : index
    %c0_273 = arith.constant 0 : index
    %598 = vector.load %arg16[%c0_272, %c0_273] : memref<1x40xf32, #tpu.memory_space<vmem>>, vector<1x40xf32>
    %599 = vector.broadcast %598 : vector<1x40xf32> to vector<2x40xf32>
    %600 = arith.addf %597, %599 : vector<2x40xf32>
    %c0_274 = arith.constant 0 : index
    %c0_275 = arith.constant 0 : index
    %601 = vector.load %arg17[%c0_274, %c0_275] : memref<40x1xf32, #tpu.memory_space<vmem>>, vector<40x1xf32>
    %cst_276 = arith.constant dense<0.000000e+00> : vector<2x1xf32>
    %602 = tpu.matmul %600, %601, %cst_276 {dimension_numbers = #tpu.dot_dimension_numbers<[1], [0], [0], [1], [0, 0, 1, 1], [], []>} : vector<2x40xf32>, vector<40x1xf32>, vector<2x1xf32> -> vector<2x1xf32>
    %c0_277 = arith.constant 0 : index
    %c0_278 = arith.constant 0 : index
    %603 = vector.load %arg18[%c0_277, %c0_278] : memref<1x1xf32, #tpu.memory_space<vmem>>, vector<1x1xf32>
    %604 = vector.broadcast %603 : vector<1x1xf32> to vector<2x1xf32>
    %605 = arith.addf %602, %604 : vector<2x1xf32>
    %c0_279 = arith.constant 0 : index
    %c0_280 = arith.constant 0 : index
    %606 = vector.load %arg19[%c0_279, %c0_280] : memref<2x1xf32, #tpu.memory_space<vmem>>, vector<2x1xf32>
    tpu.vector_store %arg19[%c0_279, %c0_280], %605 {strides = array<i32>} : memref<2x1xf32, #tpu.memory_space<vmem>>, vector<2x1xf32>,
    return
  }
  func.func @transform_0(%arg0: i32) -> (i32, i32) {
    %c0_i32 = arith.constant 0 : i32
    %c0_i32_0 = arith.constant 0 : i32
    return %arg0, %c0_i32 : i32, i32
  }
  func.func @transform_1(%arg0: i32) -> (i32, i32, i32) {
    %c0_i32 = arith.constant 0 : i32
    %c0_i32_0 = arith.constant 0 : i32
    %c0_i32_1 = arith.constant 0 : i32
    %c0_i32_2 = arith.constant 0 : i32
    return %c0_i32, %c0_i32_0, %c0_i32_1 : i32, i32, i32
  }
  func.func @transform_2(%arg0: i32) -> (i32, i32, i32) {
    %c0_i32 = arith.constant 0 : i32
    %c0_i32_0 = arith.constant 0 : i32
    %c0_i32_1 = arith.constant 0 : i32
    %c0_i32_2 = arith.constant 0 : i32
    return %c0_i32, %c0_i32_0, %c0_i32_1 : i32, i32, i32
  }
  func.func @transform_3(%arg0: i32) -> (i32, i32, i32) {
    %c0_i32 = arith.constant 0 : i32
    %c0_i32_0 = arith.constant 0 : i32
    %c0_i32_1 = arith.constant 0 : i32
    %c0_i32_2 = arith.constant 0 : i32
    return %c0_i32, %c0_i32_0, %c0_i32_1 : i32, i32, i32
  }
  func.func @transform_4(%arg0: i32) -> (i32, i32, i32, i32) {
    %c0_i32 = arith.constant 0 : i32
    %c0_i32_0 = arith.constant 0 : i32
    %c0_i32_1 = arith.constant 0 : i32
    %c0_i32_2 = arith.constant 0 : i32
    %c0_i32_3 = arith.constant 0 : i32
    return %c0_i32, %c0_i32_0, %c0_i32_1, %c0_i32_2 : i32, i32, i32, i32
  }
  func.func @transform_5(%arg0: i32) -> (i32, i32, i32) {
    %c0_i32 = arith.constant 0 : i32
    %c0_i32_0 = arith.constant 0 : i32
    %c0_i32_1 = arith.constant 0 : i32
    %c0_i32_2 = arith.constant 0 : i32
    return %c0_i32, %c0_i32_0, %c0_i32_1 : i32, i32, i32
  }
  func.func @transform_6(%arg0: i32) -> (i32, i32, i32) {
    %c0_i32 = arith.constant 0 : i32
    %c0_i32_0 = arith.constant 0 : i32
    %c0_i32_1 = arith.constant 0 : i32
    %c0_i32_2 = arith.constant 0 : i32
    return %c0_i32, %c0_i32_0, %c0_i32_1 : i32, i32, i32
  }
  func.func @transform_7(%arg0: i32) -> (i32, i32, i32) {
    %c0_i32 = arith.constant 0 : i32
    %c0_i32_0 = arith.constant 0 : i32
    %c0_i32_1 = arith.constant 0 : i32
    %c0_i32_2 = arith.constant 0 : i32
    return %c0_i32, %c0_i32_0, %c0_i32_1 : i32, i32, i32
  }
  func.func @transform_8(%arg0: i32) -> (i32, i32, i32) {
    %c0_i32 = arith.constant 0 : i32
    %c0_i32_0 = arith.constant 0 : i32
    %c0_i32_1 = arith.constant 0 : i32
    %c0_i32_2 = arith.constant 0 : i32
    return %c0_i32, %c0_i32_0, %c0_i32_1 : i32, i32, i32
  }
  func.func @transform_9(%arg0: i32) -> (i32, i32, i32) {
    %c0_i32 = arith.constant 0 : i32
    %c0_i32_0 = arith.constant 0 : i32
    %c0_i32_1 = arith.constant 0 : i32
    %c0_i32_2 = arith.constant 0 : i32
    return %c0_i32, %c0_i32_0, %c0_i32_1 : i32, i32, i32
  }
  func.func @transform_10(%arg0: i32) -> (i32, i32, i32) {
    %c0_i32 = arith.constant 0 : i32
    %c0_i32_0 = arith.constant 0 : i32
    %c0_i32_1 = arith.constant 0 : i32
    %c0_i32_2 = arith.constant 0 : i32
    return %c0_i32, %c0_i32_0, %c0_i32_1 : i32, i32, i32
  }
  func.func @transform_11(%arg0: i32) -> (i32, i32, i32) {
    %c0_i32 = arith.constant 0 : i32
    %c0_i32_0 = arith.constant 0 : i32
    %c0_i32_1 = arith.constant 0 : i32
    %c0_i32_2 = arith.constant 0 : i32
    return %c0_i32, %c0_i32_0, %c0_i32_1 : i32, i32, i32
  }
  func.func @transform_12(%arg0: i32) -> (i32, i32, i32) {
    %c0_i32 = arith.constant 0 : i32
    %c0_i32_0 = arith.constant 0 : i32
    %c0_i32_1 = arith.constant 0 : i32
    %c0_i32_2 = arith.constant 0 : i32
    return %c0_i32, %c0_i32_0, %c0_i32_1 : i32, i32, i32
  }
  func.func @transform_13(%arg0: i32) -> (i32, i32) {
    %c0_i32 = arith.constant 0 : i32
    %c0_i32_0 = arith.constant 0 : i32
    %c0_i32_1 = arith.constant 0 : i32
    return %c0_i32, %c0_i32_0 : i32, i32
  }
  func.func @transform_14(%arg0: i32) -> (i32, i32) {
    %c0_i32 = arith.constant 0 : i32
    %c0_i32_0 = arith.constant 0 : i32
    %c0_i32_1 = arith.constant 0 : i32
    return %c0_i32, %c0_i32_0 : i32, i32
  }
  func.func @transform_15(%arg0: i32) -> (i32, i32) {
    %c0_i32 = arith.constant 0 : i32
    %c0_i32_0 = arith.constant 0 : i32
    %c0_i32_1 = arith.constant 0 : i32
    return %c0_i32, %c0_i32_0 : i32, i32
  }
  func.func @transform_16(%arg0: i32) -> (i32, i32) {
    %c0_i32 = arith.constant 0 : i32
    %c0_i32_0 = arith.constant 0 : i32
    %c0_i32_1 = arith.constant 0 : i32
    return %c0_i32, %c0_i32_0 : i32, i32
  }
  func.func @transform_17(%arg0: i32) -> (i32, i32) {
    %c0_i32 = arith.constant 0 : i32
    %c0_i32_0 = arith.constant 0 : i32
    %c0_i32_1 = arith.constant 0 : i32
    return %c0_i32, %c0_i32_0 : i32, i32
  }
  func.func @transform_18(%arg0: i32) -> (i32, i32) {
    %c0_i32 = arith.constant 0 : i32
    %c0_i32_0 = arith.constant 0 : i32
    return %arg0, %c0_i32 : i32, i32
  }
}

</mosaic_0001>

<bundles_post_ra>
// kernel: tpu_custom_call.1
= control target key start
LH: loop header
LB: loop body
LE: loop exit
PB: predicated region body
PF: predicated region fallthrough
CT: control target
= control target key end

     0   :  { %s5337_s0 = inlined_call_operand.vmem [shape: f32[16,32], index: 0, kind: input, shape index: {}]   ;;  %s5338_s1 = inlined_call_operand.vmem [shape: f32[2,1,32], index: 1, kind: input, shape index: {}]   ;;  %s5339_s2 = inlined_call_operand.vmem [shape: f32[2,1,32], index: 2, kind: input, shape index: {}]   ;;  %s5340_s3 = inlined_call_operand.hbm [shape: f32[2,32,384], index: 3, kind: input, shape index: {}]   ;;  %s5341_s4 = inlined_call_operand.vmem [shape: f32[2,8,16,32], index: 4, kind: input, shape index: {}]   ;;  %s5342_s5 = inlined_call_operand.vmem [shape: f32[2,1,32], index: 5, kind: input, shape index: {}]   ;;  %s5343_s6 = inlined_call_operand.vmem [shape: f32[2,1,32], index: 6, kind: input, shape index: {}]   ;;  %s5344_s7 = inlined_call_operand.vmem [shape: f32[2,1,32], index: 7, kind: input, shape index: {}]   ;;  %s5345_s8 = inlined_call_operand.hbm [shape: f32[2,32,256], index: 8, kind: input, shape index: {}]   ;;  %s5346_s9 = inlined_call_operand.vmem [shape: f32[2,1,256], index: 9, kind: input, shape index: {}]   ;;  %s5347_s10 = inlined_call_operand.vmem [shape: f32[2,128,32], index: 10, kind: input, shape index: {}]   ;;  %s5348_s11 = inlined_call_operand.vmem [shape: f32[2,1,32], index: 11, kind: input, shape index: {}]   ;;  %s5349_s12 = inlined_call_operand.hbm [shape: f32[5,32,80], index: 12, kind: input, shape index: {}]   ;;  %s5350_s13 = inlined_call_operand.vmem [shape: f32[1,80], index: 13, kind: input, shape index: {}]   ;;  %s5351_s14 = inlined_call_operand.vmem [shape: f32[80,40], index: 14, kind: input, shape index: {}]   ;;  %s5352_s15 = inlined_call_operand.vmem [shape: f32[1,40], index: 15, kind: input, shape index: {}]   ;;  %s5353_s16 = inlined_call_operand.vmem [shape: f32[40,1], index: 16, kind: input, shape index: {}]   ;;  %s5354_s17 = inlined_call_operand.<no memory space> [shape: f32[1,1], index: 17, kind: input, shape index: {}]   ;;  %s5355_s18 = inlined_call_operand.vmem [shape: f32[2,1], index: 18, kind: output, shape index: {}]  }
   0x1   :  { %5359 = sst [smem:[#allocation10_spill]] %s5337_s0  ;;  %v23_v0 = vstv %s5354_s17 }
   0x2   :  { %5360 = sst [smem:[#allocation11_spill]] %s5338_s1  ;;  %24 = vst [vmem:[#allocation2] sm:$0x1] %v23_v0 }
   0x3   :  { %5361 = sst [smem:[#allocation12_spill]] %s5339_s2 }
   0x4   :  { %25 = vsyncpa [#allocation4], 0 }
   0x5   :  { %26 = vsyncpa [#allocation6], 0  ;;  %s58_s0 = sshll.u32 %s5345_s8, 4  ;;  %s4279_s19 = smov [#allocation5]   ;;  %s59_s0 = int_to_ptr.hbm [resolvable:$true] %s58_s0 }
   0x6   :  { %s60_s1 = sshll.u32 %s4279_s19, 4  ;;  %s37_s22 = sshll.u32 %s5340_s3, 4  ;;  %s61_s1 = int_to_ptr.vmem [resolvable:$true] %s60_s1  ;;  %s38_s22 = int_to_ptr.hbm [resolvable:$true] %s37_s22 }
   0x7   :  { %s4280_s2 = smov 256   ;;  %s4281_s23 = smov 16  }
   0x8   :  { %66 = dma.hbm_to_vmem [thread:$0]  %s59_s0, 2048, %s61_s1, [#allocation6], %s4280_s2, %s4280_s2, %s4281_s23  }
   0x9   :  { %s4282_s17 = smov [#allocation3]   ;;  %s4283_s25 = smov 384  }
   0xa   :  { %s39_s24 = sshll.u32 %s4282_s17, 4  ;;  %s4284_s26 = smov 24   ;;  %s40_s24 = int_to_ptr.vmem [resolvable:$true] %s39_s24 }
   0xb   :  { %45 = dma.hbm_to_vmem [thread:$0]  %s38_s22, 3072, %s40_s24, [#allocation4], %s4283_s25, %s4283_s25, %s4284_s26  }
   0xc   :  { %s77_s28 = sshll.u32 %s5349_s12, 4  ;;  %s4285_s29 = smov [#allocation7]   ;;  %s78_s28 = int_to_ptr.hbm [resolvable:$true] %s77_s28 }
   0xd   :  { %s79_s30 = sshll.u32 %s4285_s29, 4  ;;  %s4286_s3 = smov 128   ;;  %s80_s30 = int_to_ptr.vmem [resolvable:$true] %s79_s30 }
   0xe   :  { %s4287_s19 = smov 8  }
   0xf   :  { %85 = dma.hbm_to_vmem [thread:$0]  %s78_s28, 2560, %s80_s30, [#allocation6], %s4286_s3, %s4286_s3, %s4287_s19  }
  0x10   :  { %4275 = dma.done.wait [#allocation4], 3072  }
  0x11   :  { %4276 = vsyncadd [#allocation4], 4294964224 }
  0x12   :  { %4277 = dma.done.wait [#allocation6], 4608  }
  0x13   :  { %4278 = vsyncadd [#allocation6], 4294962688  ;;  %vm116_vm0 = vcmask 261120   ;;  %s5362_s20 = sld [smem:[#allocation10_spill]]  ;;  %v4288_v5 = vmov 32.0   ;;  %v187_v22 = vld [vmem:[#allocation3 + $0x48] sm:$0xff] }
  0x14   :  { %4049 = vrcp.f32 %v4288_v5  ;;  %v188_v23 = vld [vmem:[#allocation3 + $0x50] sm:$0xff]  ;;  %v189_v24 = vld [vmem:[#allocation3 + $0x58] sm:$0xff]  ;;  %208 = vmatpush.msra.mxu0 %v187_v22  ;;  %v186_v27 = vld [vmem:[#allocation3 + $0x40] sm:$0xff]  ;;  %s5363_s17 = sld [smem:[#allocation11_spill]]  ;;  %vm267_vm8 = vcmask 130048   ;;  %s4289_s8 = smov 112  }
  0x15   :  { %231 = vmatpush.msra.mxu1 %v188_v23  ;;  %254 = vmatpush.msra.mxu2 %v189_v24  ;;  %v184_v25 = vld [vmem:[#allocation3 + $0x30] sm:$0xff]  ;;  %v185_v26 = vld [vmem:[#allocation3 + $0x38] sm:$0xff]  ;;  %v182_v29 = vld [vmem:[#allocation3 + $0x20] sm:$0xff]  ;;  %s5364_s26 = sld [smem:[#allocation12_spill]]  ;;  %vm320_vm10 = vcmask 64512   ;;  %s4291_s27 = smov 96  }
  0x16   :  { %209 = vmatpush.msra.mxu0 %v184_v25  ;;  %v181_v28 = vld [vmem:[#allocation3 + $0x18] sm:$0xff]  ;;  %v183_v30 = vld [vmem:[#allocation3 + $0x28] sm:$0xff]  ;;  %v178_v31 = vld [vmem:[#allocation3] sm:$0xff]  ;;  %s4292_s28 = smov 80   ;;  %s4293_s21 = smov 64  }
  0x17   :  { %232 = vmatpush.msra.mxu1 %v185_v26  ;;  %255 = vmatpush.msra.mxu2 %v186_v27  ;;  %v179_v32 = vld [vmem:[#allocation3 + $0x8] sm:$0xff]  ;;  %v180_v33 = vld [vmem:[#allocation3 + $0x10] sm:$0xff]  ;;  %s4294_s0 = smov 48   ;;  %s4295_s2 = smov 32  }
  0x18   :  { %210 = vmatpush.msra.mxu0 %v181_v28 }
  0x19   :  { %v108_v1 = vld [vmem:[%s5362_s20] sm:$0xff]  ;;  %v109_v3 = vld [vmem:[%s5362_s20 + $0x8] sm:$0xff]  ;;  %233 = vmatpush.msra.mxu1 %v182_v29  ;;  %256 = vmatpush.msra.mxu2 %v183_v30 }
  0x1a   :  { %v117_v2 = vsel %vm116_vm0, %v108_v1, 0.0  ;;  %v120_v4 = vsel %vm116_vm0, %v109_v3, 0.0  ;;  %v4050_v6 = vpop.eup %4049  ;;  %211 = vmatpush.msra.mxu0 %v178_v31  ;;  %v4034_v48 = vld [vmem:[%s5363_s17] ss:$0 sm:$0xff] }
  0x1b   :  { %118 = vadd.xlane.f32.xlu0 %v117_v2  ;;  %v124_v7 = vmul.f32 32.0, %v4050_v6  ;;  %vm128_vm1 = vweird.f32 %v4050_v6  ;;  %234 = vmatpush.msra.mxu1 %v179_v32  ;;  %v4035_v52 = vld [vmem:[%s5364_s26] ss:$0 sm:$0xff] }
  0x1c   :  { %257 = vmatpush.msra.mxu2 %v180_v33 }
  0x1d   :  { %v125_v8 = vsub.f32 1.0, %v124_v7 }
  0x1f   :  { %v126_v9 = vmul.f32 %v4050_v6, %v125_v8  ;;  %v110_v8 = vlaneseq }
  0x21   :  { %v127_v10 = vadd.f32 %v4050_v6, %v126_v9 }
  0x23   :  { %121 = vadd.xlane.f32.xlu0 %v120_v4  ;;  %v4412_v11 = vsel %vm128_vm1, %v4050_v6, %v127_v10 }
  0x8e   :  { %v119_v12 = vpop.xlane.xlu0 %118 }
  0x8f   :  { %v130_v13 = vmul.f32 %v4412_v11, %v119_v12  ;;  %v111_v12 = vand.u32 127, %v110_v8 }
  0x91   :  { %v132_v14 = vsub.f32 %v108_v1, %v130_v13  ;;  %vm112_vm9 = vcmp.lt.s32.totalorder %v111_v12, 5  ;;  %v4290_v13 = vmov -1e+30  }
  0x93   :  { %v134_v15 = vmul.f32 %v132_v14, %v132_v14 }
  0x95   :  { %v136_v16 = vsel %vm116_vm0, %v134_v15, 0.0 }
  0x96   :  { %137 = vadd.xlane.f32.xlu1 %v136_v16  ;;  %v122_v17 = vpop.xlane.xlu0 %121 }
  0x97   :  { %v131_v18 = vmul.f32 %v4412_v11, %v122_v17 }
  0x99   :  { %v4417_v19 = vsub.f32 %v109_v3, %v131_v18 }
  0x9b   :  { %v135_v20 = vmul.f32 %v4417_v19, %v4417_v19 }
  0x9d   :  { %v139_v21 = vsel %vm116_vm0, %v135_v20, 0.0 }
  0x9e   :  { %140 = vadd.xlane.f32.xlu1 %v139_v21 }
 0x109   :  { %v138_v34 = vpop.xlane.xlu1 %137 }
 0x10a   :  { %v142_v35 = vmul.f32 %v138_v34, %v4412_v11 }
 0x10c   :  { %v144_v36 = vadd.f32 1e-05, %v142_v35 }
 0x10e   :  { %4051 = vrsqrt.f32 %v144_v36  ;;  %vm152_vm3 = vweird.f32 %v144_v36 }
 0x111   :  { %v141_v37 = vpop.xlane.xlu1 %140 }
 0x112   :  { %v143_v38 = vmul.f32 %v141_v37, %v4412_v11 }
 0x114   :  { %v4052_v39 = vpop.eup %4051  ;;  %v145_v40 = vadd.f32 1e-05, %v143_v38 }
 0x115   :  { %v147_v41 = vmul.f32 %v4052_v39, %v144_v36  ;;  %vm153_vm2 = vweird.f32 %v4052_v39 }
 0x116   :  { %4053 = vrsqrt.f32 %v145_v40  ;;  %vm154_vm4 = vmor %vm152_vm3, %vm153_vm2  ;;  %vm162_vm6 = vweird.f32 %v145_v40 }
 0x117   :  { %v148_v42 = vmul.f32 %v4052_v39, %v147_v41  ;;  %v390_v41 = vld [vmem:[%s5341_s4 + $0x8] sm:$0xff] }
 0x119   :  { %v149_v43 = vmul.f32 0.5, %v148_v42  ;;  %v389_v42 = vld [vmem:[%s5341_s4] sm:$0xff] }
 0x11b   :  { %v150_v44 = vsub.f32 1.5, %v149_v43 }
 0x11c   :  { %v4054_v45 = vpop.eup %4053 }
 0x11d   :  { %v151_v46 = vmul.f32 %v4052_v39, %v150_v44  ;;  %v157_v47 = vmul.f32 %v4054_v45, %v145_v40  ;;  %vm163_vm5 = vweird.f32 %v4054_v45 }
 0x11e   :  { %vm164_vm7 = vmor %vm162_vm6, %vm163_vm5 }
 0x11f   :  { %v155_v49 = vsel %vm154_vm4, %v4052_v39, %v151_v46  ;;  %v158_v50 = vmul.f32 %v4054_v45, %v157_v47 }
 0x120   :  { %v166_v51 = vmul.f32 %v155_v49, %v132_v14  ;;  %v4481_v14 = vsel %vm112_vm9, 0.0, %v4290_v13 }
 0x121   :  { %v159_v53 = vmul.f32 0.5, %v158_v50 }
 0x122   :  { %v171_v54 = vmul.f32 %v4034_v48, %v166_v51 }
 0x123   :  { %v160_v55 = vsub.f32 1.5, %v159_v53 }
 0x124   :  { %v4430_v56 = vadd.f32 %v4035_v52, %v171_v54 }
 0x125   :  { %v161_v57 = vmul.f32 %v4054_v45, %v160_v55 }
 0x126   :  { %3790 = vmatmul.msk.f32.vlgmr.msra.gmra.mxu0 %vm116_vm0, %v4430_v56  ;;  %3792 = vmatmul.msk.f32.vlgmr.msra.gmra.mxu1 %vm116_vm0, %v4430_v56 }
 0x127   :  { %v165_v58 = vsel %vm164_vm7, %v4054_v45, %v161_v57  ;;  %3794 = vmatmul.msk.f32.vlgmr.msra.gmra.mxu2 %vm116_vm0, %v4430_v56 }
 0x128   :  { %v167_v59 = vmul.f32 %v165_v58, %v4417_v19 }
 0x12a   :  { %v172_v60 = vmul.f32 %v4034_v48, %v167_v59 }
 0x12c   :  { %v4439_v61 = vadd.f32 %v4035_v52, %v172_v60 }
 0x12e   :  { %3791 = vmatmul.msk.f32.gmra.mxu0 %vm116_vm0, %v4439_v61  ;;  %3793 = vmatmul.msk.f32.gmra.mxu1 %vm116_vm0, %v4439_v61 }
 0x12f   :  { %3795 = vmatmul.msk.f32.gmra.mxu2 %vm116_vm0, %v4439_v61 }
 0x1a3   :  { %v213_v62 = vpop.f32.mrf.mxu0  ;;  %v4447_v63 = vpop.f32.mrf.mxu1 }
 0x1a4   :  { %v4449_v0 = vmul.f32 0.25, %v213_v62  ;;  %393 = vrot.lane.b32.xlu2 %v4447_v63, %s4289_s8  ;;  %3796 = vmatpush.xpose.msk.msra.mxu3 %vm267_vm8, %v4447_v63 }
 0x1a7   :  { %3797 = vmatmul.msk.f32.vlgmr.msra.gmra.mxu3 %vm267_vm8, %v4449_v0 }
 0x1aa   :  { %v4457_v1 = vpop.f32.mrf.mxu2 }
 0x1ab   :  { %v216_v2 = vpop.f32.mrf.mxu0  ;;  %v4459_v3 = vpop.f32.mrf.mxu1 }
 0x1ac   :  { %v4461_v4 = vmul.f32 0.25, %v216_v2  ;;  %391 = vrot.lane.b32.xlu2 %v4449_v0, %s4289_s8  ;;  %421 = vrot.lane.b32.xlu0 %v4459_v3, %s4289_s8 }
 0x1ad   :  { %3798 = vmatpush.xpose.msk.msrb.mxu3 %vm267_vm8, %v4459_v3 }
 0x1ae   :  { %419 = vrot.lane.b32.xlu1 %v4461_v4, %s4289_s8 }
 0x1b0   :  { %3799 = vmatmul.msk.f32.vlgmr.msrb.gmra.mxu3 %vm267_vm8, %v4461_v4 }
 0x1b1   :  { %361 = vmatpush.msra.mxu3 %v4457_v1 }
 0x1b2   :  { %v4474_v5 = vpop.f32.mrf.mxu2 }
 0x1b3   :  { %384 = vmatpush.msrb.mxu3 %v4474_v5 }
 0x1fe   :  { %v394_v6 = vpop.permute.xlu2 %393 }
 0x1ff   :  { %3802 = vmatpush.xpose.msk.msrb.mxu1 %vm267_vm8, %v394_v6 }
 0x206   :  { %v392_v7 = vpop.permute.xlu2 %391 }
 0x207   :  { %3803 = vmatmul.msk.f32.vlgmr.msrb.gmra.mxu1 %vm267_vm8, %v392_v7 }
 0x21e   :  { %v422_v9 = vpop.permute.xlu0 %421 }
 0x21f   :  { %3804 = vmatpush.xpose.msk.msrb.mxu2 %vm267_vm8, %v422_v9 }
 0x220   :  { %v420_v10 = vpop.permute.xlu1 %419 }
 0x222   :  { %3805 = vmatmul.msk.f32.vlgmr.msrb.gmra.mxu2 %vm267_vm8, %v420_v10 }
 0x223   :  { %575 = vmatpush.msra.mxu2 %v390_v41 }
 0x225   :  { %576 = vmatpush.msra.mxu2 %v389_v42 }
 0x22a   :  { %v291_v15 = vpop.f32.mrf.mxu3 }
 0x22b   :  { %v292_v16 = vadd.f32 %v291_v15, %v4481_v14 }
 0x22d   :  { %v321_v17 = vsel %vm320_vm10, %v292_v16, -inf }
 0x22e   :  { %322 = vmax.xlane.f32.xlu2 %v321_v17  ;;  %v3809_v17 = vld [vmem:[%s5341_s4 + $0x18] sm:$0xff] }
 0x22f   :  { %546 = vmatpush.msra.mxu1 %v3809_v17 }
 0x233   :  { %v317_v18 = vpop.f32.mrf.mxu3 }
 0x234   :  { %v318_v19 = vadd.f32 %v317_v18, %v4481_v14  ;;  %v3808_v18 = vld [vmem:[%s5341_s4 + $0x10] sm:$0xff] }
 0x235   :  { %547 = vmatpush.msra.mxu1 %v3808_v18 }
 0x236   :  { %v324_v20 = vsel %vm320_vm10, %v318_v19, -inf }
 0x237   :  { %325 = vmax.xlane.f32.xlu0 %v324_v20 }
 0x24b   :  { %586 = vrot.lane.b32.xlu0 %v4447_v63, %s4291_s27 }
 0x253   :  { %614 = vrot.lane.b32.xlu0 %v4459_v3, %s4291_s27 }
 0x284   :  { %v416_v31 = vpop.f32.mrf.mxu1 }
 0x285   :  { %v417_v32 = vadd.f32 %v416_v31, %v4481_v14 }
 0x287   :  { %v447_v33 = vsel %vm320_vm10, %v417_v32, -inf }
 0x2a1   :  { %v323_v21 = vpop.xlane.xlu2 %322 }
 0x2a2   :  { %v327_v22 = vsub.f32 %v292_v16, %v323_v21 }
 0x2a4   :  { %v329_v23 = vmul.f32 1.442695, %v327_v22 }
 0x2a5   :  { %v444_v34 = vpop.f32.mrf.mxu2 }
 0x2a6   :  { %4055 = vpow2.f32 %v329_v23  ;;  %v445_v35 = vadd.f32 %v444_v34, %v4481_v14 }
 0x2a8   :  { %v450_v36 = vsel %vm320_vm10, %v445_v35, -inf }
 0x2aa   :  { %v326_v24 = vpop.xlane.xlu0 %325 }
 0x2ab   :  { %v328_v25 = vsub.f32 %v318_v19, %v326_v24 }
 0x2ac   :  { %v4056_v26 = vpop.eup %4055 }
 0x2ad   :  { %v331_v27 = vmul.f32 1.442695, %v328_v25  ;;  %v333_v28 = vsel %vm320_vm10, %v4056_v26, 0.0 }
 0x2ae   :  { %334 = vadd.xlane.f32.xlu1 %v333_v28 }
 0x2af   :  { %4057 = vpow2.f32 %v331_v27 }
 0x2b5   :  { %v4058_v29 = vpop.eup %4057 }
 0x2b6   :  { %v336_v30 = vsel %vm320_vm10, %v4058_v29, 0.0 }
 0x2b7   :  { %337 = vadd.xlane.f32.xlu2 %v336_v30 }
 0x2bd   :  { %v587_v53 = vpop.permute.xlu0 %586 }
 0x2bf   :  { %448 = vmax.xlane.f32.xlu2 %v447_v33 }
 0x2c5   :  { %v615_v59 = vpop.permute.xlu0 %614 }
 0x2c7   :  { %451 = vmax.xlane.f32.xlu2 %v450_v36  ;;  %584 = vrot.lane.b32.xlu1 %v4449_v0, %s4291_s27 }
 0x2df   :  { %470 = vrot.lane.b32.xlu2 %v4457_v1, %s4289_s8 }
 0x2e7   :  { %497 = vrot.lane.b32.xlu2 %v4474_v5, %s4289_s8 }
 0x2ef   :  { %750 = vrot.lane.b32.xlu2 %v4447_v63, %s4292_s28 }
 0x321   :  { %v335_v37 = vpop.xlane.xlu1 %334 }
 0x322   :  { %4059 = vrcp.f32 %v335_v37 }
 0x328   :  { %v4060_v38 = vpop.eup %4059 }
 0x329   :  { %v341_v39 = vmul.f32 %v4060_v38, %v4056_v26 }
 0x32a   :  { %v338_v40 = vpop.xlane.xlu2 %337 }
 0x32b   :  { %4061 = vrcp.f32 %v338_v40  ;;  %3800 = vmatmul.msk.f32.vlgmr.msra.gmra.mxu3 %vm320_vm10, %v341_v39 }
 0x331   :  { %v4062_v43 = vpop.eup %4061 }
 0x332   :  { %v342_v44 = vmul.f32 %v4062_v43, %v4058_v29  ;;  %v449_v45 = vpop.xlane.xlu2 %448 }
 0x333   :  { %v453_v46 = vsub.f32 %v417_v32, %v449_v45  ;;  %v4019_v32 = vpack.i.bf16 %v4474_v5, %v4457_v1 }
 0x334   :  { %3801 = vmatmul.msk.f32.vlgmr.msrb.gmra.mxu3 %vm320_vm10, %v342_v44 }
 0x335   :  { %v455_v47 = vmul.f32 1.442695, %v453_v46 }
 0x337   :  { %4063 = vpow2.f32 %v455_v47 }
 0x339   :  { %v585_v2 = vpop.permute.xlu1 %584 }
 0x33a   :  { %v452_v48 = vpop.xlane.xlu2 %451 }
 0x33b   :  { %v454_v49 = vsub.f32 %v445_v35, %v452_v48 }
 0x33d   :  { %v4064_v50 = vpop.eup %4063  ;;  %v457_v51 = vmul.f32 1.442695, %v454_v49 }
 0x33e   :  { %v459_v52 = vsel %vm320_vm10, %v4064_v50, 0.0 }
 0x33f   :  { %4065 = vpow2.f32 %v457_v51  ;;  %460 = vadd.xlane.f32.xlu0 %v459_v52 }
 0x342   :  { %v471_v54 = vpop.permute.xlu2 %470 }
 0x343   :  { %491 = vmatpush.msra.mxu3 %v471_v54 }
 0x345   :  { %3814 = vmatpush.xpose.msk.msrb.mxu3 %vm267_vm8, %v587_v53  ;;  %v4066_v55 = vpop.eup %4065 }
 0x346   :  { %v462_v57 = vsel %vm320_vm10, %v4066_v55, 0.0 }
 0x347   :  { %463 = vadd.xlane.f32.xlu1 %v462_v57 }
 0x34a   :  { %v498_v58 = vpop.permute.xlu2 %497 }
 0x34b   :  { %518 = vmatpush.msrb.mxu0 %v498_v58 }
 0x34d   :  { %3816 = vmatpush.xpose.msk.msra.mxu0 %vm267_vm8, %v615_v59 }
 0x352   :  { %v751_v60 = vpop.permute.xlu2 %750 }
 0x353   :  { %612 = vrot.lane.b32.xlu0 %v4461_v4, %s4291_s27  ;;  %3824 = vmatpush.xpose.msk.msrb.mxu2 %vm267_vm8, %v751_v60 }
 0x360   :  { %748 = vrot.lane.b32.xlu1 %v4449_v0, %s4292_s28 }
 0x3ae   :  { %v363_v62 = vpop.f32.mrf.mxu3 }
 0x3af   :  { %3812 = vmatmul.msk.f32.vlgmr.msra.gmra.mxu2 %vm267_vm8, %v363_v62 }
 0x3b2   :  { %v461_v6 = vpop.xlane.xlu0 %460 }
 0x3b3   :  { %4067 = vrcp.f32 %v461_v6 }
 0x3b7   :  { %v386_v7 = vpop.f32.mrf.mxu3 }
 0x3b8   :  { %3813 = vmatmul.msk.f32.gmra.mxu2 %vm267_vm8, %v386_v7 }
 0x3b9   :  { %v4068_v8 = vpop.eup %4067 }
 0x3ba   :  { %v467_v9 = vmul.f32 %v4068_v8, %v4064_v50  ;;  %v464_v10 = vpop.xlane.xlu1 %463 }
 0x3bb   :  { %4069 = vrcp.f32 %v464_v10  ;;  %v3820_v10 = vld [vmem:[%s5341_s4 + $0x20] sm:$0xff] }
 0x3bc   :  { %3806 = vmatmul.msk.f32.vlgmr.msra.gmra.mxu3 %vm320_vm10, %v467_v9  ;;  %v3821_v9 = vld [vmem:[%s5341_s4 + $0x28] sm:$0xff] }
 0x3bd   :  { %737 = vmatpush.msrb.mxu1 %v3821_v9 }
 0x3bf   :  { %738 = vmatpush.msrb.mxu1 %v3820_v10 }
 0x3c1   :  { %v4070_v12 = vpop.eup %4069 }
 0x3c2   :  { %v468_v13 = vmul.f32 %v4070_v12, %v4066_v55  ;;  %v3831_v12 = vld [vmem:[%s5341_s4 + $0x38] sm:$0xff] }
 0x3c4   :  { %3807 = vmatmul.msk.f32.vlgmr.msrb.gmra.mxu0 %vm320_vm10, %v468_v13  ;;  %3815 = vmatmul.msk.f32.vlgmr.msrb.gmra.mxu3 %vm267_vm8, %v585_v2  ;;  %v3830_v13 = vld [vmem:[%s5341_s4 + $0x30] sm:$0xff] }
 0x3c5   :  { %v613_v15 = vpop.permute.xlu0 %612 }
 0x3cc   :  { %3817 = vmatmul.msk.f32.vlgmr.msra.gmra.mxu0 %vm267_vm8, %v613_v15 }
 0x3d2   :  { %v749_v16 = vpop.permute.xlu1 %748 }
 0x3d3   :  { %3825 = vmatmul.msk.f32.vlgmr.msrb.gmra.mxu2 %vm267_vm8, %v749_v16 }
 0x432   :  { %v4536_v21 = vpop.f32.mrf.mxu2 }
 0x43b   :  { %v4543_v28 = vpop.f32.mrf.mxu2 }
 0x43f   :  { %v493_v19 = vpop.f32.mrf.mxu3 }
 0x440   :  { %3810 = vmatmul.msk.f32.vlgmr.msra.gmra.mxu1 %vm267_vm8, %v493_v19 }
 0x441   :  { %v520_v20 = vpop.f32.mrf.mxu0 }
 0x447   :  { %v609_v22 = vpop.f32.mrf.mxu3 }
 0x448   :  { %v610_v23 = vadd.f32 %v609_v22, %v4481_v14  ;;  %3811 = vmatmul.msk.f32.gmra.mxu1 %vm267_vm8, %v520_v20 }
 0x449   :  { %v637_v24 = vpop.f32.mrf.mxu0 }
 0x44a   :  { %v638_v25 = vadd.f32 %v637_v24, %v4481_v14  ;;  %v640_v26 = vsel %vm320_vm10, %v610_v23, -inf }
 0x44b   :  { %641 = vmax.xlane.f32.xlu2 %v640_v26 }
 0x44c   :  { %v643_v27 = vsel %vm320_vm10, %v638_v25, -inf }
 0x44d   :  { %644 = vmax.xlane.f32.xlu0 %v643_v27 }
 0x456   :  { %v773_v29 = vpop.f32.mrf.mxu2 }
 0x457   :  { %v774_v30 = vadd.f32 %v773_v29, %v4481_v14 }
 0x459   :  { %v804_v31 = vsel %vm320_vm10, %v774_v30, -inf }
 0x45a   :  { %805 = vmax.xlane.f32.xlu1 %v804_v31 }
 0x461   :  { %778 = vrot.lane.b32.xlu0 %v4459_v3, %s4292_s28 }
 0x473   :  { %4020 = vrot.lane.b32.xlu1 %v4019_v32, %s4291_s27 }
 0x47b   :  { %826 = vrot.lane.b32.xlu1 %v4457_v1, %s4292_s28 }
 0x483   :  { %912 = vrot.lane.b32.xlu1 %v4449_v0, %s4293_s21 }
 0x48b   :  { %990 = vrot.lane.b32.xlu1 %v4457_v1, %s4293_s21 }
 0x4be   :  { %v642_v33 = vpop.xlane.xlu2 %641 }
 0x4bf   :  { %v646_v34 = vsub.f32 %v610_v23, %v642_v33 }
 0x4c0   :  { %v645_v35 = vpop.xlane.xlu0 %644 }
 0x4c1   :  { %v648_v36 = vmul.f32 1.442695, %v646_v34  ;;  %v647_v37 = vsub.f32 %v638_v25, %v645_v35 }
 0x4c3   :  { %4071 = vpow2.f32 %v648_v36  ;;  %v650_v38 = vmul.f32 1.442695, %v647_v37 }
 0x4c5   :  { %4073 = vpow2.f32 %v650_v38 }
 0x4c9   :  { %v4072_v39 = vpop.eup %4071 }
 0x4ca   :  { %v652_v40 = vsel %vm320_vm10, %v4072_v39, 0.0 }
 0x4cb   :  { %v4074_v41 = vpop.eup %4073  ;;  %653 = vadd.xlane.f32.xlu2 %v652_v40 }
 0x4cc   :  { %v655_v42 = vsel %vm320_vm10, %v4074_v41, 0.0 }
 0x4cd   :  { %v806_v43 = vpop.xlane.xlu1 %805  ;;  %656 = vadd.xlane.f32.xlu0 %v655_v42 }
 0x4ce   :  { %v810_v44 = vsub.f32 %v774_v30, %v806_v43 }
 0x4d0   :  { %v812_v45 = vmul.f32 1.442695, %v810_v44 }
 0x4d2   :  { %4075 = vpow2.f32 %v812_v45 }
 0x4d3   :  { %v779_v51 = vpop.permute.xlu0 %778 }
 0x4d8   :  { %v4076_v46 = vpop.eup %4075 }
 0x4d9   :  { %v816_v47 = vsel %vm320_vm10, %v4076_v46, 0.0 }
 0x4da   :  { %817 = vadd.xlane.f32.xlu2 %v816_v47 }
 0x4e1   :  { %914 = vrot.lane.b32.xlu0 %v4447_v63, %s4293_s21 }
 0x4e5   :  { %v4021_v48 = vpop.permute.xlu1 %4020 }
 0x4e6   :  { %v4023_v49 = vunpack.i.h.bf16 %v4021_v48  ;;  %v4022_v50 = vunpack.i.l.bf16 %v4021_v48  ;;  %v3841_v48 = vld [vmem:[%s5341_s4 + $0x48] sm:$0xff] }
 0x4e8   :  { %683 = vmatpush.msra.mxu3 %v4022_v50  ;;  %709 = vmatpush.msrb.mxu0 %v4023_v49  ;;  %v4612_v49 = vpop.f32.mrf.mxu1  ;;  %v3840_v50 = vld [vmem:[%s5341_s4 + $0x40] sm:$0xff] }
 0x4ea   :  { %3826 = vmatpush.xpose.msk.msrb.mxu3 %vm267_vm8, %v779_v51 }
 0x4ed   :  { %v827_v52 = vpop.permute.xlu1 %826 }
 0x4ee   :  { %847 = vmatpush.msra.mxu0 %v827_v52 }
 0x4f0   :  { %v4617_v51 = vpop.f32.mrf.mxu1 }
 0x4f2   :  { %776 = vrot.lane.b32.xlu2 %v4461_v4, %s4292_s28 }
 0x4f5   :  { %v913_v8 = vpop.permute.xlu1 %912 }
 0x4fd   :  { %v991_v34 = vpop.permute.xlu1 %990 }
 0x53e   :  { %v654_v53 = vpop.xlane.xlu2 %653 }
 0x53f   :  { %4077 = vrcp.f32 %v654_v53 }
 0x540   :  { %v657_v54 = vpop.xlane.xlu0 %656 }
 0x541   :  { %4079 = vrcp.f32 %v657_v54 }
 0x545   :  { %v4078_v55 = vpop.eup %4077 }
 0x546   :  { %v660_v57 = vmul.f32 %v4078_v55, %v4072_v39 }
 0x547   :  { %v4080_v58 = vpop.eup %4079 }
 0x548   :  { %v661_v59 = vmul.f32 %v4080_v58, %v4074_v41  ;;  %3818 = vmatmul.msk.f32.vlgmr.msra.gmra.mxu3 %vm320_vm10, %v660_v57 }
 0x549   :  { %901 = vmatpush.msra.mxu3 %v3831_v12 }
 0x54a   :  { %3819 = vmatmul.msk.f32.vlgmr.msrb.gmra.mxu0 %vm320_vm10, %v661_v59 }
 0x54b   :  { %902 = vmatpush.msra.mxu3 %v3830_v13 }
 0x54d   :  { %v818_v60 = vpop.xlane.xlu2 %817 }
 0x54e   :  { %4081 = vrcp.f32 %v818_v60 }
 0x553   :  { %v915_v62 = vpop.permute.xlu0 %914 }
 0x554   :  { %v4082_v2 = vpop.eup %4081  ;;  %3834 = vmatpush.xpose.msk.msrb.mxu0 %vm267_vm8, %v915_v62 }
 0x555   :  { %v824_v6 = vmul.f32 %v4082_v2, %v4076_v46  ;;  %v777_v7 = vpop.permute.xlu2 %776 }
 0x556   :  { %3827 = vmatmul.msk.f32.vlgmr.msrb.gmra.mxu3 %vm267_vm8, %v777_v7 }
 0x557   :  { %3828 = vmatmul.msk.f32.vlgmr.msra.gmra.mxu0 %vm320_vm10, %v824_v6 }
 0x55f   :  { %3835 = vmatmul.msk.f32.vlgmr.msrb.gmra.mxu0 %vm267_vm8, %v913_v8 }
 0x5c7   :  { %v711_v16 = vpop.f32.mrf.mxu0 }
 0x5cb   :  { %v685_v15 = vpop.f32.mrf.mxu3 }
 0x5cc   :  { %3822 = vmatmul.msk.f32.vlgmr.msrb.gmra.mxu1 %vm267_vm8, %v685_v15 }
 0x5d4   :  { %3823 = vmatmul.msk.f32.gmra.mxu1 %vm267_vm8, %v711_v16  ;;  %v849_v17 = vpop.f32.mrf.mxu0 }
 0x5d5   :  { %3832 = vmatmul.msk.f32.vlgmr.msra.gmra.mxu3 %vm267_vm8, %v849_v17 }
 0x5d9   :  { %v801_v18 = vpop.f32.mrf.mxu3 }
 0x5da   :  { %v802_v19 = vadd.f32 %v801_v18, %v4481_v14 }
 0x5dc   :  { %v937_v20 = vpop.f32.mrf.mxu0  ;;  %v807_v22 = vsel %vm320_vm10, %v802_v19, -inf }
 0x5dd   :  { %v938_v23 = vadd.f32 %v937_v20, %v4481_v14  ;;  %808 = vmax.xlane.f32.xlu0 %v807_v22 }
 0x5df   :  { %v968_v24 = vsel %vm320_vm10, %v938_v23, -inf }
 0x5e0   :  { %969 = vmax.xlane.f32.xlu2 %v968_v24 }
 0x5f1   :  { %942 = vrot.lane.b32.xlu0 %v4459_v3, %s4293_s21 }
 0x5f8   :  { %852 = vrot.lane.b32.xlu2 %v4474_v5, %s4292_s28 }
 0x600   :  { %1078 = vrot.lane.b32.xlu2 %v4447_v63, %s4294_s0 }
 0x649   :  { %v4619_v52 = vpop.f32.mrf.mxu1 }
 0x650   :  { %v809_v25 = vpop.xlane.xlu0 %808 }
 0x651   :  { %v811_v26 = vsub.f32 %v802_v19, %v809_v25  ;;  %v4621_v53 = vpop.f32.mrf.mxu1 }
 0x653   :  { %v814_v27 = vmul.f32 1.442695, %v811_v26  ;;  %v970_v29 = vpop.xlane.xlu2 %969 }
 0x654   :  { %v974_v30 = vsub.f32 %v938_v23, %v970_v29 }
 0x655   :  { %4083 = vpow2.f32 %v814_v27 }
 0x656   :  { %v976_v31 = vmul.f32 1.442695, %v974_v30 }
 0x658   :  { %4085 = vpow2.f32 %v976_v31  ;;  %v4645_v22 = vpop.f32.mrf.mxu3 }
 0x65b   :  { %v4084_v32 = vpop.eup %4083  ;;  %v853_v33 = vpop.permute.xlu2 %852 }
 0x65c   :  { %873 = vmatpush.msra.mxu2 %v853_v33  ;;  %v819_v35 = vsel %vm320_vm10, %v4084_v32, 0.0 }
 0x65d   :  { %820 = vadd.xlane.f32.xlu1 %v819_v35 }
 0x65e   :  { %1011 = vmatpush.msrb.mxu2 %v991_v34  ;;  %v4086_v36 = vpop.eup %4085 }
 0x65f   :  { %v980_v37 = vsel %vm320_vm10, %v4086_v36, 0.0 }
 0x660   :  { %981 = vadd.xlane.f32.xlu0 %v980_v37  ;;  %v3851_v37 = vld [vmem:[%s5341_s4 + $0x58] sm:$0xff] }
 0x663   :  { %v943_v38 = vpop.permute.xlu0 %942  ;;  %v1079_v43 = vpop.permute.xlu2 %1078 }
 0x664   :  { %3836 = vmatpush.xpose.msk.msra.mxu1 %vm267_vm8, %v943_v38  ;;  %v3850_v38 = vld [vmem:[%s5341_s4 + $0x50] sm:$0xff] }
 0x668   :  { %1065 = vmatpush.msrb.mxu1 %v3841_v48 }
 0x66a   :  { %1066 = vmatpush.msrb.mxu1 %v3840_v50 }
 0x674   :  { %940 = vrot.lane.b32.xlu0 %v4461_v4, %s4293_s21 }
 0x676   :  { %1076 = vrot.lane.b32.xlu1 %v4449_v0, %s4294_s0 }
 0x6d0   :  { %v821_v39 = vpop.xlane.xlu1 %820 }
 0x6d1   :  { %4087 = vrcp.f32 %v821_v39 }
 0x6d3   :  { %v982_v40 = vpop.xlane.xlu0 %981 }
 0x6d4   :  { %4089 = vrcp.f32 %v982_v40 }
 0x6d7   :  { %v4088_v41 = vpop.eup %4087 }
 0x6d8   :  { %v825_v42 = vmul.f32 %v4088_v41, %v4084_v32 }
 0x6da   :  { %3829 = vmatmul.msk.f32.vlgmr.msra.gmra.mxu2 %vm320_vm10, %v825_v42  ;;  %v4090_v44 = vpop.eup %4089 }
 0x6db   :  { %3844 = vmatpush.xpose.msk.msra.mxu2 %vm267_vm8, %v1079_v43  ;;  %v988_v45 = vmul.f32 %v4090_v44, %v4086_v36 }
 0x6e2   :  { %3838 = vmatmul.msk.f32.vlgmr.msrb.gmra.mxu2 %vm320_vm10, %v988_v45 }
 0x6e6   :  { %v941_v46 = vpop.permute.xlu0 %940 }
 0x6e7   :  { %3837 = vmatmul.msk.f32.vlgmr.msra.gmra.mxu1 %vm267_vm8, %v941_v46 }
 0x6e8   :  { %v1077_v47 = vpop.permute.xlu1 %1076 }
 0x6ea   :  { %3845 = vmatmul.msk.f32.vlgmr.msra.gmra.mxu2 %vm267_vm8, %v1077_v47 }
 0x75d   :  { %v875_v54 = vpop.f32.mrf.mxu2 }
 0x75e   :  { %3833 = vmatmul.msk.f32.gmra.mxu3 %vm267_vm8, %v875_v54 }
 0x764   :  { %v965_v55 = vpop.f32.mrf.mxu1 }
 0x765   :  { %v966_v57 = vadd.f32 %v965_v55, %v4481_v14  ;;  %v1013_v58 = vpop.f32.mrf.mxu2 }
 0x766   :  { %3842 = vmatmul.msk.f32.vlgmr.msrb.gmra.mxu1 %vm267_vm8, %v1013_v58 }
 0x767   :  { %v971_v59 = vsel %vm320_vm10, %v966_v57, -inf }
 0x768   :  { %972 = vmax.xlane.f32.xlu2 %v971_v59 }
 0x76d   :  { %v1101_v60 = vpop.f32.mrf.mxu2 }
 0x76e   :  { %v1102_v62 = vadd.f32 %v1101_v60, %v4481_v14 }
 0x770   :  { %v1132_v2 = vsel %vm320_vm10, %v1102_v62, -inf }
 0x771   :  { %1133 = vmax.xlane.f32.xlu0 %v1132_v2 }
 0x780   :  { %1106 = vrot.lane.b32.xlu2 %v4459_v3, %s4294_s0 }
 0x785   :  { %1104 = vrot.lane.b32.xlu0 %v4461_v4, %s4294_s0 }
 0x788   :  { %1242 = vrot.lane.b32.xlu2 %v4447_v63, %s4295_s2 }
 0x78d   :  { %1154 = vrot.lane.b32.xlu0 %v4457_v1, %s4294_s0 }
 0x795   :  { %1240 = vrot.lane.b32.xlu0 %v4449_v0, %s4295_s2 }
 0x7db   :  { %v973_v6 = vpop.xlane.xlu2 %972 }
 0x7dc   :  { %v975_v7 = vsub.f32 %v966_v57, %v973_v6 }
 0x7de   :  { %v978_v8 = vmul.f32 1.442695, %v975_v7 }
 0x7e0   :  { %4091 = vpow2.f32 %v978_v8 }
 0x7e1   :  { %v4647_v23 = vpop.f32.mrf.mxu3 }
 0x7e3   :  { %v1107_v9 = vpop.permute.xlu2 %1106 }
 0x7e4   :  { %3846 = vmatpush.xpose.msk.msrb.mxu3 %vm267_vm8, %v1107_v9  ;;  %v1134_v10 = vpop.xlane.xlu0 %1133 }
 0x7e5   :  { %v1138_v12 = vsub.f32 %v1102_v62, %v1134_v10 }
 0x7e6   :  { %v4092_v13 = vpop.eup %4091 }
 0x7e7   :  { %v1140_v15 = vmul.f32 1.442695, %v1138_v12  ;;  %v983_v16 = vsel %vm320_vm10, %v4092_v13, 0.0 }
 0x7e8   :  { %984 = vadd.xlane.f32.xlu1 %v983_v16  ;;  %1229 = vmatpush.msra.mxu3 %v3851_v37  ;;  %v3860_v16 = vld [vmem:[%s5341_s4 + $0x60] sm:$0xff] }
 0x7e9   :  { %4093 = vpow2.f32 %v1140_v15  ;;  %v3861_v15 = vld [vmem:[%s5341_s4 + $0x68] sm:$0xff] }
 0x7ea   :  { %1230 = vmatpush.msra.mxu3 %v3850_v38 }
 0x7eb   :  { %v1243_v33 = vpop.permute.xlu2 %1242 }
 0x7ef   :  { %v4094_v17 = vpop.eup %4093 }
 0x7f0   :  { %v1144_v18 = vsel %vm320_vm10, %v4094_v17, 0.0 }
 0x7f1   :  { %1145 = vadd.xlane.f32.xlu1 %v1144_v18 }
 0x7f7   :  { %v1105_v19 = vpop.permute.xlu0 %1104 }
 0x7f8   :  { %3847 = vmatmul.msk.f32.vlgmr.msrb.gmra.mxu3 %vm267_vm8, %v1105_v19 }
 0x7ff   :  { %v1155_v31 = vpop.permute.xlu0 %1154 }
 0x807   :  { %v1241_v36 = vpop.permute.xlu0 %1240 }
 0x80a   :  { %1016 = vrot.lane.b32.xlu1 %v4474_v5, %s4293_s21 }
 0x85b   :  { %v985_v20 = vpop.xlane.xlu1 %984 }
 0x85c   :  { %4095 = vrcp.f32 %v985_v20 }
 0x862   :  { %v4096_v25 = vpop.eup %4095 }
 0x863   :  { %v989_v27 = vmul.f32 %v4096_v25, %v4092_v13 }
 0x864   :  { %v1146_v24 = vpop.xlane.xlu1 %1145 }
 0x865   :  { %4097 = vrcp.f32 %v1146_v24 }
 0x86b   :  { %v4098_v34 = vpop.eup %4097 }
 0x86c   :  { %v1152_v35 = vmul.f32 %v4098_v34, %v4094_v17  ;;  %v4698_v17 = vpop.f32.mrf.mxu1 }
 0x87b   :  { %v1129_v26 = vpop.f32.mrf.mxu3 }
 0x87c   :  { %v1130_v29 = vadd.f32 %v1129_v26, %v4481_v14  ;;  %v1017_v30 = vpop.permute.xlu1 %1016 }
 0x87d   :  { %1037 = vmatpush.msra.mxu0 %v1017_v30 }
 0x87e   :  { %3839 = vmatmul.msk.f32.vlgmr.msra.gmra.mxu0 %vm320_vm10, %v989_v27  ;;  %v1135_v32 = vsel %vm320_vm10, %v1130_v29, -inf }
 0x87f   :  { %1175 = vmatpush.msrb.mxu0 %v1155_v31  ;;  %1136 = vmax.xlane.f32.xlu2 %v1135_v32 }
 0x881   :  { %3854 = vmatpush.xpose.msk.msra.mxu0 %vm267_vm8, %v1243_v33 }
 0x886   :  { %3848 = vmatmul.msk.f32.vlgmr.msrb.gmra.mxu0 %vm320_vm10, %v1152_v35 }
 0x88e   :  { %3855 = vmatmul.msk.f32.vlgmr.msra.gmra.mxu0 %vm267_vm8, %v1241_v36 }
 0x897   :  { %1180 = vrot.lane.b32.xlu2 %v4474_v5, %s4294_s0 }
 0x89f   :  { %1406 = vrot.lane.b32.xlu2 %v4447_v63, %s4281_s23 }
 0x8a7   :  { %1268 = vrot.lane.b32.xlu2 %v4461_v4, %s4295_s2 }
 0x8af   :  { %1432 = vrot.lane.b32.xlu2 %v4461_v4, %s4281_s23 }
 0x8f2   :  { %v1137_v39 = vpop.xlane.xlu2 %1136 }
 0x8f3   :  { %v1139_v40 = vsub.f32 %v1130_v29, %v1137_v39 }
 0x8f5   :  { %v1142_v41 = vmul.f32 1.442695, %v1139_v40 }
 0x8f7   :  { %4099 = vpow2.f32 %v1142_v41 }
 0x8fa   :  { %v1181_v63 = vpop.permute.xlu2 %1180 }
 0x8fb   :  { %v1039_v42 = vpop.f32.mrf.mxu0  ;;  %1201 = vmatpush.msrb.mxu2 %v1181_v63 }
 0x8fc   :  { %3843 = vmatmul.msk.f32.gmra.mxu1 %vm267_vm8, %v1039_v42 }
 0x8fd   :  { %v4100_v4 = vpop.eup %4099 }
 0x8fe   :  { %v1147_v43 = vsel %vm320_vm10, %v4100_v4, 0.0 }
 0x8ff   :  { %1148 = vadd.xlane.f32.xlu1 %v1147_v43 }
 0x902   :  { %v1407_v60 = vpop.permute.xlu2 %1406 }
 0x903   :  { %v1177_v44 = vpop.f32.mrf.mxu0 }
 0x904   :  { %3852 = vmatmul.msk.f32.vlgmr.msra.gmra.mxu3 %vm267_vm8, %v1177_v44 }
 0x90a   :  { %v1269_v12 = vpop.permute.xlu2 %1268 }
 0x90b   :  { %v1265_v45 = vpop.f32.mrf.mxu0 }
 0x90c   :  { %v1266_v46 = vadd.f32 %v1265_v45, %v4481_v14 }
 0x90e   :  { %v1296_v47 = vsel %vm320_vm10, %v1266_v46, -inf }
 0x90f   :  { %1297 = vmax.xlane.f32.xlu0 %v1296_v47 }
 0x918   :  { %1318 = vrot.lane.b32.xlu1 %v4457_v1, %s4295_s2 }
 0x920   :  { %1404 = vrot.lane.b32.xlu1 %v4449_v0, %s4281_s23 }
 0x972   :  { %v1149_v48 = vpop.xlane.xlu1 %1148 }
 0x973   :  { %4101 = vrcp.f32 %v1149_v48 }
 0x979   :  { %v4102_v50 = vpop.eup %4101  ;;  %v4700_v18 = vpop.f32.mrf.mxu1 }
 0x97a   :  { %v1153_v54 = vmul.f32 %v4102_v50, %v4100_v4 }
 0x97c   :  { %3849 = vmatmul.msk.f32.vlgmr.msrb.gmra.mxu2 %vm320_vm10, %v1153_v54 }
 0x982   :  { %v1298_v55 = vpop.xlane.xlu0 %1297 }
 0x983   :  { %v1302_v57 = vsub.f32 %v1266_v46, %v1298_v55 }
 0x985   :  { %v1304_v58 = vmul.f32 1.442695, %v1302_v57 }
 0x987   :  { %4103 = vpow2.f32 %v1304_v58  ;;  %v1232_v30 = vpop.f32.mrf.mxu3 }
 0x98a   :  { %v1319_v59 = vpop.permute.xlu1 %1318 }
 0x98b   :  { %1339 = vmatpush.msra.mxu2 %v1319_v59 }
 0x98d   :  { %3864 = vmatpush.xpose.msk.msrb.mxu2 %vm267_vm8, %v1407_v60  ;;  %v4104_v62 = vpop.eup %4103  ;;  %v3871_v60 = vld [vmem:[%s5341_s4 + $0x78] sm:$0xff] }
 0x98e   :  { %v1308_v2 = vsel %vm320_vm10, %v4104_v62, 0.0 }
 0x98f   :  { %1309 = vadd.xlane.f32.xlu0 %v1308_v2 }
 0x992   :  { %v1405_v9 = vpop.permute.xlu1 %1404 }
 0x9a3   :  { %1270 = vrot.lane.b32.xlu0 %v4459_v3, %s4295_s2 }
 0x9ab   :  { %1434 = vrot.lane.b32.xlu0 %v4459_v3, %s4281_s23  ;;  %v1433_v3 = vpop.permute.xlu2 %1432 }
 0x9ff   :  { %v1203_v0 = vpop.f32.mrf.mxu2 }
 0xa00   :  { %3853 = vmatmul.msk.f32.gmra.mxu3 %vm267_vm8, %v1203_v0 }
 0xa02   :  { %v1310_v6 = vpop.xlane.xlu0 %1309 }
 0xa03   :  { %4105 = vrcp.f32 %v1310_v6 }
 0xa09   :  { %v4106_v7 = vpop.eup %4105 }
 0xa0a   :  { %v1316_v8 = vmul.f32 %v4106_v7, %v4104_v62  ;;  %v3870_v62 = vld [vmem:[%s5341_s4 + $0x70] sm:$0xff] }
 0xa0c   :  { %3858 = vmatmul.msk.f32.vlgmr.msra.gmra.mxu2 %vm320_vm10, %v1316_v8 }
 0xa14   :  { %3865 = vmatmul.msk.f32.vlgmr.msrb.gmra.mxu2 %vm267_vm8, %v1405_v9  ;;  %v579_v9 = vadd.f32 %v4536_v21, %v4612_v49 }
 0xa15   :  { %v1271_v10 = vpop.permute.xlu0 %1270 }
 0xa16   :  { %3856 = vmatpush.xpose.msk.msra.mxu1 %vm267_vm8, %v1271_v10  ;;  %v746_v10 = vadd.f32 %v4619_v52, %v579_v9 }
 0xa19   :  { %3857 = vmatmul.msk.f32.vlgmr.msra.gmra.mxu1 %vm267_vm8, %v1269_v12  ;;  %v910_v12 = vadd.f32 %v4645_v22, %v746_v10  ;;  %v582_v22 = vadd.f32 %v4543_v28, %v4617_v51 }
 0xa1a   :  { %1393 = vmatpush.msrb.mxu1 %v3861_v15 }
 0xa1c   :  { %1394 = vmatpush.msrb.mxu1 %v3860_v16 }
 0xa1d   :  { %v1435_v13 = vpop.permute.xlu0 %1434 }
 0xa1e   :  { %3866 = vmatpush.xpose.msk.msrb.mxu3 %vm267_vm8, %v1435_v13  ;;  %v1074_v13 = vadd.f32 %v4698_v17, %v910_v12  ;;  %v1803_v12 = vld [vmem:[%s5347_s10 + $0x78] sm:$0xff] }
 0xa20   :  { %v1238_v15 = vadd.f32 %v1232_v30, %v1074_v13  ;;  %v4774_v13 = vld [vmem:[%s5346_s9] sm:$0x3] }
 0xa21   :  { %3867 = vmatmul.msk.f32.vlgmr.msrb.gmra.mxu3 %vm267_vm8, %v1433_v3 }
 0xa22   :  { %1557 = vmatpush.msra.mxu3 %v3871_v60 }
 0xa24   :  { %1558 = vmatpush.msra.mxu3 %v3870_v62  ;;  %v4038_v62 = vld [vmem:[%s5344_s7] ss:$0 sm:$0xff] }
 0xa83   :  { %v4711_v37 = vpop.f32.mrf.mxu3 }
 0xa8f   :  { %v1341_v19 = vpop.f32.mrf.mxu2 }
 0xa90   :  { %3862 = vmatmul.msk.f32.vlgmr.msrb.gmra.mxu1 %vm267_vm8, %v1341_v19  ;;  %v4036_v19 = vld [vmem:[%s5342_s5] ss:$0 sm:$0xff] }
 0xa96   :  { %v1293_v20 = vpop.f32.mrf.mxu1 }
 0xa97   :  { %v1294_v24 = vadd.f32 %v1293_v20, %v4481_v14  ;;  %v1429_v25 = vpop.f32.mrf.mxu2 }
 0xa98   :  { %v1430_v26 = vadd.f32 %v1429_v25, %v4481_v14 }
 0xa99   :  { %v1299_v27 = vsel %vm320_vm10, %v1294_v24, -inf }
 0xa9a   :  { %1300 = vmax.xlane.f32.xlu1 %v1299_v27  ;;  %v1460_v29 = vsel %vm320_vm10, %v1430_v26, -inf  ;;  %v747_v27 = vadd.f32 %v4621_v53, %v582_v22 }
 0xa9b   :  { %1461 = vmax.xlane.f32.xlu0 %v1460_v29 }
 0xa9c   :  { %v911_v30 = vadd.f32 %v4647_v23, %v747_v27  ;;  %v1639_v23 = vld [vmem:[#allocation5 + $0x38] sm:$0xff]  ;;  %v1798_v27 = vld [vmem:[%s5347_s10 + $0x50] sm:$0xff] }
 0xa9d   :  { %1687 = vmatpush.msra.mxu1 %v1639_v23 }
 0xaa4   :  { %v1457_v63 = vpop.f32.mrf.mxu3 }
 0xaaf   :  { %1344 = vrot.lane.b32.xlu0 %v4474_v5, %s4295_s2 }
 0xab7   :  { %1508 = vrot.lane.b32.xlu0 %v4474_v5, %s4281_s23  ;;  %v1458_v5 = vadd.f32 %v1457_v63, %v4481_v14  ;;  %v1635_v63 = vld [vmem:[#allocation5 + $0x18] sm:$0xff] }
 0xab9   :  { %v1463_v4 = vsel %vm320_vm10, %v1458_v5, -inf }
 0xb0d   :  { %v1301_v31 = vpop.xlane.xlu1 %1300  ;;  %v1396_v3 = vpop.f32.mrf.mxu1 }
 0xb0e   :  { %v1303_v32 = vsub.f32 %v1294_v24, %v1301_v31  ;;  %v1462_v33 = vpop.xlane.xlu0 %1461  ;;  %v1402_v16 = vadd.f32 %v1396_v3, %v1238_v15  ;;  %v1802_v15 = vld [vmem:[%s5347_s10 + $0x70] sm:$0xff] }
 0xb0f   :  { %v1466_v34 = vsub.f32 %v1430_v26, %v1462_v33 }
 0xb10   :  { %v1306_v35 = vmul.f32 1.442695, %v1303_v32  ;;  %v1075_v32 = vadd.f32 %v4700_v18, %v911_v30  ;;  %v1636_v18 = vld [vmem:[#allocation5 + $0x20] sm:$0xff] }
 0xb11   :  { %v1468_v36 = vmul.f32 1.442695, %v1466_v34 }
 0xb12   :  { %4107 = vpow2.f32 %v1306_v35  ;;  %v1239_v34 = vadd.f32 %v4711_v37, %v1075_v32  ;;  %v1632_v37 = vld [vmem:[#allocation5] sm:$0xff] }
 0xb13   :  { %4109 = vpow2.f32 %v1468_v36 }
 0xb18   :  { %v4108_v38 = vpop.eup %4107 }
 0xb19   :  { %v4110_v39 = vpop.eup %4109  ;;  %v1311_v40 = vsel %vm320_vm10, %v4108_v38, 0.0 }
 0xb1a   :  { %1312 = vadd.xlane.f32.xlu2 %v1311_v40  ;;  %v1472_v41 = vsel %vm320_vm10, %v4110_v39, 0.0  ;;  %v1637_v40 = vld [vmem:[#allocation5 + $0x28] sm:$0xff] }
 0xb1b   :  { %1473 = vadd.xlane.f32.xlu1 %v1472_v41  ;;  %1688 = vmatpush.msra.mxu1 %v1637_v40  ;;  %v1634_v41 = vld [vmem:[#allocation5 + $0x10] sm:$0xff] }
 0xb1d   :  { %1689 = vmatpush.msra.mxu1 %v1635_v63 }
 0xb21   :  { %v1345_v42 = vpop.permute.xlu0 %1344 }
 0xb22   :  { %1365 = vmatpush.msrb.mxu0 %v1345_v42 }
 0xb23   :  { %1464 = vmax.xlane.f32.xlu1 %v1463_v4 }
 0xb29   :  { %v1509_v43 = vpop.permute.xlu0 %1508 }
 0xb2a   :  { %1529 = vmatpush.msra.mxu2 %v1509_v43 }
 0xb2c   :  { %1808 = vmatpush.msrb.mxu2 %v1803_v12 }
 0xb2e   :  { %1809 = vmatpush.msrb.mxu2 %v1802_v15  ;;  %v1642_v15 = vperm.slane %v4774_v13, 0 }
 0xb32   :  { %1482 = vrot.lane.b32.xlu2 %v4457_v1, %s4281_s23 }
 0xb8d   :  { %v1313_v44 = vpop.xlane.xlu2 %1312 }
 0xb8e   :  { %4111 = vrcp.f32 %v1313_v44  ;;  %v1474_v45 = vpop.xlane.xlu1 %1473 }
 0xb8f   :  { %4113 = vrcp.f32 %v1474_v45 }
 0xb94   :  { %v4112_v46 = vpop.eup %4111 }
 0xb95   :  { %v1317_v47 = vmul.f32 %v4112_v46, %v4108_v38  ;;  %v1483_v48 = vpop.permute.xlu2 %1482  ;;  %v4114_v57 = vpop.eup %4113 }
 0xb96   :  { %v1465_v50 = vpop.xlane.xlu1 %1464  ;;  %1503 = vmatpush.msra.mxu0 %v1483_v48  ;;  %v1480_v58 = vmul.f32 %v4114_v57, %v4110_v39  ;;  %v1638_v39 = vld [vmem:[#allocation5 + $0x30] sm:$0xff] }
 0xb97   :  { %v1467_v54 = vsub.f32 %v1458_v5, %v1465_v50  ;;  %3859 = vmatmul.msk.f32.vlgmr.msrb.gmra.mxu0 %vm320_vm10, %v1317_v47  ;;  %v1633_v5 = vld [vmem:[#allocation5 + $0x8] sm:$0xff] }
 0xb98   :  { %1664 = vmatpush.msrb.mxu0 %v1638_v39  ;;  %1690 = vmatpush.msra.mxu1 %v1633_v5  ;;  %v1791_v5 = vld [vmem:[%s5347_s10 + $0x18] sm:$0xff] }
 0xb99   :  { %v1470_v55 = vmul.f32 1.442695, %v1467_v54 }
 0xb9a   :  { %1665 = vmatpush.msrb.mxu0 %v1636_v18  ;;  %v1793_v18 = vld [vmem:[%s5347_s10 + $0x28] sm:$0xff] }
 0xb9b   :  { %4115 = vpow2.f32 %v1470_v55 }
 0xb9c   :  { %1666 = vmatpush.msrb.mxu0 %v1634_v41  ;;  %v1792_v41 = vld [vmem:[%s5347_s10 + $0x20] sm:$0xff] }
 0xb9e   :  { %1667 = vmatpush.msrb.mxu0 %v1632_v37 }
 0xb9f   :  { %3868 = vmatmul.msk.f32.vlgmr.msra.gmra.mxu0 %vm320_vm10, %v1480_v58 }
 0xba1   :  { %v4116_v59 = vpop.eup %4115 }
 0xba2   :  { %v1475_v1 = vsel %vm320_vm10, %v4116_v59, 0.0 }
 0xba3   :  { %1476 = vadd.xlane.f32.xlu1 %v1475_v1 }
 0xc14   :  { %v1367_v2 = vpop.f32.mrf.mxu0 }
 0xc15   :  { %3863 = vmatmul.msk.f32.gmra.mxu1 %vm267_vm8, %v1367_v2 }
 0xc16   :  { %v1477_v0 = vpop.xlane.xlu1 %1476 }
 0xc17   :  { %4117 = vrcp.f32 %v1477_v0 }
 0xc1c   :  { %v1505_v6 = vpop.f32.mrf.mxu0 }
 0xc1d   :  { %v4118_v7 = vpop.eup %4117  ;;  %3872 = vmatmul.msk.f32.vlgmr.msra.gmra.mxu3 %vm267_vm8, %v1505_v6 }
 0xc1e   :  { %v1481_v8 = vmul.f32 %v4118_v7, %v4116_v59  ;;  %v4037_v59 = vld [vmem:[%s5343_s6] ss:$0 sm:$0xff] }
 0xc20   :  { %3869 = vmatmul.msk.f32.vlgmr.msra.gmra.mxu2 %vm320_vm10, %v1481_v8 }
 0xca0   :  { %v1560_v20 = vpop.f32.mrf.mxu3 }
 0xca1   :  { %v1566_v24 = vadd.f32 %v1560_v20, %v1402_v16  ;;  %v1801_v20 = vld [vmem:[%s5347_s10 + $0x68] sm:$0xff] }
 0xca2   :  { %1810 = vmatpush.msrb.mxu2 %v1801_v20 }
 0xca3   :  { %v1572_v25 = vadd.f32 %v4036_v19, %v1566_v24  ;;  %v1531_v26 = vpop.f32.mrf.mxu2 }
 0xca4   :  { %3873 = vmatmul.msk.f32.gmra.mxu3 %vm267_vm8, %v1531_v26 }
 0xca5   :  { %v1574_v21 = vadd.f32 %v1572_v25, %v4430_v56  ;;  %v1399_v56 = vpop.f32.mrf.mxu1  ;;  %v1800_v25 = vld [vmem:[%s5347_s10 + $0x60] sm:$0xff] }
 0xca6   :  { %v1403_v35 = vadd.f32 %v1399_v56, %v1239_v34  ;;  %1811 = vmatpush.msrb.mxu2 %v1800_v25  ;;  %v1796_v56 = vld [vmem:[%s5347_s10 + $0x40] sm:$0xff] }
 0xca7   :  { %v1578_v49 = vsel %vm116_vm0, %v1574_v21, 0.0 }
 0xca8   :  { %1579 = vadd.xlane.f32.xlu1 %v1578_v49 }
 0xd1b   :  { %v1580_v52 = vpop.xlane.xlu1 %1579 }
 0xd1c   :  { %v1584_v17 = vmul.f32 %v1580_v52, %v4412_v11  ;;  %v1799_v52 = vld [vmem:[%s5347_s10 + $0x58] sm:$0xff] }
 0xd1d   :  { %1812 = vmatpush.msrb.mxu2 %v1799_v52 }
 0xd1e   :  { %v1586_v29 = vsub.f32 %v1574_v21, %v1584_v17 }
 0xd1f   :  { %1813 = vmatpush.msrb.mxu2 %v1798_v27 }
 0xd20   :  { %v1588_v31 = vmul.f32 %v1586_v29, %v1586_v29 }
 0xd22   :  { %v1590_v33 = vsel %vm116_vm0, %v1588_v31, 0.0  ;;  %v1797_v31 = vld [vmem:[%s5347_s10 + $0x48] sm:$0xff] }
 0xd23   :  { %1591 = vadd.xlane.f32.xlu2 %v1590_v33  ;;  %1814 = vmatpush.msrb.mxu2 %v1797_v31 }
 0xd25   :  { %1815 = vmatpush.msrb.mxu2 %v1796_v56 }
 0xd27   :  { %v1563_v36 = vpop.f32.mrf.mxu3 }
 0xd28   :  { %v1567_v38 = vadd.f32 %v1563_v36, %v1403_v35 }
 0xd2a   :  { %v1573_v28 = vadd.f32 %v4036_v19, %v1567_v38  ;;  %v1643_v19 = vperm.slane %v4774_v13, 1  ;;  %v1795_v38 = vld [vmem:[%s5347_s10 + $0x38] sm:$0xff] }
 0xd2b   :  { %1816 = vmatpush.msrb.mxu2 %v1795_v38 }
 0xd2c   :  { %v1575_v51 = vadd.f32 %v1573_v28, %v4439_v61 }
 0xd2e   :  { %v1581_v53 = vsel %vm116_vm0, %v1575_v51, 0.0 }
 0xd2f   :  { %1582 = vadd.xlane.f32.xlu0 %v1581_v53  ;;  %v1794_v53 = vld [vmem:[%s5347_s10 + $0x30] sm:$0xff] }
 0xd30   :  { %1817 = vmatpush.msrb.mxu2 %v1794_v53 }
 0xd32   :  { %1818 = vmatpush.msrb.mxu2 %v1793_v18 }
 0xd34   :  { %1819 = vmatpush.msrb.mxu2 %v1792_v41 }
 0xd36   :  { %1820 = vmatpush.msrb.mxu2 %v1791_v5 }
 0xd96   :  { %v1592_v61 = vpop.xlane.xlu2 %1591 }
 0xd97   :  { %v1596_v42 = vmul.f32 %v1592_v61, %v4412_v11 }
 0xd99   :  { %v1598_v4 = vadd.f32 1e-05, %v1596_v42  ;;  %v1790_v42 = vld [vmem:[%s5347_s10 + $0x10] sm:$0xff] }
 0xd9a   :  { %1821 = vmatpush.msrb.mxu2 %v1790_v42 }
 0xd9b   :  { %4119 = vrsqrt.f32 %v1598_v4  ;;  %vm1606_vm12 = vweird.f32 %v1598_v4 }
 0xda1   :  { %v4120_v43 = vpop.eup %4119 }
 0xda2   :  { %v1601_v44 = vmul.f32 %v4120_v43, %v1598_v4  ;;  %v1583_v45 = vpop.xlane.xlu0 %1582  ;;  %vm1607_vm11 = vweird.f32 %v4120_v43 }
 0xda3   :  { %v1585_v46 = vmul.f32 %v1583_v45, %v4412_v11  ;;  %vm1608_vm13 = vmor %vm1606_vm12, %vm1607_vm11  ;;  %v1788_v45 = vld [vmem:[%s5347_s10] sm:$0xff] }
 0xda4   :  { %v1602_v47 = vmul.f32 %v4120_v43, %v1601_v44  ;;  %v1789_v44 = vld [vmem:[%s5347_s10 + $0x8] sm:$0xff] }
 0xda5   :  { %v1587_v48 = vsub.f32 %v1575_v51, %v1585_v46  ;;  %1822 = vmatpush.msrb.mxu2 %v1789_v44 }
 0xda6   :  { %v1603_v50 = vmul.f32 0.5, %v1602_v47 }
 0xda7   :  { %v1589_v54 = vmul.f32 %v1587_v48, %v1587_v48  ;;  %1823 = vmatpush.msrb.mxu2 %v1788_v45 }
 0xda8   :  { %v1604_v55 = vsub.f32 1.5, %v1603_v50 }
 0xda9   :  { %v1593_v57 = vsel %vm116_vm0, %v1589_v54, 0.0 }
 0xdaa   :  { %v1605_v58 = vmul.f32 %v4120_v43, %v1604_v55  ;;  %1594 = vadd.xlane.f32.xlu1 %v1593_v57 }
 0xdac   :  { %v1609_v1 = vsel %vm1608_vm13, %v4120_v43, %v1605_v58 }
 0xdad   :  { %v1620_v60 = vmul.f32 %v1609_v1, %v1586_v29 }
 0xdaf   :  { %v1625_v2 = vmul.f32 %v4037_v59, %v1620_v60 }
 0xdb1   :  { %v4761_v0 = vadd.f32 %v4038_v62, %v1625_v2 }
 0xdb3   :  { %3874 = vmatmul.msk.f32.vlgmr.msrb.gmra.mxu0 %vm116_vm0, %v4761_v0  ;;  %3876 = vmatmul.msk.f32.vlgmr.msra.gmra.mxu1 %vm116_vm0, %v4761_v0 }
 0xe1d   :  { %v1595_v6 = vpop.xlane.xlu1 %1594 }
 0xe1e   :  { %v1597_v7 = vmul.f32 %v1595_v6, %v4412_v11 }
 0xe20   :  { %v1599_v8 = vadd.f32 1e-05, %v1597_v7 }
 0xe22   :  { %4121 = vrsqrt.f32 %v1599_v8  ;;  %vm1616_vm15 = vweird.f32 %v1599_v8 }
 0xe28   :  { %v4122_v9 = vpop.eup %4121 }
 0xe29   :  { %v1611_v10 = vmul.f32 %v4122_v9, %v1599_v8  ;;  %vm1617_vm14 = vweird.f32 %v4122_v9 }
 0xe2a   :  { %vm1618_vm1 = vmor %vm1616_vm15, %vm1617_vm14 }
 0xe2b   :  { %v1612_v3 = vmul.f32 %v4122_v9, %v1611_v10 }
 0xe2d   :  { %v1613_v16 = vmul.f32 0.5, %v1612_v3 }
 0xe2f   :  { %v1614_v24 = vsub.f32 1.5, %v1613_v16 }
 0xe30   :  { %v1692_v26 = vpop.f32.mrf.mxu1  ;;  %v1669_v20 = vpop.f32.mrf.mxu0 }
 0xe31   :  { %v1615_v21 = vmul.f32 %v4122_v9, %v1614_v24  ;;  %v4788_v49 = vadd.f32 %v1692_v26, %v1643_v19  ;;  %v1670_v26 = vadd.f32 %v1669_v20, %v1642_v15 }
 0xe33   :  { %v1619_v22 = vsel %vm1618_vm1, %v4122_v9, %v1615_v21  ;;  %v1700_v17 = vmul.f32 0.70710677, %v4788_v49  ;;  %v1698_v24 = vmul.f32 0.5, %v4788_v49 }
 0xe34   :  { %v1621_v29 = vmul.f32 %v1619_v22, %v1587_v48 }
 0xe35   :  { %v1702_v30 = vmul.f32 %v1700_v17, %v1700_v17 }
 0xe36   :  { %v1626_v32 = vmul.f32 %v4037_v59, %v1621_v29 }
 0xe37   :  { %v1703_v33 = vmin.f32 %v1702_v30, 16.0 }
 0xe38   :  { %v4803_v34 = vadd.f32 %v4038_v62, %v1626_v32 }
 0xe39   :  { %v1704_v35 = vmul.f32 2.1237322e-06, %v1703_v33  ;;  %v1715_v36 = vmul.f32 3.8918573e-05, %v1703_v33 }
 0xe3a   :  { %3875 = vmatmul.msk.f32.gmra.mxu0 %vm116_vm0, %v4803_v34  ;;  %3877 = vmatmul.msk.f32.gmra.mxu1 %vm116_vm0, %v4803_v34 }
 0xe3b   :  { %v1705_v28 = vadd.f32 0.00028619796, %v1704_v35  ;;  %v1716_v51 = vadd.f32 0.001143296, %v1715_v36 }
 0xe3d   :  { %v1706_v39 = vmul.f32 %v1705_v28, %v1703_v33  ;;  %v1717_v23 = vmul.f32 %v1716_v51, %v1703_v33 }
 0xe3f   :  { %v1718_v40 = vadd.f32 0.014752088, %v1717_v23  ;;  %v1707_v63 = vadd.f32 0.0036580483, %v1706_v39 }
 0xe41   :  { %v1719_v37 = vmul.f32 %v1718_v40, %v1703_v33  ;;  %v1708_v4 = vmul.f32 %v1707_v63, %v1703_v33 }
 0xe43   :  { %v1720_v61 = vadd.f32 0.112945676, %v1719_v37  ;;  %v1709_v47 = vadd.f32 0.05243302, %v1708_v4 }
 0xe45   :  { %v1721_v43 = vmul.f32 %v1720_v61, %v1703_v33  ;;  %v1710_v54 = vmul.f32 %v1709_v47, %v1703_v33 }
 0xe47   :  { %v1722_v46 = vadd.f32 0.4994258, %v1721_v43  ;;  %v1711_v55 = vadd.f32 0.18741608, %v1710_v54 }
 0xe49   :  { %v1723_v48 = vmul.f32 %v1722_v46, %v1703_v33  ;;  %v1712_v58 = vmul.f32 %v1711_v55, %v1703_v33 }
 0xe4b   :  { %v1724_v50 = vadd.f32 1.0, %v1723_v48  ;;  %v1713_v62 = vadd.f32 1.1283791, %v1712_v58  ;;  %v4039_v58 = vld [vmem:[%s5348_s11] ss:$0 sm:$0xff] }
 0xe4d   :  { %4123 = vrcp.f32 %v1724_v50  ;;  %v1736_v60 = vand.u32 2147483648, %v1724_v50  ;;  %v1734_v6 = vand.u32 2147483647, %v1724_v50  ;;  %vm1730_vm3 = vweird.f32 %v1724_v50 }
 0xe4e   :  { %v1714_v9 = vmul.f32 %v1713_v62, %v1700_v17 }
 0xe4f   :  { %v1737_v8 = vor.u32 1.1754944e-38, %v1736_v60  ;;  %vm1735_vm5 = vcmp.eq.f32.partialorder %v1734_v6, 8.507059e+37 }
 0xe53   :  { %v4124_v57 = vpop.eup %4123 }
 0xe54   :  { %v1726_v59 = vmul.f32 %v4124_v57, %v1724_v50  ;;  %vm1731_vm2 = vweird.f32 %v4124_v57 }
 0xe55   :  { %vm1732_vm4 = vmor %vm1730_vm3, %vm1731_vm2 }
 0xe56   :  { %v1727_v1 = vsub.f32 1.0, %v1726_v59 }
 0xe58   :  { %v1728_v2 = vmul.f32 %v4124_v57, %v1727_v1 }
 0xe5a   :  { %v1729_v7 = vadd.f32 %v4124_v57, %v1728_v2 }
 0xe5c   :  { %v1733_v10 = vsel %vm1732_vm4, %v4124_v57, %v1729_v7 }
 0xe5d   :  { %v1738_v12 = vsel %vm1735_vm5, %v1737_v8, %v1733_v10 }
 0xe5e   :  { %v1739_v3 = vmul.f32 %v1738_v12, %v1714_v9 }
 0xe60   :  { %v3878_v16 = vclamps-f32 %v1739_v3, 1.0 }
 0xe62   :  { %v1782_v25 = vadd.f32 1.0, %v3878_v16 }
 0xe64   :  { %v1784_v21 = vmul.f32 %v1782_v25, %v1698_v24 }
 0xe66   :  { %v1786_v52 = vmul.f32 %v1784_v21, %v1670_v26  ;;  %v1902_v21 = vld [vmem:[#allocation3 + $0xb0] sm:$0xff] }
 0xe67   :  { %1945 = vmatpush.msra.mxu0 %v1902_v21 }
 0xe68   :  { %1824 = vmatmul.f32.vlgmr.msrb.gmra.mxu2 %v1786_v52  ;;  %v1903_v52 = vld [vmem:[#allocation3 + $0xb8] sm:$0xff] }
 0xe69   :  { %1968 = vmatpush.msrb.mxu1 %v1903_v52 }
 0xeb7   :  { %v1695_v22 = vpop.f32.mrf.mxu1  ;;  %v1672_v57 = vpop.f32.mrf.mxu0 }
 0xeb8   :  { %v1696_v27 = vadd.f32 %v1695_v22, %v1643_v19  ;;  %v1673_v60 = vadd.f32 %v1672_v57, %v1642_v15  ;;  %v1898_v22 = vld [vmem:[#allocation3 + $0x90] sm:$0xff] }
 0xeba   :  { %v1701_v17 = vmul.f32 0.70710677, %v1696_v27  ;;  %v1699_v59 = vmul.f32 0.5, %v1696_v27  ;;  %v1899_v27 = vld [vmem:[#allocation3 + $0x98] sm:$0xff] }
 0xebb   :  { %1946 = vmatpush.msra.mxu0 %v1899_v27 }
 0xebc   :  { %v1742_v29 = vmul.f32 %v1701_v17, %v1701_v17 }
 0xebe   :  { %v1743_v30 = vmin.f32 %v1742_v29, 16.0  ;;  %v1895_v29 = vld [vmem:[#allocation3 + $0x78] sm:$0xff] }
 0xec0   :  { %v1744_v31 = vmul.f32 2.1237322e-06, %v1743_v30  ;;  %v1755_v32 = vmul.f32 3.8918573e-05, %v1743_v30 }
 0xec2   :  { %v1745_v33 = vadd.f32 0.00028619796, %v1744_v31  ;;  %v1756_v56 = vadd.f32 0.001143296, %v1755_v32  ;;  %v1897_v31 = vld [vmem:[#allocation3 + $0x88] sm:$0xff]  ;;  %v1892_v32 = vld [vmem:[#allocation3 + $0x60] sm:$0xff] }
 0xec4   :  { %v1746_v35 = vmul.f32 %v1745_v33, %v1743_v30  ;;  %v1757_v36 = vmul.f32 %v1756_v56, %v1743_v30  ;;  %v1894_v33 = vld [vmem:[#allocation3 + $0x70] sm:$0xff] }
 0xec6   :  { %v1758_v38 = vadd.f32 0.014752088, %v1757_v36  ;;  %v1747_v49 = vadd.f32 0.0036580483, %v1746_v35 }
 0xec8   :  { %v1759_v28 = vmul.f32 %v1758_v38, %v1743_v30  ;;  %v1748_v53 = vmul.f32 %v1747_v49, %v1743_v30 }
 0xeca   :  { %v1760_v51 = vadd.f32 0.112945676, %v1759_v28  ;;  %v1749_v18 = vadd.f32 0.05243302, %v1748_v53 }
 0xecc   :  { %v1761_v39 = vmul.f32 %v1760_v51, %v1743_v30  ;;  %v1750_v19 = vmul.f32 %v1749_v18, %v1743_v30 }
 0xece   :  { %v1762_v23 = vadd.f32 0.4994258, %v1761_v39  ;;  %v1751_v41 = vadd.f32 0.18741608, %v1750_v19 }
 0xed0   :  { %v1763_v40 = vmul.f32 %v1762_v23, %v1743_v30  ;;  %v1752_v37 = vmul.f32 %v1751_v41, %v1743_v30  ;;  %v1896_v30 = vld [vmem:[#allocation3 + $0x80] sm:$0xff] }
 0xed1   :  { %1947 = vmatpush.msra.mxu0 %v1896_v30  ;;  %v4040_v41 = vld [vmem:[%s5363_s17 + $0x1] ss:$0 sm:$0xff] }
 0xed2   :  { %v1764_v13 = vadd.f32 1.0, %v1763_v40  ;;  %v1753_v4 = vadd.f32 1.1283791, %v1752_v37 }
 0xed4   :  { %4125 = vrcp.f32 %v1764_v13  ;;  %v1776_v42 = vand.u32 2147483648, %v1764_v13  ;;  %v1774_v44 = vand.u32 2147483647, %v1764_v13  ;;  %vm1770_vm7 = vweird.f32 %v1764_v13 }
 0xed5   :  { %v1754_v47 = vmul.f32 %v1753_v4, %v1701_v17  ;;  %v1900_v17 = vld [vmem:[#allocation3 + $0xa0] sm:$0xff] }
 0xed6   :  { %v1777_v46 = vor.u32 1.1754944e-38, %v1776_v42  ;;  %vm1775_vm11 = vcmp.eq.f32.partialorder %v1774_v44, 8.507059e+37  ;;  %1969 = vmatpush.msrb.mxu1 %v1900_v17 }
 0xed8   :  { %1970 = vmatpush.msrb.mxu1 %v1897_v31 }
 0xeda   :  { %v4126_v63 = vpop.eup %4125  ;;  %1971 = vmatpush.msrb.mxu1 %v1894_v33 }
 0xedb   :  { %v1766_v5 = vmul.f32 %v4126_v63, %v1764_v13  ;;  %vm1771_vm6 = vweird.f32 %v4126_v63 }
 0xedc   :  { %vm1772_vm9 = vmor %vm1770_vm7, %vm1771_vm6 }
 0xedd   :  { %v1767_v61 = vsub.f32 1.0, %v1766_v5  ;;  %v4041_v5 = vld [vmem:[%s5364_s26 + $0x1] ss:$0 sm:$0xff] }
 0xedf   :  { %v1768_v43 = vmul.f32 %v4126_v63, %v1767_v61 }
 0xee1   :  { %v1769_v45 = vadd.f32 %v4126_v63, %v1768_v43 }
 0xee3   :  { %v1773_v48 = vsel %vm1772_vm9, %v4126_v63, %v1769_v45 }
 0xee4   :  { %v1778_v50 = vsel %vm1775_vm11, %v1777_v46, %v1773_v48 }
 0xee5   :  { %v1779_v54 = vmul.f32 %v1778_v50, %v1754_v47 }
 0xee7   :  { %v3879_v55 = vclamps-f32 %v1779_v54, 1.0 }
 0xee9   :  { %v1783_v1 = vadd.f32 1.0, %v3879_v55 }
 0xeeb   :  { %v1825_v62 = vpop.f32.mrf.mxu2  ;;  %v1785_v2 = vmul.f32 %v1783_v1, %v1699_v59 }
 0xeec   :  { %v1826_v6 = vadd.f32 %v4039_v58, %v1825_v62 }
 0xeed   :  { %v1787_v7 = vmul.f32 %v1785_v2, %v1673_v60 }
 0xeee   :  { %v1831_v8 = vadd.f32 %v1826_v6, %v4761_v0  ;;  %v1901_v0 = vld [vmem:[#allocation3 + $0xa8] sm:$0xff] }
 0xeef   :  { %1827 = vmatmul.f32.gmra.mxu2 %v1787_v7  ;;  %1922 = vmatpush.msrb.mxu3 %v1901_v0 }
 0xef0   :  { %v1837_v9 = vsel %vm116_vm0, %v1831_v8, 0.0 }
 0xef1   :  { %1838 = vadd.xlane.f32.xlu1 %v1837_v9  ;;  %1923 = vmatpush.msrb.mxu3 %v1898_v22 }
 0xef3   :  { %1924 = vmatpush.msrb.mxu3 %v1895_v29 }
 0xef5   :  { %1925 = vmatpush.msrb.mxu3 %v1892_v32  ;;  %v3895_v32 = vld [vmem:[%s5341_s4 + $0x88] sm:$0xff] }
 0xf64   :  { %v1839_v10 = vpop.xlane.xlu1 %1838 }
 0xf65   :  { %v1843_v12 = vmul.f32 %v1839_v10, %v4412_v11 }
 0xf67   :  { %v1845_v3 = vsub.f32 %v1831_v8, %v1843_v12 }
 0xf69   :  { %v1847_v16 = vmul.f32 %v1845_v3, %v1845_v3 }
 0xf6b   :  { %v1849_v20 = vsel %vm116_vm0, %v1847_v16, 0.0 }
 0xf6c   :  { %1850 = vadd.xlane.f32.xlu1 %v1849_v20 }
 0xf72   :  { %v1828_v24 = vpop.f32.mrf.mxu2 }
 0xf73   :  { %v1829_v15 = vadd.f32 %v4039_v58, %v1828_v24 }
 0xf75   :  { %v1832_v25 = vadd.f32 %v1829_v15, %v4803_v34  ;;  %v1893_v34 = vld [vmem:[#allocation3 + $0x68] sm:$0xff] }
 0xf76   :  { %1948 = vmatpush.msra.mxu0 %v1893_v34 }
 0xf77   :  { %v1840_v26 = vsel %vm116_vm0, %v1832_v25, 0.0 }
 0xf78   :  { %1841 = vadd.xlane.f32.xlu1 %v1840_v26 }
 0xfdf   :  { %v1851_v56 = vpop.xlane.xlu1 %1850 }
 0xfe0   :  { %v1855_v35 = vmul.f32 %v1851_v56, %v4412_v11 }
 0xfe2   :  { %v1857_v36 = vadd.f32 1e-05, %v1855_v35 }
 0xfe4   :  { %4127 = vrsqrt.f32 %v1857_v36  ;;  %vm1865_vm13 = vweird.f32 %v1857_v36 }
 0xfea   :  { %v4128_v38 = vpop.eup %4127 }
 0xfeb   :  { %v1860_v49 = vmul.f32 %v4128_v38, %v1857_v36  ;;  %v1842_v28 = vpop.xlane.xlu1 %1841  ;;  %vm1866_vm12 = vweird.f32 %v4128_v38 }
 0xfec   :  { %v1844_v51 = vmul.f32 %v1842_v28, %v4412_v11  ;;  %vm1867_vm14 = vmor %vm1865_vm13, %vm1866_vm12 }
 0xfed   :  { %v1861_v53 = vmul.f32 %v4128_v38, %v1860_v49 }
 0xfee   :  { %v1846_v39 = vsub.f32 %v1832_v25, %v1844_v51 }
 0xfef   :  { %v1862_v23 = vmul.f32 0.5, %v1861_v53 }
 0xff0   :  { %v1848_v18 = vmul.f32 %v1846_v39, %v1846_v39 }
 0xff1   :  { %v1863_v40 = vsub.f32 1.5, %v1862_v23 }
 0xff2   :  { %v1852_v13 = vsel %vm116_vm0, %v1848_v18, 0.0 }
 0xff3   :  { %v1864_v19 = vmul.f32 %v4128_v38, %v1863_v40  ;;  %1853 = vadd.xlane.f32.xlu1 %v1852_v13 }
 0xff5   :  { %v1868_v63 = vsel %vm1867_vm14, %v4128_v38, %v1864_v19  ;;  %v3894_v38 = vld [vmem:[%s5341_s4 + $0x80] sm:$0xff] }
 0xff6   :  { %v1879_v37 = vmul.f32 %v1868_v63, %v1845_v3 }
 0xff8   :  { %v1884_v61 = vmul.f32 %v4040_v41, %v1879_v37 }
 0xffa   :  { %v4855_v42 = vadd.f32 %v4041_v5, %v1884_v61 }
 0xffc   :  { %3882 = vmatmul.msk.f32.vlgmr.msrb.gmra.mxu3 %vm116_vm0, %v4855_v42  ;;  %3884 = vmatmul.msk.f32.vlgmr.msra.gmra.mxu0 %vm116_vm0, %v4855_v42 }
 0xffd   :  { %3886 = vmatmul.msk.f32.vlgmr.msrb.gmra.mxu1 %vm116_vm0, %v4855_v42 }
0x1066   :  { %v1854_v4 = vpop.xlane.xlu1 %1853 }
0x1067   :  { %v1856_v43 = vmul.f32 %v1854_v4, %v4412_v11 }
0x1069   :  { %v1858_v44 = vadd.f32 1e-05, %v1856_v43 }
0x106b   :  { %4129 = vrsqrt.f32 %v1858_v44  ;;  %vm1875_vm1 = vweird.f32 %v1858_v44 }
0x1071   :  { %v4130_v45 = vpop.eup %4129 }
0x1072   :  { %v1870_v46 = vmul.f32 %v4130_v45, %v1858_v44  ;;  %vm1876_vm15 = vweird.f32 %v4130_v45 }
0x1073   :  { %vm1877_vm2 = vmor %vm1875_vm1, %vm1876_vm15 }
0x1074   :  { %v1871_v47 = vmul.f32 %v4130_v45, %v1870_v46 }
0x1076   :  { %v1872_v48 = vmul.f32 0.5, %v1871_v47 }
0x1078   :  { %v1873_v50 = vsub.f32 1.5, %v1872_v48 }
0x1079   :  { %v4864_v54 = vpop.f32.mrf.mxu0 }
0x107a   :  { %v1874_v55 = vmul.f32 %v4130_v45, %v1873_v50  ;;  %v4866_v57 = vpop.f32.mrf.mxu1  ;;  %3888 = vmatpush.xpose.msk.msra.mxu3 %vm267_vm8, %v4864_v54  ;;  %2106 = vrot.lane.b32.xlu1 %v4864_v54, %s4289_s8 }
0x107b   :  { %2073 = vmatpush.msra.mxu1 %v4866_v57 }
0x107c   :  { %v1878_v58 = vsel %vm1877_vm2, %v4130_v45, %v1874_v55  ;;  %vm3565_vm2 = vcmask 1041409  }
0x107d   :  { %v1880_v59 = vmul.f32 %v1878_v58, %v1846_v39 }
0x107f   :  { %v1885_v1 = vmul.f32 %v4040_v41, %v1880_v59  ;;  %v1927_v62 = vpop.f32.mrf.mxu3 }
0x1080   :  { %v4881_v2 = vmul.f32 0.25, %v1927_v62 }
0x1081   :  { %v4873_v60 = vadd.f32 %v4041_v5, %v1885_v1 }
0x1083   :  { %3883 = vmatmul.msk.f32.gmra.mxu3 %vm116_vm0, %v4873_v60  ;;  %3885 = vmatmul.msk.f32.gmra.mxu0 %vm116_vm0, %v4873_v60 }
0x1084   :  { %3887 = vmatmul.msk.f32.gmra.mxu1 %vm116_vm0, %v4873_v60 }
0x108b   :  { %3889 = vmatmul.msk.f32.vlgmr.msra.gmra.mxu3 %vm267_vm8, %v4881_v2 }
0x10ec   :  { %v2107_v7 = vpop.permute.xlu1 %2106 }
0x1100   :  { %v4885_v6 = vpop.f32.mrf.mxu0 }
0x1101   :  { %v4887_v8 = vpop.f32.mrf.mxu1  ;;  %3890 = vmatpush.xpose.msk.msrb.mxu0 %vm267_vm8, %v4885_v6 }
0x1102   :  { %2096 = vmatpush.msrb.mxu3 %v4887_v8  ;;  %v4926_v40 = vpack.i.bf16 %v4887_v8, %v4866_v57 }
0x1105   :  { %3896 = vmatpush.xpose.msk.msra.mxu0 %vm267_vm8, %v2107_v7 }
0x1106   :  { %v1930_v9 = vpop.f32.mrf.mxu3 }
0x1107   :  { %v4893_v10 = vmul.f32 0.25, %v1930_v9 }
0x1109   :  { %2132 = vrot.lane.b32.xlu1 %v4893_v10, %s4289_s8  ;;  %3891 = vmatmul.msk.f32.vlgmr.msrb.gmra.mxu0 %vm267_vm8, %v4893_v10 }
0x110e   :  { %v2004_v12 = vpop.f32.mrf.mxu3 }
0x110f   :  { %v2005_v3 = vadd.f32 %v2004_v12, %v4481_v14 }
0x1111   :  { %v2033_v16 = vsel %vm320_vm10, %v2005_v3, -inf }
0x1112   :  { %2034 = vmax.xlane.f32.xlu2 %v2033_v16 }
0x112a   :  { %2134 = vrot.lane.b32.xlu2 %v4885_v6, %s4289_s8 }
0x117b   :  { %v2133_v30 = vpop.permute.xlu1 %2132 }
0x1185   :  { %v2035_v20 = vpop.xlane.xlu2 %2034 }
0x1186   :  { %v2039_v24 = vsub.f32 %v2005_v3, %v2035_v20  ;;  %v2030_v21 = vpop.f32.mrf.mxu0 }
0x1187   :  { %v2031_v52 = vadd.f32 %v2030_v21, %v4481_v14 }
0x1188   :  { %v2041_v15 = vmul.f32 1.442695, %v2039_v24 }
0x1189   :  { %v2036_v22 = vsel %vm320_vm10, %v2031_v52, -inf }
0x118a   :  { %4131 = vpow2.f32 %v2041_v15 }
0x118d   :  { %v2135_v25 = vpop.permute.xlu2 %2134 }
0x118e   :  { %3898 = vmatpush.xpose.msk.msrb.mxu1 %vm267_vm8, %v2135_v25 }
0x1190   :  { %v4132_v26 = vpop.eup %4131 }
0x1191   :  { %v2045_v0 = vsel %vm320_vm10, %v4132_v26, 0.0 }
0x1192   :  { %2046 = vadd.xlane.f32.xlu0 %v2045_v0  ;;  %v3902_v0 = vld [vmem:[%s5341_s4 + $0x90] sm:$0xff] }
0x11a6   :  { %2104 = vrot.lane.b32.xlu0 %v4881_v2, %s4289_s8 }
0x11d0   :  { %2037 = vmax.xlane.f32.xlu0 %v2036_v22 }
0x1205   :  { %v2047_v27 = vpop.xlane.xlu0 %2046 }
0x1206   :  { %4133 = vrcp.f32 %v2047_v27 }
0x120c   :  { %v4134_v17 = vpop.eup %4133 }
0x120d   :  { %v2053_v29 = vmul.f32 %v4134_v17, %v4132_v26  ;;  %v3903_v26 = vld [vmem:[%s5341_s4 + $0x98] sm:$0xff] }
0x120e   :  { %2259 = vmatpush.msrb.mxu0 %v3903_v26 }
0x120f   :  { %3892 = vmatmul.msk.f32.vlgmr.msra.gmra.mxu1 %vm320_vm10, %v2053_v29 }
0x1210   :  { %2288 = vmatpush.msra.mxu1 %v3895_v32  ;;  %2260 = vmatpush.msrb.mxu0 %v3902_v0 }
0x1212   :  { %2289 = vmatpush.msra.mxu1 %v3894_v38 }
0x1217   :  { %3899 = vmatmul.msk.f32.vlgmr.msrb.gmra.mxu1 %vm267_vm8, %v2133_v30 }
0x1218   :  { %v2105_v31 = vpop.permute.xlu0 %2104 }
0x1219   :  { %3897 = vmatmul.msk.f32.vlgmr.msra.gmra.mxu0 %vm267_vm8, %v2105_v31 }
0x1243   :  { %v2038_v34 = vpop.xlane.xlu0 %2037 }
0x1244   :  { %v2040_v33 = vsub.f32 %v2031_v52, %v2038_v34 }
0x1246   :  { %v2043_v56 = vmul.f32 1.442695, %v2040_v33 }
0x1248   :  { %4135 = vpow2.f32 %v2043_v56 }
0x124e   :  { %v4136_v35 = vpop.eup %4135 }
0x124f   :  { %v2048_v36 = vsel %vm320_vm10, %v4136_v35, 0.0 }
0x1250   :  { %2049 = vadd.xlane.f32.xlu2 %v2048_v36 }
0x128c   :  { %v2075_v49 = vpop.f32.mrf.mxu1 }
0x128d   :  { %3906 = vmatmul.msk.f32.vlgmr.msra.gmra.mxu1 %vm267_vm8, %v2075_v49 }
0x1294   :  { %v2157_v28 = vpop.f32.mrf.mxu1 }
0x1295   :  { %v2158_v51 = vadd.f32 %v2157_v28, %v4481_v14 }
0x1296   :  { %v2129_v53 = vpop.f32.mrf.mxu0 }
0x1297   :  { %v2130_v39 = vadd.f32 %v2129_v53, %v4481_v14  ;;  %v2163_v23 = vsel %vm320_vm10, %v2158_v51, -inf }
0x1298   :  { %2164 = vmax.xlane.f32.xlu0 %v2163_v23 }
0x1299   :  { %v2160_v18 = vsel %vm320_vm10, %v2130_v39, -inf }
0x129a   :  { %2161 = vmax.xlane.f32.xlu1 %v2160_v18 }
0x12ac   :  { %4025 = vrot.lane.b32.xlu0 %v4926_v40, %s4289_s8 }
0x12b3   :  { %2327 = vrot.lane.b32.xlu1 %v4885_v6, %s4291_s27 }
0x12b4   :  { %2297 = vrot.lane.b32.xlu0 %v4881_v2, %s4291_s27 }
0x12bc   :  { %2463 = vrot.lane.b32.xlu0 %v4864_v54, %s4292_s28 }
0x12c3   :  { %v2050_v13 = vpop.xlane.xlu2 %2049 }
0x12c4   :  { %4137 = vrcp.f32 %v2050_v13 }
0x12ca   :  { %v4138_v19 = vpop.eup %4137 }
0x12cb   :  { %v2054_v41 = vmul.f32 %v4138_v19, %v4136_v35 }
0x12cd   :  { %3893 = vmatmul.msk.f32.vlgmr.msrb.gmra.mxu3 %vm320_vm10, %v2054_v41 }
0x130a   :  { %v4960_v21 = vpop.f32.mrf.mxu1 }
0x130b   :  { %v2165_v63 = vpop.xlane.xlu0 %2164 }
0x130c   :  { %v2167_v37 = vsub.f32 %v2158_v51, %v2165_v63 }
0x130d   :  { %v2162_v5 = vpop.xlane.xlu1 %2161 }
0x130e   :  { %v2170_v61 = vmul.f32 1.442695, %v2167_v37  ;;  %v2166_v4 = vsub.f32 %v2130_v39, %v2162_v5 }
0x1310   :  { %4139 = vpow2.f32 %v2170_v61  ;;  %v2168_v43 = vmul.f32 1.442695, %v2166_v4 }
0x1312   :  { %4141 = vpow2.f32 %v2168_v43 }
0x1316   :  { %v4140_v44 = vpop.eup %4139 }
0x1317   :  { %v2175_v45 = vsel %vm320_vm10, %v4140_v44, 0.0 }
0x1318   :  { %v4142_v46 = vpop.eup %4141  ;;  %2176 = vadd.xlane.f32.xlu1 %v2175_v45 }
0x1319   :  { %v2172_v47 = vsel %vm320_vm10, %v4142_v46, 0.0 }
0x131a   :  { %2173 = vadd.xlane.f32.xlu2 %v2172_v47 }
0x131e   :  { %v4026_v48 = vpop.permute.xlu0 %4025 }
0x131f   :  { %v4028_v50 = vunpack.i.h.bf16 %v4026_v48  ;;  %v4027_v55 = vunpack.i.l.bf16 %v4026_v48 }
0x1321   :  { %2204 = vmatpush.msra.mxu2 %v4027_v55  ;;  %2231 = vmatpush.msra.mxu3 %v4028_v50 }
0x1325   :  { %v2328_v58 = vpop.permute.xlu1 %2327 }
0x1326   :  { %v2298_v59 = vpop.permute.xlu0 %2297  ;;  %3910 = vmatpush.xpose.msk.msrb.mxu3 %vm267_vm8, %v2328_v58 }
0x132e   :  { %v2464_v1 = vpop.permute.xlu0 %2463 }
0x132f   :  { %3918 = vmatpush.xpose.msk.msrb.mxu1 %vm267_vm8, %v2464_v1 }
0x1331   :  { %2461 = vrot.lane.b32.xlu1 %v4881_v2, %s4292_s28 }
0x1332   :  { %2299 = vrot.lane.b32.xlu2 %v4864_v54, %s4291_s27 }
0x133a   :  { %2325 = vrot.lane.b32.xlu2 %v4893_v10, %s4291_s27 }
0x1350   :  { %v2098_v62 = vpop.f32.mrf.mxu3 }
0x1351   :  { %3907 = vmatmul.msk.f32.gmra.mxu1 %vm267_vm8, %v2098_v62 }
0x138b   :  { %v2177_v7 = vpop.xlane.xlu1 %2176 }
0x138c   :  { %4143 = vrcp.f32 %v2177_v7 }
0x138d   :  { %v2174_v9 = vpop.xlane.xlu2 %2173 }
0x138e   :  { %4145 = vrcp.f32 %v2174_v9 }
0x1392   :  { %v4144_v12 = vpop.eup %4143 }
0x1393   :  { %v2181_v3 = vmul.f32 %v4144_v12, %v4140_v44 }
0x1394   :  { %v4146_v16 = vpop.eup %4145 }
0x1395   :  { %v2180_v20 = vmul.f32 %v4146_v16, %v4142_v46  ;;  %v2300_v24 = vpop.permute.xlu2 %2299  ;;  %3901 = vmatmul.msk.f32.vlgmr.msra.gmra.mxu3 %vm320_vm10, %v2181_v3  ;;  %v3915_v46 = vld [vmem:[%s5341_s4 + $0xa8] sm:$0xff]  ;;  %v3914_v3 = vld [vmem:[%s5341_s4 + $0xa0] sm:$0xff]  ;;  %v3925_v16 = vld [vmem:[%s5341_s4 + $0xb8] sm:$0xff] }
0x1396   :  { %3908 = vmatpush.xpose.msk.msrb.mxu2 %vm267_vm8, %v2300_v24  ;;  %2450 = vmatpush.msra.mxu0 %v3915_v46 }
0x1397   :  { %3900 = vmatmul.msk.f32.vlgmr.msra.gmra.mxu2 %vm320_vm10, %v2180_v20  ;;  %v3924_v20 = vld [vmem:[%s5341_s4 + $0xb0] sm:$0xff] }
0x1398   :  { %2451 = vmatpush.msra.mxu0 %v3914_v3 }
0x139d   :  { %v2326_v15 = vpop.permute.xlu2 %2325 }
0x139e   :  { %3911 = vmatmul.msk.f32.vlgmr.msrb.gmra.mxu3 %vm267_vm8, %v2326_v15 }
0x139f   :  { %3909 = vmatmul.msk.f32.vlgmr.msrb.gmra.mxu2 %vm267_vm8, %v2298_v59 }
0x13a3   :  { %v2462_v25 = vpop.permute.xlu1 %2461 }
0x13a4   :  { %3919 = vmatmul.msk.f32.vlgmr.msrb.gmra.mxu1 %vm267_vm8, %v2462_v25 }
0x13ce   :  { %v4962_v22 = vpop.f32.mrf.mxu1 }
0x1418   :  { %v2233_v52 = vpop.f32.mrf.mxu3 }
0x141a   :  { %v2206_v27 = vpop.f32.mrf.mxu2 }
0x141b   :  { %3904 = vmatmul.msk.f32.vlgmr.msrb.gmra.mxu0 %vm267_vm8, %v2206_v27 }
0x1421   :  { %v2350_v17 = vpop.f32.mrf.mxu3  ;;  %v2486_v29 = vpop.f32.mrf.mxu1 }
0x1422   :  { %v2351_v30 = vadd.f32 %v2350_v17, %v4481_v14  ;;  %v2487_v31 = vadd.f32 %v2486_v29, %v4481_v14  ;;  %v2322_v32 = vpop.f32.mrf.mxu2 }
0x1423   :  { %v2323_v34 = vadd.f32 %v2322_v32, %v4481_v14  ;;  %3905 = vmatmul.msk.f32.gmra.mxu0 %vm267_vm8, %v2233_v52 }
0x1424   :  { %v2356_v33 = vsel %vm320_vm10, %v2351_v30, -inf  ;;  %v2517_v56 = vsel %vm320_vm10, %v2487_v31, -inf }
0x1425   :  { %2357 = vmax.xlane.f32.xlu0 %v2356_v33  ;;  %2518 = vmax.xlane.f32.xlu1 %v2517_v56  ;;  %v2353_v35 = vsel %vm320_vm10, %v2323_v34, -inf }
0x1426   :  { %2354 = vmax.xlane.f32.xlu2 %v2353_v35 }
0x1439   :  { %2491 = vrot.lane.b32.xlu0 %v4885_v6, %s4292_s28 }
0x143e   :  { %4030 = vrot.lane.b32.xlu2 %v4926_v40, %s4291_s27 }
0x1498   :  { %v2358_v36 = vpop.xlane.xlu0 %2357  ;;  %v2519_v49 = vpop.xlane.xlu1 %2518 }
0x1499   :  { %v2360_v38 = vsub.f32 %v2351_v30, %v2358_v36  ;;  %v2355_v28 = vpop.xlane.xlu2 %2354  ;;  %v2523_v51 = vsub.f32 %v2487_v31, %v2519_v49  ;;  %v2262_v30 = vpop.f32.mrf.mxu0 }
0x149a   :  { %v2359_v53 = vsub.f32 %v2323_v34, %v2355_v28  ;;  %v2292_v32 = vadd.f32 %v4960_v21, %v2262_v30 }
0x149b   :  { %v2363_v39 = vmul.f32 1.442695, %v2360_v38  ;;  %v2525_v23 = vmul.f32 1.442695, %v2523_v51 }
0x149c   :  { %v2361_v18 = vmul.f32 1.442695, %v2359_v53 }
0x149d   :  { %4147 = vpow2.f32 %v2363_v39 }
0x149e   :  { %4149 = vpow2.f32 %v2525_v23 }
0x149f   :  { %4151 = vpow2.f32 %v2361_v18 }
0x14a1   :  { %v4031_v13 = vpop.permute.xlu2 %4030  ;;  %v5023_v31 = vpop.f32.mrf.mxu0 }
0x14a2   :  { %v4033_v19 = vunpack.i.h.bf16 %v4031_v13  ;;  %v4032_v41 = vunpack.i.l.bf16 %v4031_v13 }
0x14a3   :  { %v4148_v63 = vpop.eup %4147 }
0x14a4   :  { %v4150_v37 = vpop.eup %4149  ;;  %2396 = vmatpush.msra.mxu2 %v4032_v41  ;;  %2422 = vmatpush.msra.mxu3 %v4033_v19  ;;  %v2368_v40 = vsel %vm320_vm10, %v4148_v63, 0.0 }
0x14a5   :  { %v4152_v5 = vpop.eup %4151  ;;  %2369 = vadd.xlane.f32.xlu0 %v2368_v40  ;;  %v2529_v61 = vsel %vm320_vm10, %v4150_v37, 0.0 }
0x14a6   :  { %2530 = vadd.xlane.f32.xlu1 %v2529_v61  ;;  %v2365_v4 = vsel %vm320_vm10, %v4152_v5, 0.0 }
0x14a7   :  { %2366 = vadd.xlane.f32.xlu2 %v2365_v4 }
0x14ab   :  { %v2492_v43 = vpop.permute.xlu0 %2491 }
0x14ac   :  { %3920 = vmatpush.xpose.msk.msrb.mxu2 %vm267_vm8, %v2492_v43 }
0x14b9   :  { %2627 = vrot.lane.b32.xlu0 %v4864_v54, %s4293_s21 }
0x14bf   :  { %2489 = vrot.lane.b32.xlu2 %v4893_v10, %s4292_s28  ;;  %2539 = vrot.lane.b32.xlu1 %v4866_v57, %s4292_s28 }
0x14c7   :  { %2625 = vrot.lane.b32.xlu1 %v4881_v2, %s4293_s21 }
0x1518   :  { %v2370_v44 = vpop.xlane.xlu0 %2369 }
0x1519   :  { %4153 = vrcp.f32 %v2370_v44  ;;  %v2531_v58 = vpop.xlane.xlu1 %2530 }
0x151a   :  { %v2367_v45 = vpop.xlane.xlu2 %2366 }
0x151b   :  { %4155 = vrcp.f32 %v2367_v45 }
0x151c   :  { %4157 = vrcp.f32 %v2531_v58 }
0x151f   :  { %v4154_v47 = vpop.eup %4153 }
0x1520   :  { %v2374_v48 = vmul.f32 %v4154_v47, %v4148_v63 }
0x1521   :  { %v4156_v50 = vpop.eup %4155 }
0x1522   :  { %v2373_v55 = vmul.f32 %v4156_v50, %v4152_v5  ;;  %3913 = vmatmul.msk.f32.vlgmr.msra.gmra.mxu3 %vm320_vm10, %v2374_v48  ;;  %v2490_v59 = vpop.permute.xlu2 %2489  ;;  %v4158_v1 = vpop.eup %4157  ;;  %v3935_v50 = vld [vmem:[%s5341_s4 + $0xc8] sm:$0xff] }
0x1523   :  { %v2537_v62 = vmul.f32 %v4158_v1, %v4150_v37 }
0x1524   :  { %3912 = vmatmul.msk.f32.vlgmr.msra.gmra.mxu2 %vm320_vm10, %v2373_v55  ;;  %v3934_v55 = vld [vmem:[%s5341_s4 + $0xc0] sm:$0xff] }
0x1525   :  { %2614 = vmatpush.msra.mxu2 %v3925_v16 }
0x1527   :  { %2615 = vmatpush.msra.mxu2 %v3924_v20 }
0x152b   :  { %v2628_v9 = vpop.permute.xlu0 %2627 }
0x152c   :  { %3921 = vmatmul.msk.f32.vlgmr.msrb.gmra.mxu2 %vm267_vm8, %v2490_v59 }
0x1531   :  { %v2540_v7 = vpop.permute.xlu1 %2539 }
0x1532   :  { %2560 = vmatpush.msrb.mxu3 %v2540_v7 }
0x1533   :  { %3922 = vmatmul.msk.f32.vlgmr.msrb.gmra.mxu3 %vm320_vm10, %v2537_v62 }
0x1534   :  { %3928 = vmatpush.xpose.msk.msra.mxu3 %vm267_vm8, %v2628_v9 }
0x1539   :  { %v2626_v12 = vpop.permute.xlu1 %2625 }
0x153b   :  { %3929 = vmatmul.msk.f32.vlgmr.msra.gmra.mxu3 %vm267_vm8, %v2626_v12 }
0x15a5   :  { %v2424_v15 = vpop.f32.mrf.mxu3 }
0x15a7   :  { %v2398_v24 = vpop.f32.mrf.mxu2 }
0x15a8   :  { %3916 = vmatmul.msk.f32.vlgmr.msra.gmra.mxu0 %vm267_vm8, %v2398_v24 }
0x15af   :  { %v2514_v25 = vpop.f32.mrf.mxu2 }
0x15b0   :  { %v2515_v26 = vadd.f32 %v2514_v25, %v4481_v14  ;;  %3917 = vmatmul.msk.f32.gmra.mxu0 %vm267_vm8, %v2424_v15 }
0x15b2   :  { %v2520_v0 = vsel %vm320_vm10, %v2515_v26, -inf }
0x15b3   :  { %2521 = vmax.xlane.f32.xlu2 %v2520_v0 }
0x15b6   :  { %v2562_v52 = vpop.f32.mrf.mxu3 }
0x15b7   :  { %3926 = vmatmul.msk.f32.vlgmr.msra.gmra.mxu2 %vm267_vm8, %v2562_v52 }
0x15be   :  { %v2650_v27 = vpop.f32.mrf.mxu3 }
0x15bf   :  { %v2651_v17 = vadd.f32 %v2650_v27, %v4481_v14 }
0x15c1   :  { %v2681_v29 = vsel %vm320_vm10, %v2651_v17, -inf }
0x15c2   :  { %2682 = vmax.xlane.f32.xlu0 %v2681_v29 }
0x15cb   :  { %2655 = vrot.lane.b32.xlu2 %v4885_v6, %s4293_s21 }
0x15d6   :  { %2565 = vrot.lane.b32.xlu0 %v4887_v8, %s4292_s28 }
0x15de   :  { %2653 = vrot.lane.b32.xlu0 %v4893_v10, %s4293_s21 }
0x15e6   :  { %2791 = vrot.lane.b32.xlu0 %v4864_v54, %s4294_s0 }
0x15ee   :  { %2817 = vrot.lane.b32.xlu0 %v4893_v10, %s4294_s0 }
0x1625   :  { %v2453_v34 = vpop.f32.mrf.mxu0 }
0x1626   :  { %v5026_v33 = vadd.f32 %v2453_v34, %v2292_v32  ;;  %v2522_v56 = vpop.xlane.xlu2 %2521 }
0x1627   :  { %v2524_v35 = vsub.f32 %v2515_v26, %v2522_v56 }
0x1629   :  { %v2527_v36 = vmul.f32 1.442695, %v2524_v35 }
0x162b   :  { %4159 = vpow2.f32 %v2527_v36 }
0x162d   :  { %v5041_v43 = vpop.f32.mrf.mxu0 }
0x162e   :  { %v2656_v38 = vpop.permute.xlu2 %2655 }
0x162f   :  { %3930 = vmatpush.xpose.msk.msrb.mxu0 %vm267_vm8, %v2656_v38 }
0x1631   :  { %v4160_v49 = vpop.eup %4159 }
0x1632   :  { %v2532_v28 = vsel %vm320_vm10, %v4160_v49, 0.0 }
0x1633   :  { %2533 = vadd.xlane.f32.xlu1 %v2532_v28  ;;  %2778 = vmatpush.msra.mxu0 %v3935_v50 }
0x1635   :  { %v2683_v51 = vpop.xlane.xlu0 %2682  ;;  %2779 = vmatpush.msra.mxu0 %v3934_v55 }
0x1636   :  { %v2687_v53 = vsub.f32 %v2651_v17, %v2683_v51 }
0x1638   :  { %v2689_v39 = vmul.f32 1.442695, %v2687_v53 }
0x163a   :  { %4161 = vpow2.f32 %v2689_v39  ;;  %v5067_v15 = vpop.f32.mrf.mxu2 }
0x1640   :  { %v4162_v23 = vpop.eup %4161 }
0x1641   :  { %v2693_v21 = vsel %vm320_vm10, %v4162_v23, 0.0 }
0x1642   :  { %2694 = vadd.xlane.f32.xlu2 %v2693_v21 }
0x1648   :  { %v2566_v18 = vpop.permute.xlu0 %2565 }
0x1649   :  { %2586 = vmatpush.msra.mxu1 %v2566_v18 }
0x164c   :  { %2703 = vrot.lane.b32.xlu1 %v4866_v57, %s4293_s21 }
0x1650   :  { %v2654_v13 = vpop.permute.xlu0 %2653 }
0x1651   :  { %3931 = vmatmul.msk.f32.vlgmr.msrb.gmra.mxu0 %vm267_vm8, %v2654_v13 }
0x1654   :  { %2819 = vrot.lane.b32.xlu1 %v4885_v6, %s4294_s0 }
0x1658   :  { %v2792_v4 = vpop.permute.xlu0 %2791 }
0x165a   :  { %2789 = vrot.lane.b32.xlu2 %v4881_v2, %s4294_s0 }
0x1660   :  { %v2818_v59 = vpop.permute.xlu0 %2817 }
0x16a6   :  { %v2534_v19 = vpop.xlane.xlu1 %2533 }
0x16a7   :  { %4163 = vrcp.f32 %v2534_v19 }
0x16ad   :  { %v4164_v41 = vpop.eup %4163 }
0x16ae   :  { %v2538_v63 = vmul.f32 %v4164_v41, %v4160_v49 }
0x16b0   :  { %3923 = vmatmul.msk.f32.vlgmr.msra.gmra.mxu1 %vm320_vm10, %v2538_v63 }
0x16b5   :  { %v2695_v37 = vpop.xlane.xlu2 %2694 }
0x16b6   :  { %4165 = vrcp.f32 %v2695_v37 }
0x16bc   :  { %v4166_v40 = vpop.eup %4165 }
0x16bd   :  { %v2701_v5 = vmul.f32 %v4166_v40, %v4162_v23  ;;  %v2790_v45 = vpop.permute.xlu2 %2789  ;;  %v3945_v40 = vld [vmem:[%s5341_s4 + $0xd8] sm:$0xff] }
0x16be   :  { %v2704_v61 = vpop.permute.xlu1 %2703 }
0x16bf   :  { %2724 = vmatpush.msrb.mxu1 %v2704_v61 }
0x16c0   :  { %3932 = vmatmul.msk.f32.vlgmr.msrb.gmra.mxu1 %vm320_vm10, %v2701_v5  ;;  %v3944_v5 = vld [vmem:[%s5341_s4 + $0xd0] sm:$0xff] }
0x16c1   :  { %3938 = vmatpush.xpose.msk.msra.mxu1 %vm267_vm8, %v2792_v4 }
0x16c6   :  { %v2820_v44 = vpop.permute.xlu1 %2819 }
0x16c7   :  { %3940 = vmatpush.xpose.msk.msrb.mxu2 %vm267_vm8, %v2820_v44 }
0x16c8   :  { %3939 = vmatmul.msk.f32.vlgmr.msra.gmra.mxu1 %vm267_vm8, %v2790_v45 }
0x16cb   :  { %2942 = vmatpush.msra.mxu2 %v3945_v40 }
0x16cd   :  { %2943 = vmatpush.msra.mxu2 %v3944_v5 }
0x16ce   :  { %v2678_v46 = vpop.f32.mrf.mxu0 }
0x16cf   :  { %v2679_v47 = vadd.f32 %v2678_v46, %v4481_v14 }
0x16d1   :  { %v2684_v48 = vsel %vm320_vm10, %v2679_v47, -inf }
0x16d2   :  { %2685 = vmax.xlane.f32.xlu2 %v2684_v48 }
0x172d   :  { %v2588_v58 = vpop.f32.mrf.mxu1 }
0x172e   :  { %3927 = vmatmul.msk.f32.gmra.mxu2 %vm267_vm8, %v2588_v58 }
0x1736   :  { %3941 = vmatmul.msk.f32.vlgmr.msrb.gmra.mxu2 %vm267_vm8, %v2818_v59 }
0x173d   :  { %v2726_v1 = vpop.f32.mrf.mxu1 }
0x173e   :  { %3936 = vmatmul.msk.f32.vlgmr.msra.gmra.mxu0 %vm267_vm8, %v2726_v1 }
0x1745   :  { %v2686_v62 = vpop.xlane.xlu2 %2685  ;;  %v2814_v7 = vpop.f32.mrf.mxu1 }
0x1746   :  { %v2688_v9 = vsub.f32 %v2679_v47, %v2686_v62  ;;  %v2815_v12 = vadd.f32 %v2814_v7, %v4481_v14 }
0x1748   :  { %v2691_v3 = vmul.f32 1.442695, %v2688_v9  ;;  %v2845_v16 = vsel %vm320_vm10, %v2815_v12, -inf }
0x1749   :  { %2846 = vmax.xlane.f32.xlu1 %v2845_v16  ;;  %v2295_v16 = vadd.f32 %v4962_v22, %v5023_v31 }
0x174a   :  { %4167 = vpow2.f32 %v2691_v3 }
0x1750   :  { %v4168_v20 = vpop.eup %4167 }
0x1751   :  { %v2696_v24 = vsel %vm320_vm10, %v4168_v20, 0.0 }
0x1752   :  { %2697 = vadd.xlane.f32.xlu0 %v2696_v24 }
0x1762   :  { %2729 = vrot.lane.b32.xlu1 %v4887_v8, %s4293_s21 }
0x1766   :  { %2867 = vrot.lane.b32.xlu0 %v4866_v57, %s4294_s0 }
0x176e   :  { %2953 = vrot.lane.b32.xlu0 %v4881_v2, %s4295_s2 }
0x1776   :  { %2893 = vrot.lane.b32.xlu0 %v4887_v8, %s4294_s0 }
0x17b1   :  { %v5069_v25 = vpop.f32.mrf.mxu2 }
0x17b9   :  { %v2842_v26 = vpop.f32.mrf.mxu2 }
0x17ba   :  { %v2843_v0 = vadd.f32 %v2842_v26, %v4481_v14 }
0x17bc   :  { %v2847_v52 = vpop.xlane.xlu1 %2846  ;;  %v2848_v27 = vsel %vm320_vm10, %v2843_v0, -inf }
0x17bd   :  { %v2851_v17 = vsub.f32 %v2815_v12, %v2847_v52  ;;  %2849 = vmax.xlane.f32.xlu1 %v2848_v27 }
0x17bf   :  { %v2853_v29 = vmul.f32 1.442695, %v2851_v17 }
0x17c1   :  { %4169 = vpow2.f32 %v2853_v29 }
0x17c5   :  { %v2698_v32 = vpop.xlane.xlu0 %2697 }
0x17c6   :  { %4171 = vrcp.f32 %v2698_v32 }
0x17c7   :  { %v4170_v30 = vpop.eup %4169 }
0x17c8   :  { %v2857_v34 = vsel %vm320_vm10, %v4170_v30, 0.0 }
0x17c9   :  { %2858 = vadd.xlane.f32.xlu2 %v2857_v34 }
0x17cc   :  { %v4172_v56 = vpop.eup %4171 }
0x17cd   :  { %v2702_v35 = vmul.f32 %v4172_v56, %v4168_v20  ;;  %v2460_v20 = vadd.f32 %v5041_v43, %v2295_v16 }
0x17cf   :  { %v2624_v26 = vadd.f32 %v5069_v25, %v2460_v20 }
0x17d4   :  { %v2730_v36 = vpop.permute.xlu1 %2729 }
0x17d5   :  { %2750 = vmatpush.msrb.mxu3 %v2730_v36 }
0x17d6   :  { %3031 = vrot.lane.b32.xlu1 %v4866_v57, %s4295_s2  ;;  %3933 = vmatmul.msk.f32.vlgmr.msrb.gmra.mxu3 %vm320_vm10, %v2702_v35  ;;  %v3954_v35 = vld [vmem:[%s5341_s4 + $0xe0] sm:$0xff] }
0x17d8   :  { %v2868_v38 = vpop.permute.xlu0 %2867 }
0x17d9   :  { %2888 = vmatpush.msra.mxu3 %v2868_v38 }
0x17e0   :  { %v2954_v49 = vpop.permute.xlu0 %2953 }
0x17e1   :  { %2955 = vrot.lane.b32.xlu2 %v4864_v54, %s4295_s2 }
0x17e8   :  { %v2894_v28 = vpop.permute.xlu0 %2893 }
0x17e9   :  { %2914 = vmatpush.msrb.mxu1 %v2894_v28 }
0x1830   :  { %v2850_v51 = vpop.xlane.xlu1 %2849 }
0x1831   :  { %v2852_v53 = vsub.f32 %v2843_v0, %v2850_v51 }
0x1833   :  { %v2855_v39 = vmul.f32 1.442695, %v2852_v53 }
0x1835   :  { %4173 = vpow2.f32 %v2855_v39 }
0x183b   :  { %v4174_v23 = vpop.eup %4173 }
0x183c   :  { %v2859_v21 = vpop.xlane.xlu2 %2858  ;;  %v2860_v18 = vsel %vm320_vm10, %v4174_v23, 0.0 }
0x183d   :  { %4175 = vrcp.f32 %v2859_v21  ;;  %2861 = vadd.xlane.f32.xlu2 %v2860_v18 }
0x1843   :  { %v4176_v13 = vpop.eup %4175 }
0x1844   :  { %v2865_v19 = vmul.f32 %v4176_v13, %v4170_v30  ;;  %v2956_v41 = vpop.permute.xlu2 %2955 }
0x1845   :  { %3948 = vmatpush.xpose.msk.msrb.mxu3 %vm267_vm8, %v2956_v41 }
0x1846   :  { %3942 = vmatmul.msk.f32.vlgmr.msra.gmra.mxu3 %vm320_vm10, %v2865_v19 }
0x1848   :  { %v3032_v63 = vpop.permute.xlu1 %3031 }
0x1849   :  { %3052 = vmatpush.msra.mxu1 %v3032_v63 }
0x184e   :  { %3949 = vmatmul.msk.f32.vlgmr.msrb.gmra.mxu3 %vm267_vm8, %v2954_v49 }
0x1855   :  { %2983 = vrot.lane.b32.xlu2 %v4885_v6, %s4295_s2 }
0x1859   :  { %v2752_v37 = vpop.f32.mrf.mxu3 }
0x185a   :  { %3937 = vmatmul.msk.f32.gmra.mxu0 %vm267_vm8, %v2752_v37 }
0x185d   :  { %3119 = vrot.lane.b32.xlu2 %v4864_v54, %s4281_s23 }
0x1865   :  { %3145 = vrot.lane.b32.xlu2 %v4893_v10, %s4281_s23 }
0x18b0   :  { %v2862_v61 = vpop.xlane.xlu2 %2861 }
0x18b1   :  { %4177 = vrcp.f32 %v2862_v61 }
0x18b7   :  { %v4178_v4 = vpop.eup %4177 }
0x18b8   :  { %v2866_v44 = vmul.f32 %v4178_v4, %v4174_v23  ;;  %v2984_v45 = vpop.permute.xlu2 %2983 }
0x18b9   :  { %3950 = vmatpush.xpose.msk.msrb.mxu0 %vm267_vm8, %v2984_v45 }
0x18ba   :  { %3943 = vmatmul.msk.f32.vlgmr.msrb.gmra.mxu1 %vm320_vm10, %v2866_v44 }
0x18c0   :  { %v3120_v54 = vpop.permute.xlu2 %3119 }
0x18c1   :  { %3958 = vmatpush.xpose.msk.msrb.mxu1 %vm267_vm8, %v3120_v54 }
0x18c9   :  { %v2890_v46 = vpop.f32.mrf.mxu3 }
0x18ca   :  { %3946 = vmatmul.msk.f32.vlgmr.msra.gmra.mxu2 %vm267_vm8, %v2890_v46 }
0x18d1   :  { %v2978_v47 = vpop.f32.mrf.mxu3 }
0x18d2   :  { %v2979_v48 = vadd.f32 %v2978_v47, %v4481_v14 }
0x18d4   :  { %v3009_v50 = vsel %vm320_vm10, %v2979_v48, -inf }
0x18d5   :  { %3010 = vmax.xlane.f32.xlu0 %v3009_v50 }
0x18e9   :  { %2981 = vrot.lane.b32.xlu0 %v4893_v10, %s4295_s2  ;;  %v3146_v10 = vpop.permute.xlu2 %3145 }
0x18f1   :  { %3147 = vrot.lane.b32.xlu0 %v4885_v6, %s4281_s23  ;;  %v5113_v6 = vpop.f32.mrf.mxu0 }
0x18f9   :  { %v2784_v24 = vpop.f32.mrf.mxu0 }
0x18fa   :  { %v2788_v0 = vadd.f32 %v2784_v24, %v2624_v26  ;;  %v4042_v26 = vld [vmem:[%s5342_s5 + $0x1] ss:$0 sm:$0xff] }
0x1937   :  { %v2916_v55 = vpop.f32.mrf.mxu1 }
0x1938   :  { %3947 = vmatmul.msk.f32.gmra.mxu2 %vm267_vm8, %v2916_v55 }
0x1948   :  { %v3011_v58 = vpop.xlane.xlu0 %3010 }
0x1949   :  { %v3015_v59 = vsub.f32 %v2979_v48, %v3011_v58 }
0x194b   :  { %v3017_v1 = vmul.f32 1.442695, %v3015_v59 }
0x194d   :  { %4179 = vpow2.f32 %v3017_v1  ;;  %v5115_v3 = vpop.f32.mrf.mxu2 }
0x1953   :  { %v4180_v62 = vpop.eup %4179 }
0x1954   :  { %v3021_v7 = vsel %vm320_vm10, %v4180_v62, 0.0 }
0x1955   :  { %3022 = vadd.xlane.f32.xlu1 %v3021_v7 }
0x195b   :  { %v2982_v9 = vpop.permute.xlu0 %2981 }
0x195c   :  { %3951 = vmatmul.msk.f32.vlgmr.msrb.gmra.mxu0 %vm267_vm8, %v2982_v9 }
0x1963   :  { %v3148_v12 = vpop.permute.xlu0 %3147 }
0x1964   :  { %3960 = vmatpush.xpose.msk.msrb.mxu2 %vm267_vm8, %v3148_v12  ;;  %v2623_v12 = vadd.f32 %v5067_v15, %v5026_v33 }
0x1967   :  { %3961 = vmatmul.msk.f32.vlgmr.msrb.gmra.mxu2 %vm267_vm8, %v3146_v10  ;;  %v2787_v10 = vadd.f32 %v5113_v6, %v2623_v12  ;;  %v5198_v12 = vld [vmem:[%s5346_s9 + $0x2] sm:$0x3] }
0x1969   :  { %v2951_v20 = vadd.f32 %v5115_v3, %v2787_v10  ;;  %v3993_v10 = vld [vmem:[%s5347_s10 + $0xf8] sm:$0xff] }
0x196e   :  { %3117 = vrot.lane.b32.xlu1 %v4881_v2, %s4281_s23  ;;  %v3955_v2 = vld [vmem:[%s5341_s4 + $0xe8] sm:$0xff] }
0x196f   :  { %3106 = vmatpush.msra.mxu0 %v3955_v2 }
0x1971   :  { %3107 = vmatpush.msra.mxu0 %v3954_v35 }
0x19bb   :  { %v2948_v52 = vpop.f32.mrf.mxu2 }
0x19bc   :  { %v5121_v27 = vadd.f32 %v2948_v52, %v2788_v0 }
0x19c8   :  { %v3023_v17 = vpop.xlane.xlu1 %3022 }
0x19c9   :  { %4181 = vrcp.f32 %v3023_v17 }
0x19cf   :  { %v4182_v29 = vpop.eup %4181 }
0x19d0   :  { %v3029_v30 = vmul.f32 %v4182_v29, %v4180_v62  ;;  %v3964_v62 = vld [vmem:[%s5341_s4 + $0xf0] sm:$0xff] }
0x19d2   :  { %3952 = vmatmul.msk.f32.vlgmr.msra.gmra.mxu1 %vm320_vm10, %v3029_v30 }
0x19d9   :  { %v3006_v22 = vpop.f32.mrf.mxu0 }
0x19da   :  { %v3007_v31 = vadd.f32 %v3006_v22, %v4481_v14 }
0x19dc   :  { %v3012_v43 = vsel %vm320_vm10, %v3007_v31, -inf }
0x19dd   :  { %3013 = vmax.xlane.f32.xlu1 %v3012_v43 }
0x19e0   :  { %v3118_v25 = vpop.permute.xlu1 %3117 }
0x19e1   :  { %3959 = vmatmul.msk.f32.vlgmr.msrb.gmra.mxu1 %vm267_vm8, %v3118_v25 }
0x19ea   :  { %v3170_v32 = vpop.f32.mrf.mxu2 }
0x19eb   :  { %v3171_v34 = vadd.f32 %v3170_v32, %v4481_v14 }
0x19ed   :  { %v3176_v56 = vsel %vm320_vm10, %v3171_v34, -inf }
0x19ee   :  { %3177 = vmax.xlane.f32.xlu2 %v3176_v56 }
0x1a4f   :  { %v3054_v36 = vpop.f32.mrf.mxu1 }
0x1a50   :  { %3956 = vmatmul.msk.f32.vlgmr.msra.gmra.mxu0 %vm267_vm8, %v3054_v36  ;;  %v3014_v38 = vpop.xlane.xlu1 %3013 }
0x1a51   :  { %v3016_v49 = vsub.f32 %v3007_v31, %v3014_v38 }
0x1a53   :  { %v3019_v28 = vmul.f32 1.442695, %v3016_v49  ;;  %v3356_v49 = vld [vmem:[#allocation5 + $0x78] sm:$0xff] }
0x1a54   :  { %3405 = vmatpush.msrb.mxu0 %v3356_v49 }
0x1a55   :  { %4183 = vpow2.f32 %v3019_v28  ;;  %v3353_v28 = vld [vmem:[#allocation5 + $0x60] sm:$0xff] }
0x1a5b   :  { %v4184_v51 = vpop.eup %4183 }
0x1a5c   :  { %v3024_v53 = vsel %vm320_vm10, %v4184_v51, 0.0 }
0x1a5d   :  { %3025 = vadd.xlane.f32.xlu1 %v3024_v53  ;;  %v3351_v53 = vld [vmem:[#allocation5 + $0x50] sm:$0xff] }
0x1a5e   :  { %v3142_v39 = vpop.f32.mrf.mxu1 }
0x1a5f   :  { %v3143_v23 = vadd.f32 %v3142_v39, %v4481_v14  ;;  %v3352_v39 = vld [vmem:[#allocation5 + $0x58] sm:$0xff] }
0x1a61   :  { %v3178_v21 = vpop.xlane.xlu2 %3177  ;;  %v3173_v18 = vsel %vm320_vm10, %v3143_v23, -inf }
0x1a62   :  { %v3180_v13 = vsub.f32 %v3171_v34, %v3178_v21  ;;  %3174 = vmax.xlane.f32.xlu0 %v3173_v18  ;;  %v3350_v21 = vld [vmem:[#allocation5 + $0x48] sm:$0xff] }
0x1a64   :  { %v3183_v19 = vmul.f32 1.442695, %v3180_v13 }
0x1a66   :  { %4185 = vpow2.f32 %v3183_v19 }
0x1a6c   :  { %v4186_v41 = vpop.eup %4185 }
0x1a6d   :  { %v3188_v63 = vsel %vm320_vm10, %v4186_v41, 0.0 }
0x1a6e   :  { %3189 = vadd.xlane.f32.xlu2 %v3188_v63 }
0x1a76   :  { %3057 = vrot.lane.b32.xlu0 %v4887_v8, %s4295_s2  ;;  %3195 = vrot.lane.b32.xlu1 %v4866_v57, %s4281_s23 }
0x1acd   :  { %v3109_v16 = vpop.f32.mrf.mxu0 }
0x1ace   :  { %v3115_v24 = vadd.f32 %v3109_v16, %v2951_v20  ;;  %v3992_v16 = vld [vmem:[%s5347_s10 + $0xf0] sm:$0xff]  ;;  %v3361_v20 = vperm.slane %v5198_v12, 1 }
0x1ad0   :  { %v3026_v5 = vpop.xlane.xlu1 %3025 }
0x1ad5   :  { %v3175_v37 = vpop.xlane.xlu0 %3174 }
0x1ad6   :  { %v3179_v40 = vsub.f32 %v3143_v23, %v3175_v37  ;;  %v3349_v23 = vld [vmem:[#allocation5 + $0x40] sm:$0xff] }
0x1ad8   :  { %v3181_v14 = vmul.f32 1.442695, %v3179_v40 }
0x1ada   :  { %4187 = vpow2.f32 %v3181_v14 }
0x1adb   :  { %4189 = vrcp.f32 %v3026_v5 }
0x1ae0   :  { %v4188_v61 = vpop.eup %4187 }
0x1ae1   :  { %v3185_v4 = vsel %vm320_vm10, %v4188_v61, 0.0  ;;  %v4190_v44 = vpop.eup %4189  ;;  %v3190_v57 = vpop.xlane.xlu2 %3189 }
0x1ae2   :  { %3186 = vadd.xlane.f32.xlu2 %v3185_v4  ;;  %v3030_v45 = vmul.f32 %v4190_v44, %v4184_v51  ;;  %4191 = vrcp.f32 %v3190_v57  ;;  %v3354_v51 = vld [vmem:[#allocation5 + $0x68] sm:$0xff] }
0x1ae3   :  { %3406 = vmatpush.msrb.mxu0 %v3354_v51  ;;  %v3982_v51 = vld [vmem:[%s5347_s10 + $0xa0] sm:$0xff] }
0x1ae5   :  { %3407 = vmatpush.msrb.mxu0 %v3352_v39 }
0x1ae7   :  { %3408 = vmatpush.msrb.mxu0 %v3350_v21  ;;  %v3981_v21 = vld [vmem:[%s5347_s10 + $0x98] sm:$0xff] }
0x1ae8   :  { %v3058_v54 = vpop.permute.xlu0 %3057  ;;  %v3196_v46 = vpop.permute.xlu1 %3195 }
0x1ae9   :  { %3078 = vmatpush.msra.mxu3 %v3058_v54  ;;  %v4192_v48 = vpop.eup %4191 }
0x1aea   :  { %3953 = vmatmul.msk.f32.vlgmr.msra.gmra.mxu3 %vm320_vm10, %v3030_v45  ;;  %v3194_v55 = vmul.f32 %v4192_v48, %v4186_v41 }
0x1aeb   :  { %3216 = vmatpush.msrb.mxu3 %v3196_v46  ;;  %v4043_v46 = vld [vmem:[%s5343_s6 + $0x1] ss:$0 sm:$0xff] }
0x1afa   :  { %3221 = vrot.lane.b32.xlu2 %v4887_v8, %s4281_s23  ;;  %v3965_v8 = vld [vmem:[%s5341_s4 + $0xf8] sm:$0xff] }
0x1afb   :  { %3270 = vmatpush.msra.mxu2 %v3965_v8 }
0x1afd   :  { %3271 = vmatpush.msra.mxu2 %v3964_v62 }
0x1b55   :  { %v3187_v47 = vpop.xlane.xlu2 %3186 }
0x1b56   :  { %4193 = vrcp.f32 %v3187_v47 }
0x1b5c   :  { %v4194_v50 = vpop.eup %4193 }
0x1b5d   :  { %v3193_v58 = vmul.f32 %v4194_v50, %v4188_v61  ;;  %v3222_v59 = vpop.permute.xlu2 %3221 }
0x1b5e   :  { %3242 = vmatpush.msra.mxu1 %v3222_v59 }
0x1b5f   :  { %3962 = vmatmul.msk.f32.vlgmr.msrb.gmra.mxu3 %vm320_vm10, %v3193_v58  ;;  %3963 = vmatmul.msk.f32.vlgmr.msra.gmra.mxu1 %vm320_vm10, %v3194_v55 }
0x1b60   :  { %3528 = vmatpush.msrb.mxu1 %v3993_v10 }
0x1b62   :  { %3529 = vmatpush.msrb.mxu1 %v3992_v16 }
0x1b6d   :  { %v3080_v1 = vpop.f32.mrf.mxu3 }
0x1b6e   :  { %3957 = vmatmul.msk.f32.gmra.mxu0 %vm267_vm8, %v3080_v1 }
0x1bdc   :  { %v3244_v9 = vpop.f32.mrf.mxu1 }
0x1be2   :  { %v3218_v7 = vpop.f32.mrf.mxu3 }
0x1be3   :  { %3966 = vmatmul.msk.f32.vlgmr.msra.gmra.mxu2 %vm267_vm8, %v3218_v7 }
0x1beb   :  { %3967 = vmatmul.msk.f32.gmra.mxu2 %vm267_vm8, %v3244_v9  ;;  %v3112_v2 = vpop.f32.mrf.mxu0 }
0x1bec   :  { %v3116_v30 = vadd.f32 %v3112_v2, %v5121_v27 }
0x1c66   :  { %v3273_v0 = vpop.f32.mrf.mxu2 }
0x1c67   :  { %v3279_v52 = vadd.f32 %v3273_v0, %v3115_v24  ;;  %v3991_v24 = vld [vmem:[%s5347_s10 + $0xe8] sm:$0xff]  ;;  %v3990_v0 = vld [vmem:[%s5347_s10 + $0xe0] sm:$0xff] }
0x1c68   :  { %3530 = vmatpush.msrb.mxu1 %v3991_v24 }
0x1c69   :  { %v3286_v17 = vadd.f32 %v4042_v26, %v3279_v52 }
0x1c6a   :  { %3531 = vmatpush.msrb.mxu1 %v3990_v0 }
0x1c6b   :  { %v3288_v29 = vadd.f32 %v3286_v17, %v4855_v42  ;;  %v3989_v17 = vld [vmem:[%s5347_s10 + $0xd8] sm:$0xff] }
0x1c6c   :  { %3532 = vmatpush.msrb.mxu1 %v3989_v17 }
0x1c6d   :  { %v3294_v33 = vsel %vm116_vm0, %v3288_v29, 0.0 }
0x1c6e   :  { %3295 = vadd.xlane.f32.xlu0 %v3294_v33  ;;  %v3276_v15 = vpop.f32.mrf.mxu2  ;;  %v3987_v33 = vld [vmem:[%s5347_s10 + $0xc8] sm:$0xff] }
0x1c6f   :  { %v3280_v6 = vadd.f32 %v3276_v15, %v3116_v30 }
0x1c71   :  { %v3287_v22 = vadd.f32 %v4042_v26, %v3280_v6 }
0x1c73   :  { %v3289_v3 = vadd.f32 %v3287_v22, %v4873_v60  ;;  %v3355_v60 = vld [vmem:[#allocation5 + $0x70] sm:$0xff]  ;;  %v3986_v22 = vld [vmem:[%s5347_s10 + $0xc0] sm:$0xff] }
0x1c74   :  { %3382 = vmatpush.msra.mxu3 %v3355_v60 }
0x1c75   :  { %v3297_v31 = vsel %vm116_vm0, %v3289_v3, 0.0 }
0x1c76   :  { %3298 = vadd.xlane.f32.xlu1 %v3297_v31  ;;  %3383 = vmatpush.msra.mxu3 %v3353_v28 }
0x1c78   :  { %3384 = vmatpush.msra.mxu3 %v3351_v53 }
0x1c7a   :  { %3385 = vmatpush.msra.mxu3 %v3349_v23 }
0x1ce1   :  { %v3296_v43 = vpop.xlane.xlu0 %3295 }
0x1ce2   :  { %v3300_v25 = vmul.f32 %v3296_v43, %v4412_v11 }
0x1ce4   :  { %v3302_v32 = vsub.f32 %v3288_v29, %v3300_v25  ;;  %v3988_v29 = vld [vmem:[%s5347_s10 + $0xd0] sm:$0xff]  ;;  %v3985_v25 = vld [vmem:[%s5347_s10 + $0xb8] sm:$0xff] }
0x1ce5   :  { %3533 = vmatpush.msrb.mxu1 %v3988_v29 }
0x1ce6   :  { %v3304_v34 = vmul.f32 %v3302_v32, %v3302_v32 }
0x1ce7   :  { %3534 = vmatpush.msrb.mxu1 %v3987_v33 }
0x1ce8   :  { %v3306_v42 = vsel %vm116_vm0, %v3304_v34, 0.0 }
0x1ce9   :  { %3307 = vadd.xlane.f32.xlu2 %v3306_v42  ;;  %v3299_v27 = vpop.xlane.xlu1 %3298  ;;  %3535 = vmatpush.msrb.mxu1 %v3986_v22 }
0x1cea   :  { %v3301_v56 = vmul.f32 %v3299_v27, %v4412_v11  ;;  %v3984_v27 = vld [vmem:[%s5347_s10 + $0xb0] sm:$0xff] }
0x1ceb   :  { %3536 = vmatpush.msrb.mxu1 %v3985_v25 }
0x1cec   :  { %v3303_v35 = vsub.f32 %v3289_v3, %v3301_v56 }
0x1ced   :  { %3537 = vmatpush.msrb.mxu1 %v3984_v27 }
0x1cee   :  { %v3305_v36 = vmul.f32 %v3303_v35, %v3303_v35 }
0x1cf0   :  { %v3309_v38 = vsel %vm116_vm0, %v3305_v36, 0.0 }
0x1cf1   :  { %3310 = vadd.xlane.f32.xlu0 %v3309_v38  ;;  %v3983_v38 = vld [vmem:[%s5347_s10 + $0xa8] sm:$0xff] }
0x1cf2   :  { %3538 = vmatpush.msrb.mxu1 %v3983_v38 }
0x1cf4   :  { %3539 = vmatpush.msrb.mxu1 %v3982_v51 }
0x1cf6   :  { %3540 = vmatpush.msrb.mxu1 %v3981_v21 }
0x1d5c   :  { %v3308_v18 = vpop.xlane.xlu2 %3307 }
0x1d5d   :  { %v3312_v13 = vmul.f32 %v3308_v18, %v4412_v11 }
0x1d5f   :  { %v3314_v19 = vadd.f32 1e-05, %v3312_v13 }
0x1d61   :  { %4195 = vrsqrt.f32 %v3314_v19  ;;  %vm3322_vm10 = vweird.f32 %v3314_v19 }
0x1d64   :  { %v3311_v41 = vpop.xlane.xlu0 %3310 }
0x1d65   :  { %v3313_v63 = vmul.f32 %v3311_v41, %v4412_v11  ;;  %v4044_v11 = vld [vmem:[%s5344_s7 + $0x1] ss:$0 sm:$0xff] }
0x1d67   :  { %v4196_v37 = vpop.eup %4195  ;;  %v3315_v40 = vadd.f32 1e-05, %v3313_v63  ;;  %v3980_v63 = vld [vmem:[%s5347_s10 + $0x90] sm:$0xff] }
0x1d68   :  { %v3317_v14 = vmul.f32 %v4196_v37, %v3314_v19  ;;  %vm3323_vm8 = vweird.f32 %v4196_v37  ;;  %3541 = vmatpush.msrb.mxu1 %v3980_v63 }
0x1d69   :  { %4197 = vrsqrt.f32 %v3315_v40  ;;  %vm3324_vm3 = vmor %vm3322_vm10, %vm3323_vm8  ;;  %vm3332_vm5 = vweird.f32 %v3315_v40  ;;  %vm3758_vm8 = vcmask 326656   ;;  %vm3782_vm10 = vcmask 1024  }
0x1d6a   :  { %v3318_v5 = vmul.f32 %v4196_v37, %v3317_v14 }
0x1d6c   :  { %v3319_v61 = vmul.f32 0.5, %v3318_v5  ;;  %v3979_v5 = vld [vmem:[%s5347_s10 + $0x88] sm:$0xff] }
0x1d6d   :  { %3542 = vmatpush.msrb.mxu1 %v3979_v5 }
0x1d6e   :  { %v3320_v4 = vsub.f32 1.5, %v3319_v61 }
0x1d6f   :  { %v4198_v44 = vpop.eup %4197 }
0x1d70   :  { %v3321_v45 = vmul.f32 %v4196_v37, %v3320_v4  ;;  %v3327_v54 = vmul.f32 %v4198_v44, %v3315_v40  ;;  %vm3333_vm4 = vweird.f32 %v4198_v44 }
0x1d71   :  { %vm3334_vm6 = vmor %vm3332_vm5, %vm3333_vm4 }
0x1d72   :  { %v3325_v57 = vsel %vm3324_vm3, %v4196_v37, %v3321_v45  ;;  %v3328_v47 = vmul.f32 %v4198_v44, %v3327_v54  ;;  %v3978_v45 = vld [vmem:[%s5347_s10 + $0x80] sm:$0xff] }
0x1d73   :  { %v3336_v48 = vmul.f32 %v3325_v57, %v3302_v32  ;;  %3543 = vmatpush.msrb.mxu1 %v3978_v45  ;;  %v3560_v45 = vld [vmem:[#allocation7 + $0x30] sm:$0xff] }
0x1d74   :  { %v3329_v50 = vmul.f32 0.5, %v3328_v47 }
0x1d75   :  { %v3341_v55 = vmul.f32 %v4043_v46, %v3336_v48 }
0x1d76   :  { %v3330_v58 = vsub.f32 1.5, %v3329_v50 }
0x1d77   :  { %v5183_v59 = vadd.f32 %v4044_v11, %v3341_v55 }
0x1d78   :  { %v3331_v1 = vmul.f32 %v4198_v44, %v3330_v58 }
0x1d79   :  { %3972 = vmatmul.msk.f32.vlgmr.msra.gmra.mxu3 %vm116_vm0, %v5183_v59  ;;  %3974 = vmatmul.msk.f32.vlgmr.msrb.gmra.mxu0 %vm116_vm0, %v5183_v59 }
0x1d7a   :  { %v3335_v8 = vsel %vm3334_vm6, %v4198_v44, %v3331_v1 }
0x1d7b   :  { %v3337_v62 = vmul.f32 %v3335_v8, %v3303_v35 }
0x1d7d   :  { %v3342_v7 = vmul.f32 %v4043_v46, %v3337_v62 }
0x1d7f   :  { %v5189_v9 = vadd.f32 %v4044_v11, %v3342_v7 }
0x1d81   :  { %3973 = vmatmul.msk.f32.gmra.mxu3 %vm116_vm0, %v5189_v9  ;;  %3975 = vmatmul.msk.f32.gmra.mxu0 %vm116_vm0, %v5189_v9 }
0x1df6   :  { %v3410_v26 = vpop.f32.mrf.mxu0 }
0x1df7   :  { %v5213_v52 = vadd.f32 %v3410_v26, %v3361_v20 }
0x1df9   :  { %v5219_v2 = vmul.f32 0.70710677, %v5213_v52 }
0x1dfb   :  { %v3420_v30 = vmul.f32 %v5219_v2, %v5219_v2 }
0x1dfd   :  { %v3421_v15 = vmin.f32 %v3420_v30, 16.0 }
0x1dfe   :  { %v3413_v6 = vpop.f32.mrf.mxu0 }
0x1dff   :  { %v3422_v3 = vmul.f32 2.1237322e-06, %v3421_v15  ;;  %v3433_v31 = vmul.f32 3.8918573e-05, %v3421_v15  ;;  %v5232_v43 = vadd.f32 %v3413_v6, %v3361_v20 }
0x1e01   :  { %v3423_v32 = vadd.f32 0.00028619796, %v3422_v3  ;;  %v3434_v34 = vadd.f32 0.001143296, %v3433_v31  ;;  %v5238_v42 = vmul.f32 0.70710677, %v5232_v43 }
0x1e03   :  { %v3424_v56 = vmul.f32 %v3423_v32, %v3421_v15  ;;  %v3435_v35 = vmul.f32 %v3434_v34, %v3421_v15  ;;  %v3460_v36 = vmul.f32 %v5238_v42, %v5238_v42 }
0x1e05   :  { %v3436_v60 = vadd.f32 0.014752088, %v3435_v35  ;;  %v3425_v49 = vadd.f32 0.0036580483, %v3424_v56  ;;  %v3461_v28 = vmin.f32 %v3460_v36, 16.0  ;;  %v3360_v35 = vperm.slane %v5198_v12, 0  ;;  %v3387_v36 = vpop.f32.mrf.mxu3 }
0x1e07   :  { %v3437_v53 = vmul.f32 %v3436_v60, %v3421_v15  ;;  %v3462_v39 = vmul.f32 2.1237322e-06, %v3461_v28  ;;  %v3473_v23 = vmul.f32 3.8918573e-05, %v3461_v28  ;;  %v3426_v13 = vmul.f32 %v3425_v49, %v3421_v15 }
0x1e08   :  { %v3388_v21 = vadd.f32 %v3387_v36, %v3360_v35  ;;  %v3720_v36 = vld [vmem:[%s5351_s14 + $0x48] sm:$0xff] }
0x1e09   :  { %v3438_v18 = vadd.f32 0.112945676, %v3437_v53  ;;  %v3463_v19 = vadd.f32 0.00028619796, %v3462_v39  ;;  %v3474_v41 = vadd.f32 0.001143296, %v3473_v23 }
0x1e0a   :  { %v3427_v4 = vadd.f32 0.05243302, %v3426_v13  ;;  %v3416_v39 = vmul.f32 0.5, %v5213_v52 }
0x1e0b   :  { %v3439_v37 = vmul.f32 %v3438_v18, %v3421_v15  ;;  %v3464_v40 = vmul.f32 %v3463_v19, %v3461_v28  ;;  %v3475_v14 = vmul.f32 %v3474_v41, %v3461_v28 }
0x1e0c   :  { %v3428_v11 = vmul.f32 %v3427_v4, %v3421_v15 }
0x1e0d   :  { %v3440_v61 = vadd.f32 0.4994258, %v3439_v37  ;;  %v3476_v44 = vadd.f32 0.014752088, %v3475_v14  ;;  %v3465_v46 = vadd.f32 0.0036580483, %v3464_v40  ;;  %v3390_v40 = vpop.f32.mrf.mxu3 }
0x1e0e   :  { %v3429_v58 = vadd.f32 0.18741608, %v3428_v11  ;;  %v3417_v14 = vmul.f32 0.5, %v5232_v43  ;;  %v3391_v5 = vadd.f32 %v3390_v40, %v3360_v35  ;;  %v3558_v11 = vld [vmem:[#allocation7 + $0x20] sm:$0xff]  ;;  %v3554_v43 = vld [vmem:[#allocation7 + $0x8] sm:$0xff] }
0x1e0f   :  { %v3441_v54 = vmul.f32 %v3440_v61, %v3421_v15  ;;  %v3477_v57 = vmul.f32 %v3476_v44, %v3461_v28  ;;  %v3466_v50 = vmul.f32 %v3465_v46, %v3461_v28  ;;  %v3561_v44 = vld [vmem:[#allocation7 + $0x38] sm:$0xff]  ;;  %v3559_v46 = vld [vmem:[#allocation7 + $0x28] sm:$0xff] }
0x1e10   :  { %v3430_v10 = vmul.f32 %v3429_v58, %v3421_v15  ;;  %3581 = vmatpush.msrb.mxu2 %v3561_v44  ;;  %v3648_v58 = vld [vmem:[#allocation7 + $0x78] sm:$0xff]  ;;  %v3750_v44 = vld [vmem:[%s5353_s16 + $0x8] sm:$0xff] }
0x1e11   :  { %v3442_v47 = vadd.f32 1.0, %v3441_v54  ;;  %v3478_v48 = vadd.f32 0.112945676, %v3477_v57  ;;  %v3467_v8 = vadd.f32 0.05243302, %v3466_v50  ;;  %v3556_v54 = vld [vmem:[#allocation7 + $0x18] sm:$0xff] }
0x1e12   :  { %v3431_v17 = vadd.f32 1.1283791, %v3430_v10  ;;  %3582 = vmatpush.msrb.mxu2 %v3560_v45  ;;  %3605 = vmatpush.msrb.mxu3 %v3556_v54  ;;  %v3555_v57 = vld [vmem:[#allocation7 + $0x10] sm:$0xff]  ;;  %v3553_v50 = vld [vmem:[#allocation7] sm:$0xff]  ;;  %v4047_v54 = vld [vmem:[%s5352_s15] ss:$0 sm:$0xff] }
0x1e13   :  { %4199 = vrcp.f32 %v3442_v47  ;;  %v3479_v55 = vmul.f32 %v3478_v48, %v3461_v28  ;;  %v3468_v24 = vmul.f32 %v3467_v8, %v3461_v28  ;;  %v3454_v0 = vand.u32 2147483648, %v3442_v47  ;;  %v3615_v48 = vld [vmem:[#allocation7 + $0x48] sm:$0xff]  ;;  %v3679_v8 = vld [vmem:[#allocation7 + $0x98] sm:$0xff]  ;;  %v3645_v10 = vld [vmem:[#allocation7 + $0x60] sm:$0xff] }
0x1e14   :  { %v3452_v30 = vand.u32 2147483647, %v3442_v47  ;;  %vm3448_vm9 = vweird.f32 %v3442_v47  ;;  %v3432_v31 = vmul.f32 %v3431_v17, %v5219_v2  ;;  %3583 = vmatpush.msrb.mxu2 %v3559_v46  ;;  %3606 = vmatpush.msrb.mxu3 %v3555_v57  ;;  %v3749_v45 = vld [vmem:[%s5353_s16] sm:$0xff] }
0x1e15   :  { %v3480_v1 = vadd.f32 0.4994258, %v3479_v55  ;;  %v3469_v33 = vadd.f32 0.18741608, %v3468_v24  ;;  %v3455_v22 = vor.u32 1.1754944e-38, %v3454_v0  ;;  %v3614_v55 = vld [vmem:[#allocation7 + $0x40] sm:$0xff] }
0x1e16   :  { %vm3453_vm12 = vcmp.eq.f32.partialorder %v3452_v30, 8.507059e+37  ;;  %3584 = vmatpush.msrb.mxu2 %v3558_v11  ;;  %3607 = vmatpush.msrb.mxu3 %v3554_v43  ;;  %v4045_v24 = vld [vmem:[%s5348_s11 + $0x1] ss:$0 sm:$0xff]  ;;  %v4048_v57 = vld [vmem:[#allocation2] ss:$0 sm:$0xff] }
0x1e17   :  { %v3481_v62 = vmul.f32 %v3480_v1, %v3461_v28  ;;  %v3470_v32 = vmul.f32 %v3469_v33, %v3461_v28  ;;  %v3647_v1 = vld [vmem:[#allocation7 + $0x70] sm:$0xff] }
0x1e18   :  { %3666 = vmatpush.msra.mxu2 %v3648_v58  ;;  %3608 = vmatpush.msrb.mxu3 %v3553_v50 }
0x1e19   :  { %v4200_v7 = vpop.eup %4199  ;;  %v3482_v20 = vadd.f32 1.0, %v3481_v62  ;;  %v3471_v49 = vadd.f32 1.1283791, %v3470_v32  ;;  %v3646_v62 = vld [vmem:[#allocation7 + $0x68] sm:$0xff] }
0x1e1a   :  { %v3444_v16 = vmul.f32 %v4200_v7, %v3442_v47  ;;  %vm3449_vm7 = vweird.f32 %v4200_v7  ;;  %v3616_v47 = vld [vmem:[#allocation7 + $0x50] sm:$0xff]  ;;  %3667 = vmatpush.msra.mxu2 %v3647_v1  ;;  %3697 = vmatpush.msra.mxu3 %v3679_v8 }
0x1e1b   :  { %4201 = vrcp.f32 %v3482_v20  ;;  %vm3450_vm11 = vmor %vm3448_vm9, %vm3449_vm7  ;;  %v3494_v60 = vand.u32 2147483648, %v3482_v20  ;;  %v3492_v53 = vand.u32 2147483647, %v3482_v20  ;;  %vm3488_vm14 = vweird.f32 %v3482_v20 }
0x1e1c   :  { %v3445_v26 = vsub.f32 1.0, %v3444_v16  ;;  %v3472_v13 = vmul.f32 %v3471_v49, %v5238_v42  ;;  %v3617_v42 = vld [vmem:[#allocation7 + $0x58] sm:$0xff]  ;;  %3668 = vmatpush.msra.mxu2 %v3646_v62  ;;  %v3677_v16 = vld [vmem:[#allocation7 + $0x88] sm:$0xff] }
0x1e1d   :  { %v3495_v28 = vor.u32 1.1754944e-38, %v3494_v60  ;;  %vm3493_vm1 = vcmp.eq.f32.partialorder %v3492_v53, 8.507059e+37  ;;  %3635 = vmatpush.msra.mxu0 %v3617_v42  ;;  %v3718_v60 = vld [vmem:[%s5351_s14 + $0x38] sm:$0xff]  ;;  %v3717_v49 = vld [vmem:[%s5351_s14 + $0x30] sm:$0xff]  ;;  %v3715_v53 = vld [vmem:[%s5351_s14 + $0x20] sm:$0xff] }
0x1e1e   :  { %v3446_v29 = vmul.f32 %v4200_v7, %v3445_v26  ;;  %3669 = vmatpush.msra.mxu2 %v3645_v10 }
0x1e1f   :  { %3636 = vmatpush.msra.mxu0 %v3616_v47 }
0x1e20   :  { %v3447_v6 = vadd.f32 %v4200_v7, %v3446_v29 }
0x1e21   :  { %v4202_v3 = vpop.eup %4201  ;;  %3637 = vmatpush.msra.mxu0 %v3615_v48 }
0x1e22   :  { %v3451_v25 = vsel %vm3450_vm11, %v4200_v7, %v3447_v6  ;;  %v3484_v34 = vmul.f32 %v4202_v3, %v3482_v20  ;;  %vm3489_vm13 = vweird.f32 %v4202_v3  ;;  %v3678_v7 = vld [vmem:[#allocation7 + $0x90] sm:$0xff]  ;;  %v3676_v20 = vld [vmem:[#allocation7 + $0x80] sm:$0xff] }
0x1e23   :  { %v3456_v15 = vsel %vm3453_vm12, %v3455_v22, %v3451_v25  ;;  %vm3490_vm15 = vmor %vm3488_vm14, %vm3489_vm13  ;;  %3638 = vmatpush.msra.mxu0 %v3614_v55  ;;  %3698 = vmatpush.msra.mxu3 %v3678_v7 }
0x1e24   :  { %v3457_v27 = vmul.f32 %v3456_v15, %v3432_v31  ;;  %v3485_v56 = vsub.f32 1.0, %v3484_v34 }
0x1e25   :  { %3699 = vmatpush.msra.mxu3 %v3677_v16  ;;  %3735 = vmatpush.msrb.mxu0 %v3720_v36 }
0x1e26   :  { %v3976_v38 = vclamps-f32 %v3457_v27, 1.0  ;;  %v3486_v51 = vmul.f32 %v4202_v3, %v3485_v56 }
0x1e27   :  { %3700 = vmatpush.msra.mxu3 %v3676_v20 }
0x1e28   :  { %v3500_v23 = vadd.f32 1.0, %v3976_v38  ;;  %v3487_v2 = vadd.f32 %v4202_v3, %v3486_v51  ;;  %v3719_v38 = vld [vmem:[%s5351_s14 + $0x40] sm:$0xff]  ;;  %v3716_v51 = vld [vmem:[%s5351_s14 + $0x28] sm:$0xff] }
0x1e29   :  { %3736 = vmatpush.msrb.mxu0 %v3719_v38 }
0x1e2a   :  { %v3502_v18 = vmul.f32 %v3500_v23, %v3416_v39  ;;  %v3491_v19 = vsel %vm3490_vm15, %v4202_v3, %v3487_v2  ;;  %v3714_v39 = vld [vmem:[%s5351_s14 + $0x18] sm:$0xff]  ;;  %v3713_v23 = vld [vmem:[%s5351_s14 + $0x10] sm:$0xff]  ;;  %v3712_v2 = vld [vmem:[%s5351_s14 + $0x8] sm:$0xff] }
0x1e2b   :  { %v3496_v41 = vsel %vm3493_vm1, %v3495_v28, %v3491_v19  ;;  %3737 = vmatpush.msrb.mxu0 %v3718_v60  ;;  %v3752_v28 = vld [vmem:[%s5353_s16 + $0x18] sm:$0xff] }
0x1e2c   :  { %v3504_v12 = vmul.f32 %v3502_v18, %v3388_v21  ;;  %v3497_v63 = vmul.f32 %v3496_v41, %v3472_v13  ;;  %v3711_v21 = vld [vmem:[%s5351_s14] sm:$0xff]  ;;  %v3751_v13 = vld [vmem:[%s5353_s16 + $0x10] sm:$0xff] }
0x1e2d   :  { %3738 = vmatpush.msrb.mxu0 %v3717_v49  ;;  %v3753_v18 = vld [vmem:[%s5353_s16 + $0x20] sm:$0xff] }
0x1e2e   :  { %3544 = vmatmul.f32.vlgmr.msrb.gmra.mxu1 %v3504_v12  ;;  %v3977_v37 = vclamps-f32 %v3497_v63, 1.0 }
0x1e2f   :  { %3739 = vmatpush.msrb.mxu0 %v3716_v51 }
0x1e30   :  { %v3501_v52 = vadd.f32 1.0, %v3977_v37 }
0x1e31   :  { %3740 = vmatpush.msrb.mxu0 %v3715_v53 }
0x1e32   :  { %v3503_v61 = vmul.f32 %v3501_v52, %v3417_v14  ;;  %v4046_v52 = vld [vmem:[%s5350_s13] ss:$0 sm:$0xff] }
0x1e33   :  { %3741 = vmatpush.msrb.mxu0 %v3714_v39 }
0x1e34   :  { %v3505_v4 = vmul.f32 %v3503_v61, %v3391_v5 }
0x1e35   :  { %3742 = vmatpush.msrb.mxu0 %v3713_v23 }
0x1e36   :  { %3547 = vmatmul.f32.gmra.mxu1 %v3505_v4 }
0x1e37   :  { %3743 = vmatpush.msrb.mxu0 %v3712_v2 }
0x1e39   :  { %3744 = vmatpush.msrb.mxu0 %v3711_v21 }
0x1eab   :  { %v3545_v26 = vpop.f32.mrf.mxu1 }
0x1eac   :  { %v3546_v0 = vadd.f32 %v4045_v24, %v3545_v26 }
0x1eae   :  { %v3551_v17 = vadd.f32 %v3546_v0, %v5183_v59 }
0x1eb0   :  { %v3564_v6 = vrot.slane %v3551_v17, 1  ;;  %v3618_v31 = vrot.slane %v3551_v17, 2  ;;  %v3649_v34 = vrot.slane %v3551_v17, 3  ;;  %v3680_v56 = vrot.slane %v3551_v17, 4 }
0x1eb3   :  { %v3548_v29 = vpop.f32.mrf.mxu1 }
0x1eb4   :  { %v3549_v30 = vadd.f32 %v4045_v24, %v3548_v29 }
0x1eb6   :  { %v3552_v33 = vadd.f32 %v3549_v30, %v5189_v9 }
0x1eb8   :  { %v3566_v22 = vsel %vm3565_vm2, %v3552_v33, %v3564_v6  ;;  %v3589_v3 = vrot.slane %v3552_v33, 7  ;;  %v3619_v25 = vrot.slane %v3552_v33, 1  ;;  %v3650_v59 = vrot.slane %v3552_v33, 2 }
0x1eb9   :  { %3995 = vmatmul.msk.f32.vlgmr.msrb.gmra.mxu2 %vm116_vm0, %v3566_v22  ;;  %v3681_v27 = vrot.slane %v3552_v33, 3 }
0x1eba   :  { %v3590_v15 = vsel %vm3565_vm2, %v3589_v3, %v3551_v17  ;;  %v3620_v32 = vsel %vm3565_vm2, %v3619_v25, %v3618_v31  ;;  %v3651_v9 = vsel %vm3565_vm2, %v3650_v59, %v3649_v34  ;;  %3773 = vmatpush.msrb.mxu2 %v3753_v18 }
0x1ebb   :  { %3996 = vmatmul.msk.f32.vlgmr.msrb.gmra.mxu3 %vm116_vm0, %v3590_v15  ;;  %3997 = vmatmul.msk.f32.vlgmr.msra.gmra.mxu0 %vm116_vm0, %v3620_v32  ;;  %v3682_v35 = vsel %vm3565_vm2, %v3681_v27, %v3680_v56 }
0x1ebc   :  { %3774 = vmatpush.msrb.mxu2 %v3752_v28 }
0x1ebe   :  { %3775 = vmatpush.msrb.mxu2 %v3751_v13 }
0x1ec0   :  { %3776 = vmatpush.msrb.mxu2 %v3750_v44 }
0x1ec1   :  { %3998 = vmatmul.msk.f32.vlgmr.msra.gmra.mxu2 %vm116_vm0, %v3651_v9 }
0x1ec2   :  { %3777 = vmatpush.msrb.mxu2 %v3749_v45 }
0x1ec3   :  { %3999 = vmatmul.msk.f32.vlgmr.msra.gmra.mxu3 %vm116_vm0, %v3682_v35  ;;  %vm3725_vm0 = vcmask 654336  }
0x1f38   :  { %v3640_v63 = vpop.f32.mrf.mxu0 }
0x1f3c   :  { %v3586_v19 = vpop.f32.mrf.mxu2 }
0x1f3e   :  { %v3610_v12 = vpop.f32.mrf.mxu3 }
0x1f3f   :  { %v3611_v41 = vadd.f32 %v3610_v12, %v3586_v19 }
0x1f41   :  { %v3643_v37 = vadd.f32 %v3640_v63, %v3611_v41 }
0x1f44   :  { %v3671_v40 = vpop.f32.mrf.mxu2 }
0x1f45   :  { %v3674_v14 = vadd.f32 %v3671_v40, %v3643_v37 }
0x1f46   :  { %v3702_v5 = vpop.f32.mrf.mxu3 }
0x1f47   :  { %v3705_v61 = vadd.f32 %v3702_v5, %v3674_v14 }
0x1f49   :  { %v3710_v4 = vadd.f32 %v4046_v52, %v3705_v61 }
0x1f4b   :  { %4000 = vmatmul.msk.f32.vlgmr.msrb.gmra.mxu0 %vm3725_vm0, %v3710_v4 }
0x1fc8   :  { %v3746_v42 = vpop.f32.mrf.mxu0 }
0x1fc9   :  { %v3747_v46 = vadd.f32 %v4047_v54, %v3746_v42 }
0x1fcb   :  { %4001 = vmatmul.msk.f32.vlgmr.msrb.gmra.mxu2 %vm3758_vm8, %v3747_v46 }
0x204e   :  { %v3779_v47 = vpop.f32.mrf.mxu2 }
0x204f   :  { %v3780_v11 = vadd.f32 %v4048_v57, %v3779_v47 }
0x2051   :  { %3783 = vst.msk [vmem:[%s5355_s18] sm:$0x3] %vm3782_vm10, %v3780_v11 }
0x2052   :  { %3788 = vsyncpa [#allocation4], 1 }
0x2053   :  { %3789 = vsyncpa [#allocation6], 1 }

</bundles_post_ra>
